<compile_context>
chip_gen: v7x
topology: tpu7x:2x2x1
jax: 0.10.0
libtpu: 0.0.40
codegen_flags: <defaults>
</compile_context>

<pallas_src>
from functools import partial

import jax
import jax.numpy as jnp
from jax.experimental import pallas as pl
from jax.experimental.pallas import tpu as pltpu


def _encoder_kernel(x_ref, w1_ref, b1_ref, w2_ref, b2_ref, w3_ref, b3_ref,
                    out_ref, *, d_latent, compute_dtype, precision):
    # In-kernel operand cast (no extra HBM traffic; no-op in the f32 path).
    x = x_ref[...].astype(compute_dtype)

    # fc1 + ReLU (bias add / accumulation in f32)
    h = jnp.dot(x, w1_ref[...], preferred_element_type=jnp.float32,
                precision=precision)
    h = jnp.maximum(h + b1_ref[...], 0.0).astype(compute_dtype)

    # TODO(synk): nn.Dropout(p=0.1) is the eval-mode identity here; training-mode
    # dropout would use pltpu.prng_seed + pltpu.stateful_bernoulli.

    # fc2 + ReLU
    h = jnp.dot(h, w2_ref[...], preferred_element_type=jnp.float32,
                precision=precision)
    h = jnp.maximum(h + b2_ref[...], 0.0).astype(compute_dtype)

    # fc3 -> fused (mu | logstd) params, lane-dense (tb, 128) tile.
    p = jnp.dot(h, w3_ref[...], preferred_element_type=jnp.float32,
                precision=precision)
    p = p + b3_ref[...]

    # Fused epilogue: exp() only on the log-std lanes [d_latent, 2*d_latent).
    lane = jax.lax.broadcasted_iota(jnp.int32, p.shape, dimension=1)
    is_logstd = (lane >= d_latent) & (lane < 2 * d_latent)
    out_ref[...] = jnp.where(is_logstd, jnp.exp(p), p)


def _cdiv(a, b):
    return -(-a // b)


def _round_up(n, m):
    return _cdiv(n, m) * m


def _pad2(a, rows, cols):
    return jnp.pad(a, ((0, rows - a.shape[0]), (0, cols - a.shape[1])))


@partial(jax.jit, static_argnames=("d_latent", "use_bf16"))
def forward_encoder(x, w1, b1, w2, b2, w3, b3, d_latent, use_bf16=False):
    """x: (B, 1, H, W) float32 of zeros/ones.  Returns (mu, std), (B, d_latent) each."""
    B = x.shape[0]
    x_flat = x.reshape(B, -1)           # nn.Flatten element order (NCHW); a view
    d_in = x_flat.shape[1]              # 784 -- left UNPADDED (full-dim lane rule)

    # Lane-aligned (128) padded dims for the tiny resident weights only.
    h1_p = _round_up(w1.shape[1], 128)  # 200 -> 256
    h2_p = _round_up(w2.shape[1], 128)  # 100 -> 128
    d_out = 2 * d_latent
    d_out_p = _round_up(d_out, 128)     # 16  -> 128

    # Batch tiling: tiles up to TB_MAX rows; >= 4 tiles once the batch is big
    # enough (keeps both v7x TensorCores busy); tb ~= cdiv(B, steps) rounded to 8
    # sublanes so batch padding is minimal.
    TB_MAX = 2048
    steps = max(1, _cdiv(B, TB_MAX))
    if B >= 256:
        steps = max(steps, 4)
    tb = _round_up(_cdiv(B, steps), 8)
    b_p = _round_up(B, tb)

    compute_dtype = jnp.bfloat16 if use_bf16 else jnp.float32
    precision = (jax.lax.Precision.DEFAULT if use_bf16
                 else jax.lax.Precision.HIGHEST)

    # x: pad only the batch axis, and only when needed.  No feature pad, no dtype
    # cast here (that would add a full extra HBM pass on the dominant array).
    x_in = x_flat if b_p == B else jnp.pad(x_flat, ((0, b_p - B), (0, 0)))

    # Weights/biases are tiny; zero-pad to lane-aligned tiles (math stays exact).
    w1_p = _pad2(w1, d_in, h1_p).astype(compute_dtype)
    w2_p = _pad2(w2, h1_p, h2_p).astype(compute_dtype)
    w3_p = _pad2(w3, h2_p, d_out_p).astype(compute_dtype)
    b1_p = _pad2(b1.reshape(1, -1), 1, h1_p).astype(jnp.float32)
    b2_p = _pad2(b2.reshape(1, -1), 1, h2_p).astype(jnp.float32)
    b3_p = _pad2(b3.reshape(1, -1), 1, d_out_p).astype(jnp.float32)

    kernel = partial(_encoder_kernel, d_latent=d_latent,
                     compute_dtype=compute_dtype, precision=precision)

    params = pl.pallas_call(
        kernel,
        out_shape=jax.ShapeDtypeStruct((b_p, d_out_p), jnp.float32),
        grid=(b_p // tb,),
        in_specs=[
            # x: batch-tiled, feature dim left at its full (unpadded) extent.
            pl.BlockSpec((tb, d_in), lambda i: (i, 0)),
            # Weights/biases: constant block index -> DMA'd once, kept resident.
            pl.BlockSpec((d_in, h1_p), lambda i: (0, 0)),
            pl.BlockSpec((1, h1_p), lambda i: (0, 0)),
            pl.BlockSpec((h1_p, h2_p), lambda i: (0, 0)),
            pl.BlockSpec((1, h2_p), lambda i: (0, 0)),
            pl.BlockSpec((h2_p, d_out_p), lambda i: (0, 0)),
            pl.BlockSpec((1, d_out_p), lambda i: (0, 0)),
        ],
        out_specs=pl.BlockSpec((tb, d_out_p), lambda i: (i, 0)),
        compiler_params=pltpu.CompilerParams(
            dimension_semantics=("parallel",),        # shard batch over v7x's 2 TCs
            vmem_limit_bytes=32 * 1024 * 1024),       # room for 2048-row x tiles
    )(x_in, w1_p, b1_p, w2_p, b2_p, w3_p, b3_p)

    # Un-pad and split; exp() already applied in-kernel to the std lanes.
    params = params[:B, :d_out]
    mu = params[:, :d_latent]
    std = params[:, d_latent:]
    return mu, std


def _linear_params(key, fan_in, fan_out):
    """Deterministic init mimicking torch.nn.Linear (kaiming-uniform style)."""
    kw, kb = jax.random.split(key)
    bound = 1.0 / jnp.sqrt(float(fan_in))
    # Stored as (fan_in, fan_out) so the kernel does x @ W (== x @ W_torch.T).
    w = jax.random.uniform(kw, (fan_in, fan_out), jnp.float32, -bound, bound)
    b = jax.random.uniform(kb, (1, fan_out), jnp.float32, -bound, bound)
    return w, b


if __name__ == "__main__":
    D_latent = 8
    B, C, H, W = 2, 1, 28, 28            # shape the module operates on
    D_in = C * H * W                     # 784

    key = jax.random.PRNGKey(0)
    kx, k1, k2, k3 = jax.random.split(key, 4)

    # Input of zeros/ones, like binarized MNIST.
    x = (jax.random.uniform(kx, (B, C, H, W)) > 0.5).astype(jnp.float32)

    w1, b1 = _linear_params(k1, D_in, 200)
    w2, b2 = _linear_params(k2, 200, 100)
    w3, b3 = _linear_params(k3, 100, 2 * D_latent)

    mu, std = forward_encoder(x, w1, b1, w2, b2, w3, b3, d_latent=D_latent)
    mu = jax.block_until_ready(mu)
    std = jax.block_until_ready(std)

    # Reference (plain JAX, same f32/HIGHEST precision) of the eval-mode forward.
    hp = jax.lax.Precision.HIGHEST
    xf = x.reshape(B, -1)
    h2 = jnp.maximum(jnp.dot(xf, w1, precision=hp) + b1, 0.0)
    h3 = jnp.maximum(jnp.dot(h2, w2, precision=hp) + b2, 0.0)
    params_ref = jnp.dot(h3, w3, precision=hp) + b3
    mu_ref = params_ref[:, :D_latent]
    std_ref = jnp.exp(params_ref[:, D_latent:])

    assert mu.shape == (B, D_latent) and std.shape == (B, D_latent)
    assert jnp.allclose(mu, mu_ref, atol=1e-5, rtol=1e-5)
    assert jnp.allclose(std, std_ref, atol=1e-5, rtol=1e-5)
    assert bool(jnp.all(std > 0.0))

    print("KERNEL_OK")
</pallas_src>

<mosaic_0001>
module attributes {stable_mosaic.version = 11 : i64} {
  func.func @_encoder_kernel(%arg0: i32, %arg1: memref<8x784xf32, #tpu.memory_space<vmem>>, %arg2: memref<784x256xf32, #tpu.memory_space<vmem>>, %arg3: memref<1x256xf32, #tpu.memory_space<vmem>>, %arg4: memref<256x128xf32, #tpu.memory_space<vmem>>, %arg5: memref<1x128xf32, #tpu.memory_space<vmem>>, %arg6: memref<128x128xf32, #tpu.memory_space<vmem>>, %arg7: memref<1x128xf32, #tpu.memory_space<vmem>>, %arg8: memref<8x128xf32, #tpu.memory_space<vmem>>) attributes {dimension_semantics = [#tpu.dimension_semantics<parallel>], iteration_bounds = array<i64: 1>, scalar_prefetch = 0 : i64, scratch_operands = 0 : i64, tpu.core_type = #tpu.core_type<tc>, window_params = [{transform_indices = @transform_0, window_bounds = array<i64: 8, 784>}, {pipeline_mode = #tpu.pipeline_mode<synchronous>, transform_indices = @transform_1, window_bounds = array<i64: 784, 256>}, {pipeline_mode = #tpu.pipeline_mode<synchronous>, transform_indices = @transform_2, window_bounds = array<i64: 1, 256>}, {pipeline_mode = #tpu.pipeline_mode<synchronous>, transform_indices = @transform_3, window_bounds = array<i64: 256, 128>}, {pipeline_mode = #tpu.pipeline_mode<synchronous>, transform_indices = @transform_4, window_bounds = array<i64: 1, 128>}, {pipeline_mode = #tpu.pipeline_mode<synchronous>, transform_indices = @transform_5, window_bounds = array<i64: 128, 128>}, {pipeline_mode = #tpu.pipeline_mode<synchronous>, transform_indices = @transform_6, window_bounds = array<i64: 1, 128>}, {transform_indices = @transform_7, window_bounds = array<i64: 8, 128>}]} {
    %c0 = arith.constant 0 : index
    %c0_0 = arith.constant 0 : index
    %0 = vector.load %arg1[%c0, %c0_0] : memref<8x784xf32, #tpu.memory_space<vmem>>, vector<8x784xf32>
    %c0_1 = arith.constant 0 : index
    %c0_2 = arith.constant 0 : index
    %1 = vector.load %arg2[%c0_1, %c0_2] : memref<784x256xf32, #tpu.memory_space<vmem>>, vector<784x256xf32>
    %cst = arith.constant dense<0.000000e+00> : vector<8x256xf32>
    %2 = tpu.matmul %0, %1, %cst {dimension_numbers = #tpu.dot_dimension_numbers<[1], [0], [0], [1], [0, 0, 1, 1], [], []>, precision = #tpu.contract_precision<fp32>} : vector<8x784xf32>, vector<784x256xf32>, vector<8x256xf32> -> vector<8x256xf32>
    %c0_3 = arith.constant 0 : index
    %c0_4 = arith.constant 0 : index
    %3 = vector.load %arg3[%c0_3, %c0_4] : memref<1x256xf32, #tpu.memory_space<vmem>>, vector<1x256xf32>
    %4 = vector.broadcast %3 : vector<1x256xf32> to vector<8x256xf32>
    %5 = arith.addf %2, %4 : vector<8x256xf32>
    %cst_5 = arith.constant 0.000000e+00 : f32
    %6 = vector.broadcast %cst_5 : f32 to vector<8x256xf32>
    %7 = arith.maximumf %5, %6 : vector<8x256xf32>
    %c0_6 = arith.constant 0 : index
    %c0_7 = arith.constant 0 : index
    %8 = vector.load %arg4[%c0_6, %c0_7] : memref<256x128xf32, #tpu.memory_space<vmem>>, vector<256x128xf32>
    %cst_8 = arith.constant dense<0.000000e+00> : vector<8x128xf32>
    %9 = tpu.matmul %7, %8, %cst_8 {dimension_numbers = #tpu.dot_dimension_numbers<[1], [0], [0], [1], [0, 0, 1, 1], [], []>, precision = #tpu.contract_precision<fp32>} : vector<8x256xf32>, vector<256x128xf32>, vector<8x128xf32> -> vector<8x128xf32>
    %c0_9 = arith.constant 0 : index
    %c0_10 = arith.constant 0 : index
    %10 = vector.load %arg5[%c0_9, %c0_10] : memref<1x128xf32, #tpu.memory_space<vmem>>, vector<1x128xf32>
    %11 = vector.broadcast %10 : vector<1x128xf32> to vector<8x128xf32>
    %12 = arith.addf %9, %11 : vector<8x128xf32>
    %cst_11 = arith.constant 0.000000e+00 : f32
    %13 = vector.broadcast %cst_11 : f32 to vector<8x128xf32>
    %14 = arith.maximumf %12, %13 : vector<8x128xf32>
    %c0_12 = arith.constant 0 : index
    %c0_13 = arith.constant 0 : index
    %15 = vector.load %arg6[%c0_12, %c0_13] : memref<128x128xf32, #tpu.memory_space<vmem>>, vector<128x128xf32>
    %cst_14 = arith.constant dense<0.000000e+00> : vector<8x128xf32>
    %16 = tpu.matmul %14, %15, %cst_14 {dimension_numbers = #tpu.dot_dimension_numbers<[1], [0], [0], [1], [0, 0, 1, 1], [], []>, precision = #tpu.contract_precision<fp32>} : vector<8x128xf32>, vector<128x128xf32>, vector<8x128xf32> -> vector<8x128xf32>
    %c0_15 = arith.constant 0 : index
    %c0_16 = arith.constant 0 : index
    %17 = vector.load %arg7[%c0_15, %c0_16] : memref<1x128xf32, #tpu.memory_space<vmem>>, vector<1x128xf32>
    %18 = vector.broadcast %17 : vector<1x128xf32> to vector<8x128xf32>
    %19 = arith.addf %16, %18 : vector<8x128xf32>
    %20 = tpu.iota {dimensions = array<i32: 1>} : vector<8x128xi32>
    %c8_i32 = arith.constant 8 : i32
    %21 = vector.broadcast %c8_i32 : i32 to vector<8x128xi32>
    %22 = arith.cmpi sge, %20, %21 : vector<8x128xi32>
    %c16_i32 = arith.constant 16 : i32
    %23 = vector.broadcast %c16_i32 : i32 to vector<8x128xi32>
    %24 = arith.cmpi slt, %20, %23 : vector<8x128xi32>
    %25 = arith.andi %22, %24 : vector<8x128xi1>
    %26 = math.exp %19 : vector<8x128xf32>
    %27 = arith.select %25, %26, %19 : vector<8x128xi1>, vector<8x128xf32>
    %c0_17 = arith.constant 0 : index
    %c0_18 = arith.constant 0 : index
    %28 = vector.load %arg8[%c0_17, %c0_18] : memref<8x128xf32, #tpu.memory_space<vmem>>, vector<8x128xf32>
    tpu.vector_store %arg8[%c0_17, %c0_18], %27 {strides = array<i32>} : memref<8x128xf32, #tpu.memory_space<vmem>>, vector<8x128xf32>,
    return
  }
  func.func @transform_0(%arg0: i32) -> (i32, i32) {
    %c0_i32 = arith.constant 0 : i32
    %c0_i32_0 = arith.constant 0 : i32
    return %arg0, %c0_i32 : i32, i32
  }
  func.func @transform_1(%arg0: i32) -> (i32, i32) {
    %c0_i32 = arith.constant 0 : i32
    %c0_i32_0 = arith.constant 0 : i32
    %c0_i32_1 = arith.constant 0 : i32
    return %c0_i32, %c0_i32_0 : i32, i32
  }
  func.func @transform_2(%arg0: i32) -> (i32, i32) {
    %c0_i32 = arith.constant 0 : i32
    %c0_i32_0 = arith.constant 0 : i32
    %c0_i32_1 = arith.constant 0 : i32
    return %c0_i32, %c0_i32_0 : i32, i32
  }
  func.func @transform_3(%arg0: i32) -> (i32, i32) {
    %c0_i32 = arith.constant 0 : i32
    %c0_i32_0 = arith.constant 0 : i32
    %c0_i32_1 = arith.constant 0 : i32
    return %c0_i32, %c0_i32_0 : i32, i32
  }
  func.func @transform_4(%arg0: i32) -> (i32, i32) {
    %c0_i32 = arith.constant 0 : i32
    %c0_i32_0 = arith.constant 0 : i32
    %c0_i32_1 = arith.constant 0 : i32
    return %c0_i32, %c0_i32_0 : i32, i32
  }
  func.func @transform_5(%arg0: i32) -> (i32, i32) {
    %c0_i32 = arith.constant 0 : i32
    %c0_i32_0 = arith.constant 0 : i32
    %c0_i32_1 = arith.constant 0 : i32
    return %c0_i32, %c0_i32_0 : i32, i32
  }
  func.func @transform_6(%arg0: i32) -> (i32, i32) {
    %c0_i32 = arith.constant 0 : i32
    %c0_i32_0 = arith.constant 0 : i32
    %c0_i32_1 = arith.constant 0 : i32
    return %c0_i32, %c0_i32_0 : i32, i32
  }
  func.func @transform_7(%arg0: i32) -> (i32, i32) {
    %c0_i32 = arith.constant 0 : i32
    %c0_i32_0 = arith.constant 0 : i32
    return %arg0, %c0_i32 : i32, i32
  }
}

</mosaic_0001>

<bundles_post_ra>
// kernel: forward_encoder.1
= control target key start
LH: loop header
LB: loop body
LE: loop exit
PB: predicated region body
PF: predicated region fallthrough
CT: control target
= control target key end

     0   :  { %vm241_vm0 = vcmask 130048   ;;  %vm8271_vm1 = vmmov 0   ;;  %s12542_s1 = inlined_call_operand.vmem [shape: f32[784,256], index: 1, kind: input, shape index: {}]   ;;  %s12543_s0 = inlined_call_operand.vmem [shape: f32[8,784], index: 0, kind: input, shape index: {}]   ;;  %s12544_s3 = inlined_call_operand.vmem [shape: f32[256,128], index: 3, kind: input, shape index: {}]   ;;  %s12545_s2 = inlined_call_operand.vmem [shape: f32[1,256], index: 2, kind: input, shape index: {}]   ;;  %s12546_s5 = inlined_call_operand.vmem [shape: f32[128,128], index: 5, kind: input, shape index: {}]   ;;  %s12547_s4 = inlined_call_operand.vmem [shape: f32[1,128], index: 4, kind: input, shape index: {}]   ;;  %s12548_s6 = inlined_call_operand.vmem [shape: f32[1,128], index: 6, kind: input, shape index: {}]   ;;  %s12549_s7 = inlined_call_operand.vmem [shape: f32[8,128], index: 7, kind: output, shape index: {}]  }
   0x1   :  { %v98_v0 = vld [vmem:[%s12542_s1 + $0x208] sm:$0xff]  ;;  %v100_v1 = vld [vmem:[%s12542_s1 + $0x218] sm:$0xff]  ;;  %v97_v2 = vld [vmem:[%s12542_s1 + $0x200] sm:$0xff] }
   0x2   :  { %v1529_v3 = vand.u32 4294901760, %v98_v0  ;;  %v1533_v4 = vand.u32 4294901760, %v100_v1  ;;  %v99_v5 = vld [vmem:[%s12542_s1 + $0x210] sm:$0xff]  ;;  %v1531_v6 = vand.u32 4294901760, %v97_v2  ;;  %v102_v7 = vld [vmem:[%s12542_s1 + $0x228] sm:$0xff]  ;;  %v104_v8 = vld [vmem:[%s12542_s1 + $0x238] sm:$0xff] }
   0x3   :  { %v1535_v9 = vand.u32 4294901760, %v99_v5  ;;  %v1537_v10 = vand.u32 4294901760, %v102_v7  ;;  %v1541_v11 = vand.u32 4294901760, %v104_v8  ;;  %v101_v12 = vld [vmem:[%s12542_s1 + $0x220] sm:$0xff]  ;;  %v103_v13 = vld [vmem:[%s12542_s1 + $0x230] sm:$0xff]  ;;  %v106_v14 = vld [vmem:[%s12542_s1 + $0x248] sm:$0xff] }
   0x4   :  { %v8339_v15 = vpack.c.bf16 %v1533_v4, %v1529_v3  ;;  %v8341_v16 = vsub.f32 %v98_v0, %v1529_v3  ;;  %v8343_v17 = vsub.f32 %v100_v1, %v1533_v4  ;;  %v8345_v18 = vsub.f32 %v97_v2, %v1531_v6  ;;  %v108_v19 = vld [vmem:[%s12542_s1 + $0x258] sm:$0xff]  ;;  %v105_v20 = vld [vmem:[%s12542_s1 + $0x240] sm:$0xff]  ;;  %v107_v21 = vld [vmem:[%s12542_s1 + $0x250] sm:$0xff] }
   0x5   :  { %v8356_v22 = vpack.c.bf16 %v1535_v9, %v1531_v6  ;;  %v8358_v23 = vsub.f32 %v99_v5, %v1535_v9  ;;  %v8360_v24 = vpack.c.bf16 %v1541_v11, %v1537_v10  ;;  %v8362_v25 = vsub.f32 %v102_v7, %v1537_v10  ;;  %v110_v26 = vld [vmem:[%s12542_s1 + $0x268] sm:$0xff]  ;;  %v112_v31 = vld [vmem:[%s12542_s1 + $0x278] sm:$0xff]  ;;  %v109_v36 = vld [vmem:[%s12542_s1 + $0x260] sm:$0xff] }
   0x6   :  { %13326 = vst [vmem:[#allocation2_spill] sm:$0xff] %v8339_v15  ;;  %13327 = vst [vmem:[#allocation3_spill] sm:$0xff] %v8341_v16  ;;  %7078 = vmatprep.subr.bf16.mxu0 %v8339_v15  ;;  %v8368_v27 = vsub.f32 %v104_v8, %v1541_v11  ;;  %v1539_v28 = vand.u32 4294901760, %v101_v12  ;;  %v1543_v29 = vand.u32 4294901760, %v103_v13  ;;  %v1545_v30 = vand.u32 4294901760, %v106_v14  ;;  %v111_v37 = vld [vmem:[%s12542_s1 + $0x270] sm:$0xff] }
   0x7   :  { %13328 = vst [vmem:[#allocation4_spill] sm:$0xff] %v8343_v17  ;;  %13329 = vst [vmem:[#allocation5_spill] sm:$0xff] %v8345_v18  ;;  %7080 = vmatpush1.bf16.msra.mxu0 %v8356_v22  ;;  %v1549_v32 = vand.u32 4294901760, %v108_v19  ;;  %v1547_v33 = vand.u32 4294901760, %v105_v20  ;;  %v1551_v34 = vand.u32 4294901760, %v107_v21  ;;  %v1553_v35 = vand.u32 4294901760, %v110_v26 }
   0x8   :  { %13330 = vst [vmem:[#allocation6_spill] sm:$0xff] %v8356_v22  ;;  %13331 = vst [vmem:[#allocation7_spill] sm:$0xff] %v8358_v23  ;;  %7082 = vmatprep.subr.bf16.mxu0 %v8360_v24  ;;  %v8381_v38 = vpack.c.bf16 %v1543_v29, %v1539_v28  ;;  %v8383_v39 = vsub.f32 %v101_v12, %v1539_v28  ;;  %v8385_v40 = vsub.f32 %v103_v13, %v1543_v29  ;;  %v114_v42 = vld [vmem:[%s12542_s1 + $0x288] sm:$0xff]  ;;  %v116_v43 = vld [vmem:[%s12542_s1 + $0x298] sm:$0xff] }
   0x9   :  { %13332 = vst [vmem:[#allocation8_spill] sm:$0xff] %v8360_v24  ;;  %13333 = vst [vmem:[#allocation9_spill] sm:$0xff] %v8362_v25  ;;  %v8387_v41 = vsub.f32 %v106_v14, %v1545_v30  ;;  %v113_v44 = vld [vmem:[%s12542_s1 + $0x280] sm:$0xff]  ;;  %v8398_v45 = vpack.c.bf16 %v1549_v32, %v1545_v30  ;;  %v8400_v46 = vsub.f32 %v108_v19, %v1549_v32  ;;  %v115_v49 = vld [vmem:[%s12542_s1 + $0x290] sm:$0xff]  ;;  %v1557_v51 = vand.u32 4294901760, %v112_v31 }
   0xa   :  { %13334 = vst [vmem:[#allocation10_spill] sm:$0xff] %v8368_v27  ;;  %13335 = vst [vmem:[#allocation11_spill] sm:$0xff] %v8381_v38  ;;  %v8402_v47 = vpack.c.bf16 %v1551_v34, %v1547_v33  ;;  %v8404_v48 = vsub.f32 %v105_v20, %v1547_v33  ;;  %v8409_v50 = vsub.f32 %v107_v21, %v1551_v34  ;;  %v1555_v53 = vand.u32 4294901760, %v109_v36  ;;  %v118_v58 = vld [vmem:[%s12542_s1 + $0x2a8] sm:$0xff]  ;;  %v120_v59 = vld [vmem:[%s12542_s1 + $0x2b8] sm:$0xff] }
   0xb   :  { %13336 = vst [vmem:[#allocation12_spill] sm:$0xff] %v8383_v39  ;;  %13337 = vst [vmem:[#allocation13_spill] sm:$0xff] %v8385_v40  ;;  %v8411_v52 = vsub.f32 %v110_v26, %v1553_v35  ;;  %7084 = vmatpush1.bf16.msra.mxu0 %v8381_v38  ;;  %v1559_v54 = vand.u32 4294901760, %v111_v37  ;;  %v1561_v55 = vand.u32 4294901760, %v114_v42  ;;  %v1565_v56 = vand.u32 4294901760, %v116_v43  ;;  %v117_v0 = vld [vmem:[%s12542_s1 + $0x2a0] sm:$0xff] }
   0xc   :  { %13338 = vst [vmem:[#allocation14_spill] sm:$0xff] %v8387_v41  ;;  %13339 = vst [vmem:[#allocation15_spill] sm:$0xff] %v8398_v45  ;;  %v1563_v57 = vand.u32 4294901760, %v113_v44  ;;  %7086 = vmatprep.subr.bf16.mxu0 %v8398_v45  ;;  %v8421_v60 = vpack.c.bf16 %v1557_v51, %v1553_v35  ;;  %v8423_v61 = vsub.f32 %v112_v31, %v1557_v51  ;;  %v1567_v63 = vand.u32 4294901760, %v115_v49  ;;  %v119_v1 = vld [vmem:[%s12542_s1 + $0x2b0] sm:$0xff]  ;;  %v122_v2 = vld [vmem:[%s12542_s1 + $0x2c8] sm:$0xff] }
   0xd   :  { %13340 = vst [vmem:[#allocation16_spill] sm:$0xff] %v8400_v46  ;;  %13341 = vst [vmem:[#allocation17_spill] sm:$0xff] %v8402_v47  ;;  %v8425_v62 = vsub.f32 %v109_v36, %v1555_v53  ;;  %v8436_v3 = vpack.c.bf16 %v1559_v54, %v1555_v53  ;;  %v8438_v4 = vsub.f32 %v111_v37, %v1559_v54  ;;  %v124_v7 = vld [vmem:[%s12542_s1 + $0x2d8] sm:$0xff]  ;;  %v121_v8 = vld [vmem:[%s12542_s1 + $0x2c0] sm:$0xff]  ;;  %v1569_v14 = vand.u32 4294901760, %v118_v58 }
   0xe   :  { %13342 = vst [vmem:[#allocation18_spill] sm:$0xff] %v8404_v48  ;;  %13343 = vst [vmem:[#allocation19_spill] sm:$0xff] %v8409_v50  ;;  %v8440_v5 = vpack.c.bf16 %v1565_v56, %v1561_v55  ;;  %v8442_v6 = vsub.f32 %v114_v42, %v1561_v55  ;;  %v123_v9 = vld [vmem:[%s12542_s1 + $0x2d0] sm:$0xff]  ;;  %v8453_v10 = vsub.f32 %v116_v43, %v1565_v56  ;;  %v1573_v19 = vand.u32 4294901760, %v120_v59  ;;  %v126_v31 = vld [vmem:[%s12542_s1 + $0x2e8] sm:$0xff] }
   0xf   :  { %13344 = vst [vmem:[#allocation20_spill] sm:$0xff] %v8411_v52  ;;  %13345 = vst [vmem:[#allocation21_spill] sm:$0xff] %v8421_v60  ;;  %v8455_v11 = vpack.c.bf16 %v1567_v63, %v1563_v57  ;;  %v8457_v12 = vsub.f32 %v113_v44, %v1563_v57  ;;  %v8459_v13 = vsub.f32 %v115_v49, %v1567_v63  ;;  %7088 = vmatpush1.bf16.msra.mxu0 %v8402_v47  ;;  %v128_v32 = vld [vmem:[%s12542_s1 + $0x2f8] sm:$0xff]  ;;  %v125_v37 = vld [vmem:[%s12542_s1 + $0x2e0] sm:$0xff] }
  0x10   :  { %13346 = vst [vmem:[#allocation22_spill] sm:$0xff] %v8423_v61  ;;  %13347 = vst [vmem:[#allocation23_spill] sm:$0xff] %v8425_v62  ;;  %v1571_v20 = vand.u32 4294901760, %v117_v0  ;;  %v1575_v21 = vand.u32 4294901760, %v119_v1  ;;  %7090 = vmatprep.subr.bf16.mxu0 %v8421_v60  ;;  %v1577_v26 = vand.u32 4294901760, %v122_v2  ;;  %v1581_v28 = vand.u32 4294901760, %v124_v7 }
  0x11   :  { %13348 = vst [vmem:[#allocation24_spill] sm:$0xff] %v8436_v3  ;;  %13349 = vst [vmem:[#allocation25_spill] sm:$0xff] %v8438_v4  ;;  %v1579_v29 = vand.u32 4294901760, %v121_v8  ;;  %v1583_v30 = vand.u32 4294901760, %v123_v9  ;;  %v8469_v33 = vpack.c.bf16 %v1573_v19, %v1569_v14  ;;  %v8471_v34 = vsub.f32 %v118_v58, %v1569_v14  ;;  %v127_v42 = vld [vmem:[%s12542_s1 + $0x2f0] sm:$0xff]  ;;  %v130_v43 = vld [vmem:[%s12542_s1 + $0x308] sm:$0xff] }
  0x12   :  { %13350 = vst [vmem:[#allocation26_spill] sm:$0xff] %v8440_v5  ;;  %13351 = vst [vmem:[#allocation27_spill] sm:$0xff] %v8442_v6  ;;  %v8473_v35 = vsub.f32 %v120_v59, %v1573_v19  ;;  %v8475_v36 = vpack.c.bf16 %v1575_v21, %v1571_v20  ;;  %v8486_v44 = vsub.f32 %v117_v0, %v1571_v20  ;;  %v132_v54 = vld [vmem:[%s12542_s1 + $0x318] sm:$0xff]  ;;  %v129_v55 = vld [vmem:[%s12542_s1 + $0x300] sm:$0xff]  ;;  %v1585_v0 = vand.u32 4294901760, %v126_v31 }
  0x13   :  { %13352 = vst [vmem:[#allocation28_spill] sm:$0xff] %v8453_v10  ;;  %13353 = vst [vmem:[#allocation29_spill] sm:$0xff] %v8455_v11  ;;  %v8488_v49 = vsub.f32 %v119_v1, %v1575_v21  ;;  %v8490_v51 = vpack.c.bf16 %v1581_v28, %v1577_v26  ;;  %v8492_v53 = vsub.f32 %v122_v2, %v1577_v26  ;;  %v131_v56 = vld [vmem:[%s12542_s1 + $0x310] sm:$0xff]  ;;  %7092 = vmatpush1.bf16.msra.mxu0 %v8436_v3  ;;  %v138_v60 = vld [vmem:[%s12542_s1 + $0x348] sm:$0xff] }
  0x14   :  { %13354 = vst [vmem:[#allocation30_spill] sm:$0xff] %v8457_v12  ;;  %13355 = vst [vmem:[#allocation31_spill] sm:$0xff] %v8459_v13  ;;  %v8504_v57 = vsub.f32 %v124_v7, %v1581_v28  ;;  %v8506_v58 = vpack.c.bf16 %v1583_v30, %v1579_v29  ;;  %v8508_v59 = vsub.f32 %v121_v8, %v1579_v29  ;;  %7094 = vmatprep.subr.bf16.mxu0 %v8440_v5  ;;  %v134_v7 = vld [vmem:[%s12542_s1 + $0x328] sm:$0xff]  ;;  %v136_v8 = vld [vmem:[%s12542_s1 + $0x338] sm:$0xff] }
  0x15   :  { %13356 = vst [vmem:[#allocation32_spill] sm:$0xff] %v8469_v33  ;;  %13357 = vst [vmem:[#allocation33_spill] sm:$0xff] %v8471_v34  ;;  %v8510_v63 = vsub.f32 %v123_v9, %v1583_v30  ;;  %v1589_v1 = vand.u32 4294901760, %v128_v32  ;;  %v1587_v2 = vand.u32 4294901760, %v125_v37  ;;  %v1591_v14 = vand.u32 4294901760, %v127_v42  ;;  %v133_v5 = vld [vmem:[%s12542_s1 + $0x320] sm:$0xff] }
  0x16   :  { %13358 = vst [vmem:[#allocation34_spill] sm:$0xff] %v8473_v35  ;;  %13359 = vst [vmem:[#allocation35_spill] sm:$0xff] %v8475_v36  ;;  %v1593_v19 = vand.u32 4294901760, %v130_v43  ;;  %v1597_v20 = vand.u32 4294901760, %v132_v54  ;;  %v1595_v21 = vand.u32 4294901760, %v129_v55  ;;  %v1599_v26 = vand.u32 4294901760, %v131_v56 }
  0x17   :  { %13360 = vst [vmem:[#allocation36_spill] sm:$0xff] %v8486_v44  ;;  %13361 = vst [vmem:[#allocation37_spill] sm:$0xff] %v8488_v49  ;;  %v8519_v9 = vpack.c.bf16 %v1589_v1, %v1585_v0  ;;  %v8521_v28 = vsub.f32 %v126_v31, %v1585_v0  ;;  %v8523_v29 = vsub.f32 %v128_v32, %v1589_v1  ;;  %v135_v3 = vld [vmem:[%s12542_s1 + $0x330] sm:$0xff]  ;;  %7096 = vmatpush1.bf16.msra.mxu0 %v8455_v11  ;;  %v140_v47 = vld [vmem:[%s12542_s1 + $0x358] sm:$0xff] }
  0x18   :  { %13362 = vst [vmem:[#allocation38_spill] sm:$0xff] %v8490_v51  ;;  %13363 = vst [vmem:[#allocation39_spill] sm:$0xff] %v8492_v53  ;;  %v8525_v30 = vpack.c.bf16 %v1591_v14, %v1587_v2  ;;  %v8537_v31 = vsub.f32 %v125_v37, %v1587_v2  ;;  %v8539_v32 = vsub.f32 %v127_v42, %v1591_v14  ;;  %v137_v45 = vld [vmem:[%s12542_s1 + $0x340] sm:$0xff]  ;;  %v139_v11 = vld [vmem:[%s12542_s1 + $0x350] sm:$0xff]  ;;  %7098 = vmatprep.subr.bf16.mxu0 %v8469_v33 }
  0x19   :  { %13364 = vst [vmem:[#allocation40_spill] sm:$0xff] %v8504_v57  ;;  %13365 = vst [vmem:[#allocation41_spill] sm:$0xff] %v8506_v58  ;;  %v8541_v0 = vpack.c.bf16 %v1597_v20, %v1593_v19  ;;  %v8543_v1 = vsub.f32 %v130_v43, %v1593_v19  ;;  %v8555_v37 = vsub.f32 %v132_v54, %v1597_v20  ;;  %v1601_v14 = vand.u32 4294901760, %v134_v7  ;;  %v142_v33 = vld [vmem:[%s12542_s1 + $0x368] sm:$0xff]  ;;  %v144_v54 = vld [vmem:[%s12542_s1 + $0x378] sm:$0xff] }
  0x1a   :  { %13366 = vst [vmem:[#allocation42_spill] sm:$0xff] %v8508_v59  ;;  %13367 = vst [vmem:[#allocation43_spill] sm:$0xff] %v8510_v63  ;;  %v8557_v42 = vpack.c.bf16 %v1599_v26, %v1595_v21  ;;  %v8559_v43 = vsub.f32 %v129_v55, %v1595_v21  ;;  %v8561_v2 = vsub.f32 %v131_v56, %v1599_v26  ;;  %v1605_v19 = vand.u32 4294901760, %v136_v8  ;;  %v141_v26 = vld [vmem:[%s12542_s1 + $0x360] sm:$0xff] }
  0x1b   :  { %13368 = vst [vmem:[#allocation44_spill] sm:$0xff] %v8519_v9  ;;  %13369 = vst [vmem:[#allocation45_spill] sm:$0xff] %v8521_v28  ;;  %v1603_v38 = vand.u32 4294901760, %v133_v5  ;;  %v1607_v24 = vand.u32 4294901760, %v135_v3  ;;  %v1609_v22 = vand.u32 4294901760, %v138_v60  ;;  %v1613_v15 = vand.u32 4294901760, %v140_v47  ;;  %7100 = vmatpush1.bf16.msra.mxu0 %v8475_v36 }
  0x1c   :  { %13370 = vst [vmem:[#allocation46_spill] sm:$0xff] %v8523_v29  ;;  %13371 = vst [vmem:[#allocation47_spill] sm:$0xff] %v8525_v30  ;;  %v8570_v55 = vpack.c.bf16 %v1605_v19, %v1601_v14  ;;  %v8572_v56 = vsub.f32 %v134_v7, %v1601_v14  ;;  %v8574_v20 = vsub.f32 %v136_v8, %v1605_v19  ;;  %v146_v36 = vld [vmem:[%s12542_s1 + $0x388] sm:$0xff]  ;;  %7102 = vmatprep.subr.bf16.mxu0 %v8490_v51  ;;  %v147_v51 = vld [vmem:[%s12542_s1 + $0x390] sm:$0xff] }
  0x1d   :  { %13372 = vst [vmem:[#allocation48_spill] sm:$0xff] %v8537_v31  ;;  %13373 = vst [vmem:[#allocation49_spill] sm:$0xff] %v8539_v32  ;;  %v1615_v32 = vand.u32 4294901760, %v139_v11  ;;  %v8576_v21 = vpack.c.bf16 %v1607_v24, %v1603_v38  ;;  %v8588_v7 = vsub.f32 %v133_v5, %v1603_v38  ;;  %v8590_v8 = vsub.f32 %v135_v3, %v1607_v24 }
  0x1e   :  { %13374 = vst [vmem:[#allocation50_spill] sm:$0xff] %v8541_v0  ;;  %13375 = vst [vmem:[#allocation51_spill] sm:$0xff] %v8543_v1  ;;  %v1611_v1 = vand.u32 4294901760, %v137_v45  ;;  %v8592_v14 = vpack.c.bf16 %v1613_v15, %v1609_v22  ;;  %v8594_v19 = vsub.f32 %v138_v60, %v1609_v22  ;;  %v8605_v38 = vsub.f32 %v140_v47, %v1613_v15  ;;  %v150_v15 = vld [vmem:[%s12542_s1 + $0x3a8] sm:$0xff] }
  0x1f   :  { %13376 = vst [vmem:[#allocation52_spill] sm:$0xff] %v8555_v37  ;;  %13377 = vst [vmem:[#allocation53_spill] sm:$0xff] %v8557_v42  ;;  %v8611_v22 = vsub.f32 %v139_v11, %v1615_v32  ;;  %v1617_v60 = vand.u32 4294901760, %v142_v33  ;;  %v1621_v5 = vand.u32 4294901760, %v144_v54  ;;  %7104 = vmatpush1.bf16.msra.mxu0 %v8506_v58  ;;  %v1631_v31 = vand.u32 4294901760, %v147_v51  ;;  %v149_v58 = vld [vmem:[%s12542_s1 + $0x3a0] sm:$0xff] }
  0x20   :  { %13378 = vst [vmem:[#allocation54_spill] sm:$0xff] %v8559_v43  ;;  %13379 = vst [vmem:[#allocation55_spill] sm:$0xff] %v8561_v2  ;;  %v143_v2 = vld [vmem:[%s12542_s1 + $0x370] sm:$0xff]  ;;  %v8607_v24 = vpack.c.bf16 %v1615_v32, %v1611_v1  ;;  %v8609_v3 = vsub.f32 %v137_v45, %v1611_v1  ;;  %v152_v45 = vld [vmem:[%s12542_s1 + $0x3b8] sm:$0xff]  ;;  %7106 = vmatprep.subr.bf16.mxu0 %v8519_v9 }
  0x21   :  { %13380 = vst [vmem:[#allocation56_spill] sm:$0xff] %v8570_v55  ;;  %13381 = vst [vmem:[#allocation57_spill] sm:$0xff] %v8572_v56  ;;  %v145_v56 = vld [vmem:[%s12542_s1 + $0x380] sm:$0xff]  ;;  %v8621_v47 = vpack.c.bf16 %v1621_v5, %v1617_v60  ;;  %v8623_v11 = vsub.f32 %v142_v33, %v1617_v60  ;;  %v8625_v32 = vsub.f32 %v144_v54, %v1621_v5  ;;  %v154_v9 = vld [vmem:[%s12542_s1 + $0x3c8] sm:$0xff] }
  0x22   :  { %13382 = vst [vmem:[#allocation58_spill] sm:$0xff] %v8574_v20  ;;  %13383 = vst [vmem:[#allocation59_spill] sm:$0xff] %v8576_v21  ;;  %v148_v20 = vld [vmem:[%s12542_s1 + $0x398] sm:$0xff]  ;;  %v1627_v37 = vand.u32 4294901760, %v145_v56 }
  0x23   :  { %13384 = vst [vmem:[#allocation60_spill] sm:$0xff] %v8588_v7  ;;  %13385 = vst [vmem:[#allocation61_spill] sm:$0xff] %v8590_v8  ;;  %v1623_v8 = vand.u32 4294901760, %v143_v2  ;;  %v1625_v7 = vand.u32 4294901760, %v146_v36  ;;  %v1629_v43 = vand.u32 4294901760, %v148_v20  ;;  %v156_v5 = vld [vmem:[%s12542_s1 + $0x3d8] sm:$0xff]  ;;  %7108 = vmatpush1.bf16.msra.mxu0 %v8525_v30 }
  0x24   :  { %13386 = vst [vmem:[#allocation62_spill] sm:$0xff] %v8592_v14  ;;  %13387 = vst [vmem:[#allocation63_spill] sm:$0xff] %v8594_v19  ;;  %v1619_v19 = vand.u32 4294901760, %v141_v26  ;;  %7110 = vmatprep.subr.bf16.mxu0 %v8541_v0  ;;  %v157_v0 = vld [vmem:[%s12542_s1 + $0x3e0] sm:$0xff]  ;;  %v159_v30 = vld [vmem:[%s12542_s1 + $0x3f0] sm:$0xff] }
  0x25   :  { %13388 = vst [vmem:[#allocation64_spill] sm:$0xff] %v8605_v38  ;;  %13389 = vst [vmem:[#allocation65_spill] sm:$0xff] %v8607_v24  ;;  %v8640_v33 = vsub.f32 %v143_v2, %v1623_v8  ;;  %v8642_v54 = vpack.c.bf16 %v1629_v43, %v1625_v7  ;;  %v8644_v60 = vsub.f32 %v146_v36, %v1625_v7  ;;  %v1633_v7 = vand.u32 4294901760, %v150_v15 }
  0x26   :  { %13390 = vst [vmem:[#allocation66_spill] sm:$0xff] %v8609_v3  ;;  %13391 = vst [vmem:[#allocation67_spill] sm:$0xff] %v8611_v22  ;;  %v8627_v1 = vpack.c.bf16 %v1623_v8, %v1619_v19  ;;  %v151_v22 = vld [vmem:[%s12542_s1 + $0x3b0] sm:$0xff]  ;;  %v8638_v3 = vsub.f32 %v141_v26, %v1619_v19  ;;  %v8655_v26 = vsub.f32 %v148_v20, %v1629_v43  ;;  %v1637_v19 = vand.u32 4294901760, %v152_v45  ;;  %v158_v43 = vld [vmem:[%s12542_s1 + $0x3e8] sm:$0xff] }
  0x27   :  { %13392 = vst [vmem:[#allocation68_spill] sm:$0xff] %v8621_v47  ;;  %13393 = vst [vmem:[#allocation69_spill] sm:$0xff] %v8623_v11  ;;  %v155_v11 = vld [vmem:[%s12542_s1 + $0x3d0] sm:$0xff]  ;;  %v8657_v2 = vpack.c.bf16 %v1631_v31, %v1627_v37  ;;  %v8659_v8 = vsub.f32 %v145_v56, %v1627_v37  ;;  %v8661_v36 = vsub.f32 %v147_v51, %v1631_v31  ;;  %v1645_v38 = vand.u32 4294901760, %v156_v5  ;;  %v160_v51 = vld [vmem:[%s12542_s1 + $0x3f8] sm:$0xff] }
  0x28   :  { %13394 = vst [vmem:[#allocation70_spill] sm:$0xff] %v8625_v32  ;;  %13395 = vst [vmem:[#allocation71_spill] sm:$0xff] %v8627_v1  ;;  %v153_v32 = vld [vmem:[%s12542_s1 + $0x3c0] sm:$0xff]  ;;  %v1647_v28 = vand.u32 4294901760, %v155_v11  ;;  %v8671_v31 = vpack.c.bf16 %v1637_v19, %v1633_v7  ;;  %v8673_v37 = vsub.f32 %v150_v15, %v1633_v7  ;;  %v8675_v56 = vsub.f32 %v152_v45, %v1637_v19  ;;  %v36_v19 = vld [vmem:[%s12542_s1 + $0x18] sm:$0xff] }
  0x29   :  { %13396 = vst [vmem:[#allocation72_spill] sm:$0xff] %v8638_v3  ;;  %13397 = vst [vmem:[#allocation73_spill] sm:$0xff] %v8640_v33  ;;  %v1639_v33 = vand.u32 4294901760, %v151_v22  ;;  %v1641_v3 = vand.u32 4294901760, %v154_v9  ;;  %v1643_v29 = vand.u32 4294901760, %v153_v32  ;;  %7112 = vmatpush1.bf16.msra.mxu0 %v8557_v42 }
  0x2a   :  { %13398 = vst [vmem:[#allocation74_spill] sm:$0xff] %v8642_v54  ;;  %13399 = vst [vmem:[#allocation75_spill] sm:$0xff] %v8644_v60  ;;  %v1635_v60 = vand.u32 4294901760, %v149_v58  ;;  %7114 = vmatprep.subr.bf16.mxu0 %v8570_v55 }
  0x2b   :  { %13400 = vst [vmem:[#allocation76_spill] sm:$0xff] %v8655_v26  ;;  %13401 = vst [vmem:[#allocation77_spill] sm:$0xff] %v8657_v2  ;;  %v8690_v15 = vsub.f32 %v151_v22, %v1639_v33  ;;  %v8692_v45 = vpack.c.bf16 %v1645_v38, %v1641_v3  ;;  %v8694_v7 = vsub.f32 %v154_v9, %v1641_v3  ;;  %v249_v26 = vand.u32 4294901760, %v36_v19 }
  0x2c   :  { %13402 = vst [vmem:[#allocation78_spill] sm:$0xff] %v8659_v8  ;;  %13403 = vst [vmem:[#allocation79_spill] sm:$0xff] %v8661_v36  ;;  %v8677_v20 = vpack.c.bf16 %v1639_v33, %v1635_v60  ;;  %v34_v36 = vld [vmem:[%s12542_s1 + $0x8] sm:$0xff]  ;;  %v8688_v8 = vsub.f32 %v149_v58, %v1635_v60  ;;  %v8706_v58 = vsub.f32 %v156_v5, %v1645_v38  ;;  %v1649_v33 = vand.u32 4294901760, %v158_v43 }
  0x2d   :  { %13404 = vst [vmem:[#allocation80_spill] sm:$0xff] %v8671_v31  ;;  %13405 = vst [vmem:[#allocation81_spill] sm:$0xff] %v8673_v37  ;;  %v35_v37 = vld [vmem:[%s12542_s1 + $0x10] sm:$0xff]  ;;  %v8708_v22 = vpack.c.bf16 %v1647_v28, %v1643_v29  ;;  %v8710_v9 = vsub.f32 %v153_v32, %v1643_v29  ;;  %v8712_v3 = vsub.f32 %v155_v11, %v1647_v28  ;;  %v1653_v60 = vand.u32 4294901760, %v160_v51  ;;  %v29_v28 = vld [vmem:[%s12543_s0 + $0x18] sm:$0xff] }
  0x2e   :  { %13406 = vst [vmem:[#allocation82_spill] sm:$0xff] %v8675_v56  ;;  %13407 = vst [vmem:[#allocation83_spill] sm:$0xff] %v8677_v20  ;;  %v33_v56 = vld [vmem:[%s12542_s1] sm:$0xff]  ;;  %v251_v59 = vand.u32 4294901760, %v35_v37  ;;  %v8717_v38 = vsub.f32 %v158_v43, %v1649_v33  ;;  %v28_v11 = vld [vmem:[%s12543_s0 + $0x10] sm:$0xff]  ;;  %7116 = vmatpush1.bf16.msra.mxu0 %v8576_v21  ;;  %v8745_v42 = vsub.f32 %v36_v19, %v249_v26 }
  0x2f   :  { %13408 = vst [vmem:[#allocation84_spill] sm:$0xff] %v8688_v8  ;;  %13409 = vst [vmem:[#allocation85_spill] sm:$0xff] %v8690_v15  ;;  %v1655_v15 = vand.u32 4294901760, %v159_v30  ;;  %v245_v8 = vand.u32 4294901760, %v34_v36  ;;  %v247_v63 = vand.u32 4294901760, %v33_v56  ;;  %v8715_v57 = vpack.c.bf16 %v1653_v60, %v1649_v33  ;;  %v38_v33 = vld [vmem:[%s12542_s1 + $0x28] sm:$0xff]  ;;  %7118 = vmatprep.subr.bf16.mxu0 %v8592_v14 }
  0x30   :  { %13410 = vst [vmem:[#allocation86_spill] sm:$0xff] %v8692_v45  ;;  %13411 = vst [vmem:[#allocation87_spill] sm:$0xff] %v8694_v7  ;;  %v1651_v7 = vand.u32 4294901760, %v157_v0  ;;  %v8719_v5 = vsub.f32 %v160_v51, %v1653_v60  ;;  %v40_v60 = vld [vmem:[%s12542_s1 + $0x38] sm:$0xff]  ;;  %v8758_v21 = vand.u32 4294901760, %v28_v11  ;;  %v37_v19 = vld [vmem:[%s12542_s1 + $0x20] sm:$0xff] }
  0x31   :  { %13412 = vst [vmem:[#allocation88_spill] sm:$0xff] %v8706_v58  ;;  %13413 = vst [vmem:[#allocation89_spill] sm:$0xff] %v8708_v22  ;;  %v8732_v55 = vsub.f32 %v159_v30, %v1655_v15  ;;  %v8734_v43 = vpack.c.bf16 %v249_v26, %v245_v8  ;;  %v8736_v51 = vsub.f32 %v34_v36, %v245_v8  ;;  %v8754_v8 = vand.u32 4294901760, %v29_v28 }
  0x32   :  { %13414 = vst [vmem:[#allocation90_spill] sm:$0xff] %v8710_v9  ;;  %13415 = vst [vmem:[#allocation91_spill] sm:$0xff] %v8712_v3  ;;  %v8721_v29 = vpack.c.bf16 %v1655_v15, %v1651_v7  ;;  %v8730_v32 = vsub.f32 %v157_v0, %v1651_v7  ;;  %v8747_v0 = vpack.c.bf16 %v251_v59, %v247_v63  ;;  %v12628_v36 = vand.u32 4294901760, %v8341_v16 }
  0x33   :  { %13416 = vst [vmem:[#allocation92_spill] sm:$0xff] %v8715_v57  ;;  %13417 = vst [vmem:[#allocation93_spill] sm:$0xff] %v8717_v38  ;;  %v8749_v30 = vsub.f32 %v33_v56, %v247_v63  ;;  %v8751_v15 = vsub.f32 %v35_v37, %v251_v59  ;;  %6694 = vmatprep.subr.bf16.mxu1 %v8734_v43  ;;  %v12631_v7 = vand.u32 4294901760, %v8343_v17  ;;  %v12641_v26 = vand.u32 4294901760, %v8345_v18 }
  0x34   :  { %13418 = vst [vmem:[#allocation94_spill] sm:$0xff] %v8719_v5  ;;  %13419 = vst [vmem:[#allocation95_spill] sm:$0xff] %v8721_v29  ;;  %6696 = vmatpush1.bf16.msra.mxu1 %v8747_v0  ;;  %v253_v63 = vand.u32 4294901760, %v38_v33  ;;  %v257_v56 = vand.u32 4294901760, %v40_v60  ;;  %7120 = vmatpush1.bf16.msra.mxu0 %v8607_v24  ;;  %v8765_v59 = vsub.f32 %v29_v28, %v8754_v8  ;;  %v13429_v24 = vand.u32 4294901760, %v8358_v23 }
  0x35   :  { %13420 = vst [vmem:[#allocation96_spill] sm:$0xff] %v8730_v32  ;;  %13421 = vst [vmem:[#allocation97_spill] sm:$0xff] %v8732_v55  ;;  %v1677_v37 = vsub.f32 %v8341_v16, %v12628_v36  ;;  %7122 = vmatprep.subr.bf16.mxu0 %v8621_v47  ;;  %v1683_v28 = vsub.f32 %v8345_v18, %v12641_v26 }
  0x36   :  { %13422 = vst [vmem:[#allocation98_spill] sm:$0xff] %v8734_v43  ;;  %13423 = vst [vmem:[#allocation99_spill] sm:$0xff] %v8747_v0  ;;  %v1689_v43 = vsub.f32 %v8343_v17, %v12631_v7  ;;  %v8774_v0 = vsub.f32 %v28_v11, %v8758_v21  ;;  %v1695_v36 = vsub.f32 %v8358_v23, %v13429_v24  ;;  %v39_v11 = vld [vmem:[%s12542_s1 + $0x30] sm:$0xff]  ;;  %v255_v24 = vand.u32 4294901760, %v37_v19 }
  0x37   :  { %13424 = vst [vmem:[#allocation100_spill] sm:$0xff] %v8751_v15  ;;  %13425 = vst [vmem:[#allocation101_spill] sm:$0xff] %v8754_v8  ;;  %v8786_v14 = vpack.c.bf16 %v257_v56, %v253_v63  ;;  %v8788_v7 = vsub.f32 %v38_v33, %v253_v63  ;;  %v1678_v17 = vand.u32 4294901760, %v1677_v37  ;;  %v1684_v15 = vand.u32 4294901760, %v1683_v28 }
  0x38   :  { %13426 = vst [vmem:[#allocation102_spill] sm:$0xff] %v8758_v21  ;;  %13427 = vst [vmem:[#allocation103_spill] sm:$0xff] %v8765_v59  ;;  %v12645_v21 = vand.u32 4294901760, %v8765_v59  ;;  %v1690_v47 = vand.u32 4294901760, %v1689_v43  ;;  %v12644_v16 = vand.u32 4294901760, %v8774_v0  ;;  %v1696_v26 = vand.u32 4294901760, %v1695_v36  ;;  %7124 = vmatpush1.bf16.msra.mxu0 %v8627_v1 }
  0x39   :  { %13428 = vst [vmem:[#allocation104_spill] sm:$0xff] %v8774_v0  ;;  %13430 = vst [vmem:[#allocation105_spill] sm:$0xff] %v8786_v14  ;;  %6698 = vmatprep.subr.bf16.mxu1 %v8786_v14  ;;  %v8796_v18 = vsub.f32 %v40_v60, %v257_v56  ;;  %v259_v37 = vand.u32 4294901760, %v39_v11  ;;  %v42_v60 = vld [vmem:[%s12542_s1 + $0x48] sm:$0xff]  ;;  %7126 = vmatprep.subr.bf16.mxu0 %v8642_v54  ;;  %v8815_v56 = vsub.f32 %v37_v19, %v255_v24 }
  0x3a   :  { %v1660_v33 = vsub.f32 %v8765_v59, %v12645_v21  ;;  %v8802_v63 = vpack.c.bf16 %v1690_v47, %v1678_v17  ;;  %v8807_v43 = vsub.f32 %v8774_v0, %v12644_v16  ;;  %v8813_v36 = vpack.c.bf16 %v1696_v26, %v1684_v15  ;;  %v44_v47 = vld [vmem:[%s12542_s1 + $0x58] sm:$0xff]  ;;  %v41_v16 = vld [vmem:[%s12542_s1 + $0x40] sm:$0xff]  ;;  %v43_v21 = vld [vmem:[%s12542_s1 + $0x50] sm:$0xff] }
  0x3b   :  { %v8829_v19 = vpack.c.bf16 %v259_v37, %v255_v24  ;;  %v8831_v28 = vsub.f32 %v39_v11, %v259_v37  ;;  %v13433_v17 = vand.u32 4294901760, %v8362_v25  ;;  %v13434_v54 = vand.u32 4294901760, %v8368_v27 }
  0x3c   :  { %v1661_v15 = vand.u32 4294901760, %v1660_v33  ;;  %v12663_v0 = vand.u32 4294901760, %v8383_v39  ;;  %v12666_v59 = vand.u32 4294901760, %v8385_v40  ;;  %7128 = vmatpush1.bf16.msra.mxu0 %v8657_v2  ;;  %v261_v33 = vand.u32 4294901760, %v42_v60 }
  0x3d   :  { %13431 = vst [vmem:[#allocation106_spill] sm:$0xff] %v8829_v19  ;;  %13432 = vst [vmem:[#allocation107_spill] sm:$0xff] %v8831_v28  ;;  %v1701_v14 = vsub.f32 %v8362_v25, %v13433_v17  ;;  %v1713_v1 = vsub.f32 %v8368_v27, %v13434_v54  ;;  %v265_v24 = vand.u32 4294901760, %v44_v47  ;;  %v263_v26 = vand.u32 4294901760, %v41_v16  ;;  %7130 = vmatprep.subr.bf16.mxu0 %v8671_v31 }
  0x3e   :  { %1662 = vmatprep.mubr.f32.mxu0 %v1661_v15  ;;  %v267_v11 = vand.u32 4294901760, %v43_v21  ;;  %6700 = vmatpush1.bf16.msra.mxu1 %v8829_v19  ;;  %v1707_v54 = vsub.f32 %v8383_v39, %v12663_v0  ;;  %v1719_v27 = vsub.f32 %v8385_v40, %v12666_v59  ;;  %v8852_v15 = vsub.f32 %v42_v60, %v261_v33  ;;  %v45_v60 = vld [vmem:[%s12542_s1 + $0x60] sm:$0xff] }
  0x3f   :  { %v1702_v37 = vand.u32 4294901760, %v1701_v14  ;;  %v1714_v17 = vand.u32 4294901760, %v1713_v1  ;;  %v8850_v2 = vpack.c.bf16 %v265_v24, %v261_v33  ;;  %v8854_v25 = vsub.f32 %v44_v47, %v265_v24  ;;  %v46_v14 = vld [vmem:[%s12542_s1 + $0x68] sm:$0xff]  ;;  %v48_v1 = vld [vmem:[%s12542_s1 + $0x78] sm:$0xff] }
  0x40   :  { %v8856_v28 = vpack.c.bf16 %v267_v11, %v263_v26  ;;  %v1708_v19 = vand.u32 4294901760, %v1707_v54  ;;  %v1720_v59 = vand.u32 4294901760, %v1719_v27  ;;  %v8866_v31 = vsub.f32 %v41_v16, %v263_v26  ;;  %7132 = vmatpush1.bf16.msra.mxu0 %v8677_v20 }
  0x41   :  { %13435 = vst [vmem:[#allocation108_spill] sm:$0xff] %v8850_v2  ;;  %v8864_v0 = vpack.c.bf16 %v1714_v17, %v1702_v37  ;;  %6702 = vmatprep.subr.bf16.mxu1 %v8850_v2  ;;  %v8873_v47 = vsub.f32 %v43_v21, %v267_v11  ;;  %v12677_v33 = vand.u32 4294901760, %v8387_v41  ;;  %v12680_v24 = vand.u32 4294901760, %v8400_v46  ;;  %7134 = vmatprep.subr.bf16.mxu0 %v8692_v45  ;;  %v47_v21 = vld [vmem:[%s12542_s1 + $0x70] sm:$0xff] }
  0x42   :  { %13436 = vst [vmem:[#allocation109_spill] sm:$0xff] %v8856_v28  ;;  %13437 = vst [vmem:[#allocation110_spill] sm:$0xff] %v8866_v31  ;;  %v12683_v37 = vand.u32 4294901760, %v8404_v48  ;;  %v8879_v16 = vpack.c.bf16 %v1720_v59, %v1708_v19  ;;  %6704 = vmatpush1.bf16.msra.mxu1 %v8856_v28  ;;  %v12686_v27 = vand.u32 4294901760, %v8409_v50  ;;  %v269_v26 = vand.u32 4294901760, %v46_v14 }
  0x43   :  { %13438 = vst [vmem:[#allocation111_spill] sm:$0xff] %v8873_v47  ;;  %v273_v17 = vand.u32 4294901760, %v48_v1  ;;  %v1725_v11 = vsub.f32 %v8387_v41, %v12677_v33  ;;  %v1737_v54 = vsub.f32 %v8400_v46, %v12680_v24  ;;  %v271_v19 = vand.u32 4294901760, %v45_v60 }
  0x44   :  { %v1731_v59 = vsub.f32 %v8404_v48, %v12683_v37  ;;  %v1743_v28 = vsub.f32 %v8409_v50, %v12686_v27  ;;  %v8900_v45 = vsub.f32 %v46_v14, %v269_v26  ;;  %7136 = vmatpush1.bf16.msra.mxu0 %v8708_v22  ;;  %v275_v46 = vand.u32 4294901760, %v47_v21 }
  0x45   :  { %v8898_v2 = vpack.c.bf16 %v273_v17, %v269_v26  ;;  %v8902_v20 = vsub.f32 %v48_v1, %v273_v17  ;;  %v1726_v33 = vand.u32 4294901760, %v1725_v11  ;;  %v1738_v41 = vand.u32 4294901760, %v1737_v54  ;;  %7138 = vmatprep.subr.bf16.mxu0 %v8715_v57  ;;  %v50_v1 = vld [vmem:[%s12542_s1 + $0x88] sm:$0xff]  ;;  %v52_v26 = vld [vmem:[%s12542_s1 + $0x98] sm:$0xff] }
  0x46   :  { %13440 = vst [vmem:[#allocation113_spill] sm:$0xff] %v8900_v45  ;;  %v1732_v24 = vand.u32 4294901760, %v1731_v59  ;;  %v1744_v37 = vand.u32 4294901760, %v1743_v28  ;;  %v8907_v48 = vsub.f32 %v45_v60, %v271_v19  ;;  %v12691_v27 = vand.u32 4294901760, %v8411_v52  ;;  %v49_v28 = vld [vmem:[%s12542_s1 + $0x80] sm:$0xff]  ;;  %v51_v59 = vld [vmem:[%s12542_s1 + $0x90] sm:$0xff] }
  0x47   :  { %13439 = vst [vmem:[#allocation112_spill] sm:$0xff] %v8898_v2  ;;  %13441 = vst [vmem:[#allocation114_spill] sm:$0xff] %v8902_v20  ;;  %6706 = vmatprep.subr.bf16.mxu1 %v8898_v2  ;;  %v7149_v17 = vpack.c.bf16 %v1738_v41, %v1726_v33  ;;  %v8920_v11 = vpack.c.bf16 %v275_v46, %v271_v19  ;;  %v8922_v60 = vsub.f32 %v47_v21, %v275_v46 }
  0x48   :  { %13442 = vst [vmem:[#allocation115_spill] sm:$0xff] %v8907_v48  ;;  %v12702_v54 = vand.u32 4294901760, %v8425_v62  ;;  %v8928_v14 = vpack.c.bf16 %v1744_v37, %v1732_v24  ;;  %v1749_v2 = vsub.f32 %v8411_v52, %v12691_v27  ;;  %v13445_v57 = vand.u32 4294901760, %v8423_v61  ;;  %7140 = vmatpush1.bf16.msra.mxu0 %v8721_v29 }
  0x49   :  { %13443 = vst [vmem:[#allocation116_spill] sm:$0xff] %v8920_v11  ;;  %13444 = vst [vmem:[#allocation117_spill] sm:$0xff] %v8922_v60  ;;  %v12703_v33 = vand.u32 4294901760, %v8438_v4  ;;  %6708 = vmatpush1.bf16.msra.mxu1 %v8920_v11  ;;  %v277_v24 = vand.u32 4294901760, %v50_v1  ;;  %v281_v37 = vand.u32 4294901760, %v52_v26  ;;  %v279_v21 = vand.u32 4294901760, %v49_v28  ;;  %7142 = vmatprep.subr.bf16.mxu0 %v8802_v63 }
  0x4a   :  { %v1761_v41 = vsub.f32 %v8423_v61, %v13445_v57  ;;  %v1755_v46 = vsub.f32 %v8425_v62, %v12702_v54  ;;  %v1750_v19 = vand.u32 4294901760, %v1749_v2  ;;  %v283_v22 = vand.u32 4294901760, %v51_v59  ;;  %v54_v54 = vld [vmem:[%s12542_s1 + $0xa8] sm:$0xff]  ;;  %v56_v2 = vld [vmem:[%s12542_s1 + $0xb8] sm:$0xff] }
  0x4b   :  { %v1767_v57 = vsub.f32 %v8438_v4, %v12703_v33  ;;  %v8946_v29 = vpack.c.bf16 %v281_v37, %v277_v24  ;;  %v8948_v11 = vsub.f32 %v50_v1, %v277_v24  ;;  %v8950_v52 = vsub.f32 %v52_v26, %v281_v37  ;;  %v53_v1 = vld [vmem:[%s12542_s1 + $0xa0] sm:$0xff] }
  0x4c   :  { %v1762_v27 = vand.u32 4294901760, %v1761_v41  ;;  %v1756_v61 = vand.u32 4294901760, %v1755_v46  ;;  %v13449_v63 = vand.u32 4294901760, %v8807_v43  ;;  %v8960_v46 = vpack.c.bf16 %v283_v22, %v279_v21 }
  0x4d   :  { %13446 = vst [vmem:[#allocation118_spill] sm:$0xff] %v8946_v29  ;;  %13447 = vst [vmem:[#allocation119_spill] sm:$0xff] %v8948_v11  ;;  %v1768_v33 = vand.u32 4294901760, %v1767_v57  ;;  %v8962_v4 = vsub.f32 %v49_v28, %v279_v21  ;;  %6710 = vmatprep.subr.bf16.mxu1 %v8946_v29  ;;  %v8969_v26 = vsub.f32 %v51_v59, %v283_v22  ;;  %v12706_v24 = vand.u32 4294901760, %v8442_v6  ;;  %v55_v22 = vld [vmem:[%s12542_s1 + $0xb0] sm:$0xff] }
  0x4e   :  { %13448 = vst [vmem:[#allocation120_spill] sm:$0xff] %v8950_v52  ;;  %1668 = vmatmul.mubr.f32.vlgmr.msra.gmra.mrb[0].mxu0 %v13449_v63  ;;  %v7153_v41 = vpack.c.bf16 %v1762_v27, %v1750_v19  ;;  %13450 = vst [vmem:[#allocation121_spill] sm:$0xff] %v8960_v46  ;;  %v12707_v43 = vand.u32 4294901760, %v8453_v10  ;;  %v12714_v27 = vand.u32 4294901760, %v8457_v12  ;;  %6712 = vmatpush1.bf16.msra.mxu1 %v8960_v46  ;;  %v12717_v37 = vand.u32 4294901760, %v8459_v13 }
  0x4f   :  { %13451 = vst [vmem:[#allocation122_spill] sm:$0xff] %v8962_v4  ;;  %7144 = vmatpush1.bf16.msra.mxu0 %v8813_v36  ;;  %13452 = vst [vmem:[#allocation123_spill] sm:$0xff] %v8969_v26  ;;  %v7155_v28 = vpack.c.bf16 %v1768_v33, %v1756_v61  ;;  %v285_v21 = vand.u32 4294901760, %v54_v54  ;;  %v289_v19 = vand.u32 4294901760, %v56_v2  ;;  %v1773_v36 = vsub.f32 %v8442_v6, %v12706_v24 }
  0x50   :  { %7146 = vmatprep.subr.bf16.mxu0 %v8864_v0  ;;  %v1785_v59 = vsub.f32 %v8453_v10, %v12707_v43  ;;  %v1779_v61 = vsub.f32 %v8457_v12, %v12714_v27  ;;  %v287_v0 = vand.u32 4294901760, %v53_v1  ;;  %2059 = vmatprep.mubr.f32.mxu0 %v8754_v8  ;;  %v1791_v33 = vsub.f32 %v8459_v13, %v12717_v37 }
  0x51   :  { %v8993_v57 = vpack.c.bf16 %v289_v19, %v285_v21  ;;  %v8995_v63 = vsub.f32 %v54_v54, %v285_v21  ;;  %v8997_v24 = vsub.f32 %v56_v2, %v289_v19  ;;  %v1774_v43 = vand.u32 4294901760, %v1773_v36  ;;  %v58_v54 = vld [vmem:[%s12542_s1 + $0xc8] sm:$0xff]  ;;  %v59_v36 = vld [vmem:[%s12542_s1 + $0xd0] sm:$0xff] }
  0x52   :  { %v1786_v46 = vand.u32 4294901760, %v1785_v59  ;;  %v1780_v29 = vand.u32 4294901760, %v1779_v61  ;;  %v291_v10 = vand.u32 4294901760, %v55_v22  ;;  %v1792_v27 = vand.u32 4294901760, %v1791_v33 }
  0x53   :  { %13453 = vst [vmem:[#allocation124_spill] sm:$0xff] %v8993_v57  ;;  %13454 = vst [vmem:[#allocation125_spill] sm:$0xff] %v8995_v63  ;;  %7148 = vmatpush1.bf16.msra.mxu0 %v8879_v16  ;;  %6714 = vmatprep.subr.bf16.mxu1 %v8993_v57  ;;  %v9001_v8 = vsub.f32 %v53_v1, %v287_v0  ;;  %v12721_v37 = vand.u32 4294901760, %v8471_v34  ;;  %v12720_v13 = vand.u32 4294901760, %v8473_v35  ;;  %v60_v16 = vld [vmem:[%s12542_s1 + $0xd8] sm:$0xff]  ;;  %v12728_v19 = vand.u32 4294901760, %v8486_v44 }
  0x54   :  { %13455 = vst [vmem:[#allocation126_spill] sm:$0xff] %v8997_v24  ;;  %7150 = vmatprep.subr.bf16.mxu0 %v7149_v17  ;;  %v57_v17 = vld [vmem:[%s12542_s1 + $0xc0] sm:$0xff]  ;;  %v7157_v2 = vpack.c.bf16 %v1786_v46, %v1774_v43  ;;  %v9014_v21 = vpack.c.bf16 %v291_v10, %v287_v0  ;;  %v9016_v1 = vsub.f32 %v55_v22, %v291_v10  ;;  %v12731_v46 = vand.u32 4294901760, %v8488_v49 }
  0x55   :  { %13456 = vst [vmem:[#allocation127_spill] sm:$0xff] %v9001_v8  ;;  %v7159_v59 = vpack.c.bf16 %v1792_v27, %v1780_v29  ;;  %v1797_v61 = vsub.f32 %v8471_v34, %v12721_v37  ;;  %v1809_v33 = vsub.f32 %v8473_v35, %v12720_v13  ;;  %v1803_v10 = vsub.f32 %v8486_v44, %v12728_v19  ;;  %v62_v19 = vld [vmem:[%s12542_s1 + $0xe8] sm:$0xff] }
  0x56   :  { %13457 = vst [vmem:[#allocation128_spill] sm:$0xff] %v9014_v21  ;;  %13458 = vst [vmem:[#allocation129_spill] sm:$0xff] %v9016_v1  ;;  %6716 = vmatpush1.bf16.msra.mxu1 %v9014_v21  ;;  %v293_v43 = vand.u32 4294901760, %v58_v54  ;;  %v297_v29 = vand.u32 4294901760, %v60_v16  ;;  %v295_v27 = vand.u32 4294901760, %v57_v17  ;;  %v1815_v13 = vsub.f32 %v8488_v49, %v12731_v46 }
  0x57   :  { %7152 = vmatpush1.bf16.msra.mxu0 %v8928_v14  ;;  %v1798_v22 = vand.u32 4294901760, %v1797_v61  ;;  %v1810_v0 = vand.u32 4294901760, %v1809_v33  ;;  %v299_v37 = vand.u32 4294901760, %v59_v36  ;;  %v1804_v57 = vand.u32 4294901760, %v1803_v10 }
  0x58   :  { %7154 = vmatprep.subr.bf16.mxu0 %v7153_v41  ;;  %v9037_v35 = vpack.c.bf16 %v297_v29, %v293_v43  ;;  %v9039_v14 = vsub.f32 %v58_v54, %v293_v43  ;;  %v9041_v21 = vsub.f32 %v60_v16, %v297_v29  ;;  %v64_v41 = vld [vmem:[%s12542_s1 + $0xf8] sm:$0xff]  ;;  %v1816_v33 = vand.u32 4294901760, %v1815_v13  ;;  %v61_v54 = vld [vmem:[%s12542_s1 + $0xe0] sm:$0xff]  ;;  %v13465_v43 = vld [vmem:[#allocation40_spill] sm:$0xff] }
  0x59   :  { %v7161_v61 = vpack.c.bf16 %v1810_v0, %v1798_v22  ;;  %v9049_v44 = vpack.c.bf16 %v299_v37, %v295_v27  ;;  %v9051_v46 = vsub.f32 %v57_v17, %v295_v27  ;;  %v9057_v16 = vsub.f32 %v59_v36, %v299_v37  ;;  %v13467_v17 = vld [vmem:[#allocation43_spill] sm:$0xff] }
  0x5a   :  { %13459 = vst [vmem:[#allocation130_spill] sm:$0xff] %v9037_v35  ;;  %13460 = vst [vmem:[#allocation131_spill] sm:$0xff] %v9039_v14  ;;  %6718 = vmatprep.subr.bf16.mxu1 %v9037_v35  ;;  %v12739_v10 = vand.u32 4294901760, %v8492_v53  ;;  %v12743_v29 = vand.u32 4294901760, %v13465_v43  ;;  %v7163_v13 = vpack.c.bf16 %v1816_v33, %v1804_v57  ;;  %v12749_v27 = vand.u32 4294901760, %v13467_v17 }
  0x5b   :  { %13461 = vst [vmem:[#allocation132_spill] sm:$0xff] %v9041_v21  ;;  %13462 = vst [vmem:[#allocation133_spill] sm:$0xff] %v9049_v44  ;;  %7156 = vmatpush1.bf16.msra.mxu0 %v7155_v28  ;;  %v13466_v21 = vld [vmem:[#allocation42_spill] sm:$0xff]  ;;  %6720 = vmatpush1.bf16.msra.mxu1 %v9049_v44  ;;  %v301_v0 = vand.u32 4294901760, %v62_v19  ;;  %v63_v28 = vld [vmem:[%s12542_s1 + $0xf0] sm:$0xff] }
  0x5c   :  { %13463 = vst [vmem:[#allocation134_spill] sm:$0xff] %v9051_v46  ;;  %13464 = vst [vmem:[#allocation135_spill] sm:$0xff] %v9057_v16  ;;  %v12745_v22 = vand.u32 4294901760, %v13466_v21  ;;  %7158 = vmatprep.subr.bf16.mxu0 %v7157_v2  ;;  %v305_v46 = vand.u32 4294901760, %v64_v41  ;;  %v1821_v37 = vsub.f32 %v8492_v53, %v12739_v10  ;;  %v1833_v36 = vsub.f32 %v13465_v43, %v12743_v29 }
  0x5d   :  { %v303_v2 = vand.u32 4294901760, %v61_v54  ;;  %v1839_v33 = vsub.f32 %v13467_v17, %v12749_v27  ;;  %v9081_v35 = vsub.f32 %v62_v19, %v301_v0  ;;  %v307_v29 = vand.u32 4294901760, %v63_v28  ;;  %v13473_v27 = vld [vmem:[#allocation46_spill] sm:$0xff]  ;;  %v66_v19 = vld [vmem:[%s12542_s1 + $0x108] sm:$0xff] }
  0x5e   :  { %v1827_v57 = vsub.f32 %v13466_v21, %v12745_v22  ;;  %v9079_v44 = vpack.c.bf16 %v305_v46, %v301_v0  ;;  %v9083_v16 = vsub.f32 %v64_v41, %v305_v46  ;;  %v1822_v10 = vand.u32 4294901760, %v1821_v37  ;;  %v13472_v21 = vld [vmem:[#allocation45_spill] sm:$0xff]  ;;  %v65_v46 = vld [vmem:[%s12542_s1 + $0x100] sm:$0xff]  ;;  %v13476_v0 = vld [vmem:[#allocation48_spill] sm:$0xff] }
  0x5f   :  { %13469 = vst [vmem:[#allocation137_spill] sm:$0xff] %v9081_v35  ;;  %7160 = vmatpush1.bf16.msra.mxu0 %v7159_v59  ;;  %v1834_v53 = vand.u32 4294901760, %v1833_v36  ;;  %v1840_v43 = vand.u32 4294901760, %v1839_v33  ;;  %v9086_v22 = vsub.f32 %v61_v54, %v303_v2  ;;  %v12754_v49 = vand.u32 4294901760, %v13472_v21  ;;  %v68_v59 = vld [vmem:[%s12542_s1 + $0x118] sm:$0xff]  ;;  %v67_v36 = vld [vmem:[%s12542_s1 + $0x110] sm:$0xff] }
  0x60   :  { %13468 = vst [vmem:[#allocation136_spill] sm:$0xff] %v9079_v44  ;;  %13470 = vst [vmem:[#allocation138_spill] sm:$0xff] %v9083_v16  ;;  %v1828_v14 = vand.u32 4294901760, %v1827_v57  ;;  %7162 = vmatprep.subr.bf16.mxu0 %v7161_v61  ;;  %6722 = vmatprep.subr.bf16.mxu1 %v9079_v44  ;;  %v12755_v17 = vand.u32 4294901760, %v13473_v27  ;;  %v9099_v61 = vpack.c.bf16 %v307_v29, %v303_v2  ;;  %v12760_v37 = vand.u32 4294901760, %v13476_v0  ;;  %v13493_v16 = vld [vmem:[#allocation58_spill] sm:$0xff] }
  0x61   :  { %13471 = vst [vmem:[#allocation139_spill] sm:$0xff] %v9086_v22  ;;  %v7165_v41 = vpack.c.bf16 %v1834_v53, %v1822_v10  ;;  %v9101_v54 = vsub.f32 %v63_v28, %v307_v29  ;;  %v1845_v33 = vsub.f32 %v13472_v21, %v12754_v49  ;;  %v13477_v53 = vld [vmem:[#allocation49_spill] sm:$0xff]  ;;  %v309_v28 = vand.u32 4294901760, %v66_v19 }
  0x62   :  { %13474 = vst [vmem:[#allocation140_spill] sm:$0xff] %v9099_v61  ;;  %v7167_v57 = vpack.c.bf16 %v1840_v43, %v1828_v14  ;;  %v1857_v44 = vsub.f32 %v13473_v27, %v12755_v17  ;;  %v12762_v10 = vand.u32 4294901760, %v13477_v53  ;;  %6724 = vmatpush1.bf16.msra.mxu1 %v9099_v61  ;;  %v1851_v29 = vsub.f32 %v13476_v0, %v12760_v37  ;;  %v70_v37 = vld [vmem:[%s12542_s1 + $0x128] sm:$0xff] }
  0x63   :  { %13475 = vst [vmem:[#allocation141_spill] sm:$0xff] %v9101_v54  ;;  %7164 = vmatpush1.bf16.msra.mxu0 %v7163_v13  ;;  %v313_v2 = vand.u32 4294901760, %v68_v59  ;;  %v311_v14 = vand.u32 4294901760, %v65_v46  ;;  %v1846_v43 = vand.u32 4294901760, %v1845_v33  ;;  %v315_v17 = vand.u32 4294901760, %v67_v36 }
  0x64   :  { %7166 = vmatprep.subr.bf16.mxu0 %v7165_v41  ;;  %v1858_v54 = vand.u32 4294901760, %v1857_v44  ;;  %v1863_v49 = vsub.f32 %v13477_v53, %v12762_v10  ;;  %v1852_v27 = vand.u32 4294901760, %v1851_v29  ;;  %v9123_v13 = vsub.f32 %v66_v19, %v309_v28  ;;  %v72_v44 = vld [vmem:[%s12542_s1 + $0x138] sm:$0xff]  ;;  %v69_v19 = vld [vmem:[%s12542_s1 + $0x120] sm:$0xff]  ;;  %v13484_v29 = vld [vmem:[#allocation51_spill] sm:$0xff] }
  0x65   :  { %v9121_v21 = vpack.c.bf16 %v313_v2, %v309_v28  ;;  %v9125_v61 = vsub.f32 %v68_v59, %v313_v2  ;;  %v9133_v0 = vpack.c.bf16 %v315_v17, %v311_v14  ;;  %v9135_v10 = vsub.f32 %v65_v46, %v311_v14  ;;  %v13485_v2 = vld [vmem:[#allocation52_spill] sm:$0xff]  ;;  %v13487_v46 = vld [vmem:[#allocation55_spill] sm:$0xff] }
  0x66   :  { %13479 = vst [vmem:[#allocation143_spill] sm:$0xff] %v9123_v13  ;;  %v7169_v41 = vpack.c.bf16 %v1858_v54, %v1846_v43  ;;  %v1864_v33 = vand.u32 4294901760, %v1863_v49  ;;  %v9141_v59 = vsub.f32 %v67_v36, %v315_v17  ;;  %v12771_v28 = vand.u32 4294901760, %v13484_v29  ;;  %v13486_v13 = vld [vmem:[#allocation54_spill] sm:$0xff] }
  0x67   :  { %13478 = vst [vmem:[#allocation142_spill] sm:$0xff] %v9121_v21  ;;  %13480 = vst [vmem:[#allocation144_spill] sm:$0xff] %v9125_v61  ;;  %7168 = vmatpush1.bf16.msra.mxu0 %v7167_v57  ;;  %6726 = vmatprep.subr.bf16.mxu1 %v9121_v21  ;;  %v12774_v61 = vand.u32 4294901760, %v13485_v2  ;;  %v12776_v54 = vand.u32 4294901760, %v13486_v13  ;;  %v12780_v14 = vand.u32 4294901760, %v13487_v46  ;;  %v317_v43 = vand.u32 4294901760, %v70_v37 }
  0x68   :  { %13481 = vst [vmem:[#allocation145_spill] sm:$0xff] %v9133_v0  ;;  %13482 = vst [vmem:[#allocation146_spill] sm:$0xff] %v9135_v10  ;;  %7170 = vmatprep.subr.bf16.mxu0 %v7169_v41  ;;  %v7171_v49 = vpack.c.bf16 %v1864_v33, %v1852_v27  ;;  %6728 = vmatpush1.bf16.msra.mxu1 %v9133_v0  ;;  %v321_v10 = vand.u32 4294901760, %v72_v44  ;;  %v71_v57 = vld [vmem:[%s12542_s1 + $0x130] sm:$0xff]  ;;  %v1869_v17 = vsub.f32 %v13484_v29, %v12771_v28 }
  0x69   :  { %13483 = vst [vmem:[#allocation147_spill] sm:$0xff] %v9141_v59  ;;  %v1881_v36 = vsub.f32 %v13485_v2, %v12774_v61  ;;  %v1875_v27 = vsub.f32 %v13486_v13, %v12776_v54  ;;  %v319_v41 = vand.u32 4294901760, %v69_v19  ;;  %v1887_v33 = vsub.f32 %v13487_v46, %v12780_v14  ;;  %v13492_v13 = vld [vmem:[#allocation57_spill] sm:$0xff] }
  0x6a   :  { %v9163_v0 = vpack.c.bf16 %v321_v10, %v317_v43  ;;  %v9165_v21 = vsub.f32 %v70_v37, %v317_v43  ;;  %v9167_v59 = vsub.f32 %v72_v44, %v321_v10  ;;  %v1870_v28 = vand.u32 4294901760, %v1869_v17  ;;  %v74_v37 = vld [vmem:[%s12542_s1 + $0x148] sm:$0xff]  ;;  %v76_v10 = vld [vmem:[%s12542_s1 + $0x158] sm:$0xff]  ;;  %v73_v44 = vld [vmem:[%s12542_s1 + $0x140] sm:$0xff] }
  0x6b   :  { %7172 = vmatpush1.bf16.msra.mxu0 %v7171_v49  ;;  %v1882_v29 = vand.u32 4294901760, %v1881_v36  ;;  %v1876_v53 = vand.u32 4294901760, %v1875_v27  ;;  %v323_v61 = vand.u32 4294901760, %v71_v57  ;;  %v1888_v2 = vand.u32 4294901760, %v1887_v33  ;;  %v13496_v17 = vld [vmem:[#allocation60_spill] sm:$0xff] }
  0x6c   :  { %13488 = vst [vmem:[#allocation148_spill] sm:$0xff] %v9163_v0  ;;  %13489 = vst [vmem:[#allocation149_spill] sm:$0xff] %v9165_v21  ;;  %6730 = vmatprep.subr.bf16.mxu1 %v9163_v0  ;;  %v9170_v54 = vsub.f32 %v69_v19, %v319_v41  ;;  %v12785_v22 = vand.u32 4294901760, %v13492_v13  ;;  %v12790_v36 = vand.u32 4294901760, %v13496_v17  ;;  %v75_v27 = vld [vmem:[%s12542_s1 + $0x150] sm:$0xff]  ;;  %v13497_v0 = vand.u32 4294901760, %v13493_v16 }
  0x6d   :  { %13490 = vst [vmem:[#allocation150_spill] sm:$0xff] %v9167_v59  ;;  %v7173_v49 = vpack.c.bf16 %v1882_v29, %v1870_v28  ;;  %v9183_v43 = vpack.c.bf16 %v323_v61, %v319_v41  ;;  %v9185_v19 = vsub.f32 %v71_v57, %v323_v61  ;;  %v7175_v33 = vpack.c.bf16 %v1888_v2, %v1876_v53  ;;  %v13498_v29 = vld [vmem:[#allocation61_spill] sm:$0xff]  ;;  %v13514_v21 = vld [vmem:[#allocation70_spill] sm:$0xff] }
  0x6e   :  { %13491 = vst [vmem:[#allocation151_spill] sm:$0xff] %v9170_v54  ;;  %v1893_v14 = vsub.f32 %v13492_v13, %v12785_v22  ;;  %v1905_v54 = vsub.f32 %v13493_v16, %v13497_v0  ;;  %v12792_v28 = vand.u32 4294901760, %v13498_v29  ;;  %v1899_v61 = vsub.f32 %v13496_v17, %v12790_v36  ;;  %v78_v36 = vld [vmem:[%s12542_s1 + $0x168] sm:$0xff] }
  0x6f   :  { %13494 = vst [vmem:[#allocation152_spill] sm:$0xff] %v9183_v43  ;;  %13495 = vst [vmem:[#allocation153_spill] sm:$0xff] %v9185_v19  ;;  %7174 = vmatprep.subr.bf16.mxu0 %v7173_v49  ;;  %6732 = vmatpush1.bf16.msra.mxu1 %v9183_v43  ;;  %v325_v57 = vand.u32 4294901760, %v74_v37  ;;  %v329_v41 = vand.u32 4294901760, %v76_v10  ;;  %v327_v53 = vand.u32 4294901760, %v73_v44  ;;  %v331_v0 = vand.u32 4294901760, %v75_v27 }
  0x70   :  { %7176 = vmatpush1.bf16.msra.mxu0 %v7175_v33  ;;  %v1894_v2 = vand.u32 4294901760, %v1893_v14  ;;  %v1906_v19 = vand.u32 4294901760, %v1905_v54  ;;  %v1911_v22 = vsub.f32 %v13498_v29, %v12792_v28  ;;  %v1900_v16 = vand.u32 4294901760, %v1899_v61  ;;  %v80_v54 = vld [vmem:[%s12542_s1 + $0x178] sm:$0xff]  ;;  %v13505_v61 = vld [vmem:[#allocation63_spill] sm:$0xff] }
  0x71   :  { %v9205_v13 = vpack.c.bf16 %v329_v41, %v325_v57  ;;  %v9207_v49 = vsub.f32 %v74_v37, %v325_v57  ;;  %v9209_v43 = vsub.f32 %v76_v10, %v329_v41  ;;  %v9217_v17 = vpack.c.bf16 %v331_v0, %v327_v53  ;;  %v77_v37 = vld [vmem:[%s12542_s1 + $0x160] sm:$0xff]  ;;  %v13506_v41 = vld [vmem:[#allocation64_spill] sm:$0xff] }
  0x72   :  { %v7177_v14 = vpack.c.bf16 %v1906_v19, %v1894_v2  ;;  %v1912_v33 = vand.u32 4294901760, %v1911_v22  ;;  %v9219_v28 = vsub.f32 %v73_v44, %v327_v53  ;;  %v9225_v10 = vsub.f32 %v75_v27, %v331_v0  ;;  %v13508_v44 = vld [vmem:[#allocation67_spill] sm:$0xff] }
  0x73   :  { %13499 = vst [vmem:[#allocation154_spill] sm:$0xff] %v9205_v13  ;;  %13500 = vst [vmem:[#allocation155_spill] sm:$0xff] %v9207_v49  ;;  %6734 = vmatprep.subr.bf16.mxu1 %v9205_v13  ;;  %v12802_v57 = vand.u32 4294901760, %v13505_v61  ;;  %v13507_v49 = vld [vmem:[#allocation66_spill] sm:$0xff]  ;;  %v12811_v19 = vand.u32 4294901760, %v13508_v44  ;;  %v333_v53 = vand.u32 4294901760, %v78_v36 }
  0x74   :  { %13501 = vst [vmem:[#allocation156_spill] sm:$0xff] %v9209_v43  ;;  %13502 = vst [vmem:[#allocation157_spill] sm:$0xff] %v9217_v17  ;;  %v12805_v43 = vand.u32 4294901760, %v13506_v41  ;;  %v12807_v29 = vand.u32 4294901760, %v13507_v49  ;;  %7178 = vmatprep.subr.bf16.mxu0 %v7177_v14  ;;  %v7179_v22 = vpack.c.bf16 %v1912_v33, %v1900_v16  ;;  %6736 = vmatpush1.bf16.msra.mxu1 %v9217_v17  ;;  %v337_v2 = vand.u32 4294901760, %v80_v54  ;;  %v79_v13 = vld [vmem:[%s12542_s1 + $0x170] sm:$0xff] }
  0x75   :  { %13503 = vst [vmem:[#allocation158_spill] sm:$0xff] %v9219_v28  ;;  %13504 = vst [vmem:[#allocation159_spill] sm:$0xff] %v9225_v10  ;;  %v1917_v27 = vsub.f32 %v13505_v61, %v12802_v57  ;;  %v335_v14 = vand.u32 4294901760, %v77_v37  ;;  %v1935_v33 = vsub.f32 %v13508_v44, %v12811_v19  ;;  %v9249_v10 = vsub.f32 %v78_v36, %v333_v53  ;;  %v82_v36 = vld [vmem:[%s12542_s1 + $0x188] sm:$0xff] }
  0x76   :  { %v1929_v0 = vsub.f32 %v13506_v41, %v12805_v43  ;;  %v1923_v16 = vsub.f32 %v13507_v49, %v12807_v29  ;;  %7180 = vmatpush1.bf16.msra.mxu0 %v7179_v22  ;;  %v9247_v17 = vpack.c.bf16 %v337_v2, %v333_v53  ;;  %v9251_v28 = vsub.f32 %v80_v54, %v337_v2  ;;  %v13513_v22 = vld [vmem:[#allocation69_spill] sm:$0xff]  ;;  %v81_v53 = vld [vmem:[%s12542_s1 + $0x180] sm:$0xff] }
  0x77   :  { %13510 = vst [vmem:[#allocation161_spill] sm:$0xff] %v9249_v10  ;;  %v1918_v57 = vand.u32 4294901760, %v1917_v27  ;;  %v339_v43 = vand.u32 4294901760, %v79_v13  ;;  %v1936_v41 = vand.u32 4294901760, %v1935_v33  ;;  %v9254_v29 = vsub.f32 %v77_v37, %v335_v14  ;;  %v84_v54 = vld [vmem:[%s12542_s1 + $0x198] sm:$0xff]  ;;  %v83_v33 = vld [vmem:[%s12542_s1 + $0x190] sm:$0xff] }
  0x78   :  { %13509 = vst [vmem:[#allocation160_spill] sm:$0xff] %v9247_v17  ;;  %13511 = vst [vmem:[#allocation162_spill] sm:$0xff] %v9251_v28  ;;  %v1930_v61 = vand.u32 4294901760, %v1929_v0  ;;  %v1924_v59 = vand.u32 4294901760, %v1923_v16  ;;  %6738 = vmatprep.subr.bf16.mxu1 %v9247_v17  ;;  %v12816_v49 = vand.u32 4294901760, %v13513_v22  ;;  %v13517_v0 = vld [vmem:[#allocation72_spill] sm:$0xff] }
  0x79   :  { %13512 = vst [vmem:[#allocation163_spill] sm:$0xff] %v9254_v29  ;;  %v9267_v27 = vpack.c.bf16 %v339_v43, %v335_v14  ;;  %v9269_v37 = vsub.f32 %v79_v13, %v339_v43  ;;  %v12821_v16 = vand.u32 4294901760, %v13517_v0  ;;  %v13518_v17 = vand.u32 4294901760, %v13514_v21  ;;  %v13535_v10 = vld [vmem:[#allocation82_spill] sm:$0xff] }
  0x7a   :  { %v7181_v2 = vpack.c.bf16 %v1930_v61, %v1918_v57  ;;  %v7183_v19 = vpack.c.bf16 %v1936_v41, %v1924_v59  ;;  %v1941_v46 = vsub.f32 %v13513_v22, %v12816_v49  ;;  %v13519_v61 = vld [vmem:[#allocation73_spill] sm:$0xff]  ;;  %v341_v43 = vand.u32 4294901760, %v82_v36 }
  0x7b   :  { %13515 = vst [vmem:[#allocation164_spill] sm:$0xff] %v9267_v27  ;;  %13516 = vst [vmem:[#allocation165_spill] sm:$0xff] %v9269_v37  ;;  %v1953_v29 = vsub.f32 %v13514_v21, %v13518_v17  ;;  %v12823_v57 = vand.u32 4294901760, %v13519_v61  ;;  %6740 = vmatpush1.bf16.msra.mxu1 %v9267_v27  ;;  %v1947_v13 = vsub.f32 %v13517_v0, %v12821_v16  ;;  %v345_v14 = vand.u32 4294901760, %v84_v54  ;;  %v86_v16 = vld [vmem:[%s12542_s1 + $0x1a8] sm:$0xff] }
  0x7c   :  { %7182 = vmatprep.subr.bf16.mxu0 %v7181_v2  ;;  %v343_v59 = vand.u32 4294901760, %v81_v53  ;;  %v1942_v41 = vand.u32 4294901760, %v1941_v46  ;;  %v347_v17 = vand.u32 4294901760, %v83_v33  ;;  %v9291_v2 = vsub.f32 %v82_v36, %v341_v43  ;;  %v88_v46 = vld [vmem:[%s12542_s1 + $0x1b8] sm:$0xff]  ;;  %v85_v36 = vld [vmem:[%s12542_s1 + $0x1a0] sm:$0xff] }
  0x7d   :  { %7184 = vmatpush1.bf16.msra.mxu0 %v7183_v19  ;;  %v1954_v37 = vand.u32 4294901760, %v1953_v29  ;;  %v1959_v49 = vsub.f32 %v13519_v61, %v12823_v57  ;;  %v1948_v21 = vand.u32 4294901760, %v1947_v13  ;;  %v9289_v22 = vpack.c.bf16 %v345_v14, %v341_v43  ;;  %v13526_v13 = vld [vmem:[#allocation75_spill] sm:$0xff] }
  0x7e   :  { %13521 = vst [vmem:[#allocation167_spill] sm:$0xff] %v9291_v2  ;;  %v9293_v27 = vsub.f32 %v84_v54, %v345_v14  ;;  %v9301_v0 = vpack.c.bf16 %v347_v17, %v343_v59  ;;  %v9303_v57 = vsub.f32 %v81_v53, %v343_v59  ;;  %v9309_v54 = vsub.f32 %v83_v33, %v347_v17  ;;  %v13527_v14 = vld [vmem:[#allocation76_spill] sm:$0xff]  ;;  %v13528_v2 = vld [vmem:[#allocation78_spill] sm:$0xff]  ;;  %v13529_v53 = vld [vmem:[#allocation79_spill] sm:$0xff] }
  0x7f   :  { %13520 = vst [vmem:[#allocation166_spill] sm:$0xff] %v9289_v22  ;;  %v7185_v29 = vpack.c.bf16 %v1954_v37, %v1942_v41  ;;  %v1960_v19 = vand.u32 4294901760, %v1959_v49  ;;  %6742 = vmatprep.subr.bf16.mxu1 %v9289_v22  ;;  %v12833_v43 = vand.u32 4294901760, %v13526_v13  ;;  %v12838_v61 = vand.u32 4294901760, %v13528_v2  ;;  %v87_v22 = vld [vmem:[%s12542_s1 + $0x1b0] sm:$0xff] }
  0x80   :  { %13522 = vst [vmem:[#allocation168_spill] sm:$0xff] %v9293_v27  ;;  %13523 = vst [vmem:[#allocation169_spill] sm:$0xff] %v9301_v0  ;;  %v12836_v27 = vand.u32 4294901760, %v13527_v14  ;;  %6744 = vmatpush1.bf16.msra.mxu1 %v9301_v0  ;;  %v12842_v37 = vand.u32 4294901760, %v13529_v53  ;;  %v349_v59 = vand.u32 4294901760, %v86_v16  ;;  %v353_v41 = vand.u32 4294901760, %v88_v46 }
  0x81   :  { %13524 = vst [vmem:[#allocation170_spill] sm:$0xff] %v9303_v57  ;;  %13525 = vst [vmem:[#allocation171_spill] sm:$0xff] %v9309_v54  ;;  %7186 = vmatprep.subr.bf16.mxu0 %v7185_v29  ;;  %v7187_v49 = vpack.c.bf16 %v1960_v19, %v1948_v21  ;;  %v1965_v33 = vsub.f32 %v13526_v13, %v12833_v43  ;;  %v1971_v21 = vsub.f32 %v13528_v2, %v12838_v61 }
  0x82   :  { %v1977_v17 = vsub.f32 %v13527_v14, %v12836_v27  ;;  %v351_v29 = vand.u32 4294901760, %v85_v36  ;;  %v1983_v19 = vsub.f32 %v13529_v53, %v12842_v37  ;;  %v9331_v0 = vpack.c.bf16 %v353_v41, %v349_v59 }
  0x83   :  { %7188 = vmatpush1.bf16.msra.mxu0 %v7187_v49  ;;  %v9333_v54 = vsub.f32 %v86_v16, %v349_v59  ;;  %v9335_v57 = vsub.f32 %v88_v46, %v353_v41  ;;  %v1966_v43 = vand.u32 4294901760, %v1965_v33  ;;  %v1972_v28 = vand.u32 4294901760, %v1971_v21  ;;  %v13534_v49 = vld [vmem:[#allocation81_spill] sm:$0xff]  ;;  %v90_v16 = vld [vmem:[%s12542_s1 + $0x1c8] sm:$0xff]  ;;  %v89_v59 = vld [vmem:[%s12542_s1 + $0x1c0] sm:$0xff] }
  0x84   :  { %13530 = vst [vmem:[#allocation172_spill] sm:$0xff] %v9331_v0  ;;  %v1978_v13 = vand.u32 4294901760, %v1977_v17  ;;  %v355_v27 = vand.u32 4294901760, %v87_v22  ;;  %v1984_v14 = vand.u32 4294901760, %v1983_v19  ;;  %6746 = vmatprep.subr.bf16.mxu1 %v9331_v0  ;;  %v9338_v61 = vsub.f32 %v85_v36, %v351_v29  ;;  %v92_v46 = vld [vmem:[%s12542_s1 + $0x1d8] sm:$0xff]  ;;  %v13538_v17 = vld [vmem:[#allocation84_spill] sm:$0xff] }
  0x85   :  { %13531 = vst [vmem:[#allocation173_spill] sm:$0xff] %v9333_v54  ;;  %13532 = vst [vmem:[#allocation174_spill] sm:$0xff] %v9335_v57  ;;  %v12847_v2 = vand.u32 4294901760, %v13534_v49  ;;  %v12852_v21 = vand.u32 4294901760, %v13538_v17  ;;  %v91_v19 = vld [vmem:[%s12542_s1 + $0x1d0] sm:$0xff]  ;;  %v13539_v0 = vand.u32 4294901760, %v13535_v10 }
  0x86   :  { %13533 = vst [vmem:[#allocation175_spill] sm:$0xff] %v9338_v61  ;;  %v7189_v41 = vpack.c.bf16 %v1978_v13, %v1966_v43  ;;  %v9351_v33 = vpack.c.bf16 %v355_v27, %v351_v29  ;;  %v9353_v36 = vsub.f32 %v87_v22, %v355_v27  ;;  %v7191_v37 = vpack.c.bf16 %v1984_v14, %v1972_v28  ;;  %v13540_v13 = vld [vmem:[#allocation85_spill] sm:$0xff] }
  0x87   :  { %v1989_v44 = vsub.f32 %v13534_v49, %v12847_v2  ;;  %v2001_v61 = vsub.f32 %v13535_v10, %v13539_v0  ;;  %v12854_v43 = vand.u32 4294901760, %v13540_v13  ;;  %v1995_v22 = vsub.f32 %v13538_v17, %v12852_v21  ;;  %v94_v21 = vld [vmem:[%s12542_s1 + $0x1e8] sm:$0xff] }
  0x88   :  { %13536 = vst [vmem:[#allocation176_spill] sm:$0xff] %v9351_v33  ;;  %13537 = vst [vmem:[#allocation177_spill] sm:$0xff] %v9353_v36  ;;  %7190 = vmatprep.subr.bf16.mxu0 %v7189_v41  ;;  %6748 = vmatpush1.bf16.msra.mxu1 %v9351_v33  ;;  %v357_v27 = vand.u32 4294901760, %v90_v16  ;;  %v361_v29 = vand.u32 4294901760, %v92_v46  ;;  %v359_v28 = vand.u32 4294901760, %v89_v59  ;;  %v363_v0 = vand.u32 4294901760, %v91_v19 }
  0x89   :  { %7192 = vmatpush1.bf16.msra.mxu0 %v7191_v37  ;;  %v1990_v14 = vand.u32 4294901760, %v1989_v44  ;;  %v2002_v36 = vand.u32 4294901760, %v2001_v61  ;;  %v2007_v2 = vsub.f32 %v13540_v13, %v12854_v43  ;;  %v1996_v10 = vand.u32 4294901760, %v1995_v22  ;;  %v96_v44 = vld [vmem:[%s12542_s1 + $0x1f8] sm:$0xff]  ;;  %v13547_v22 = vld [vmem:[#allocation87_spill] sm:$0xff] }
  0x8a   :  { %v9373_v49 = vpack.c.bf16 %v361_v29, %v357_v27  ;;  %v9375_v41 = vsub.f32 %v90_v16, %v357_v27  ;;  %v9377_v33 = vsub.f32 %v92_v46, %v361_v29  ;;  %v9385_v17 = vpack.c.bf16 %v363_v0, %v359_v28  ;;  %v93_v16 = vld [vmem:[%s12542_s1 + $0x1e0] sm:$0xff] }
  0x8b   :  { %v7193_v61 = vpack.c.bf16 %v2002_v36, %v1990_v14  ;;  %v2008_v37 = vand.u32 4294901760, %v2007_v2  ;;  %v9387_v43 = vsub.f32 %v89_v59, %v359_v28  ;;  %v9393_v46 = vsub.f32 %v91_v19, %v363_v0  ;;  %v95_v14 = vld [vmem:[%s12542_s1 + $0x1f0] sm:$0xff] }
  0x8c   :  { %13541 = vst [vmem:[#allocation178_spill] sm:$0xff] %v9373_v49  ;;  %13542 = vst [vmem:[#allocation179_spill] sm:$0xff] %v9375_v41  ;;  %6750 = vmatprep.subr.bf16.mxu1 %v9373_v49  ;;  %v12861_v27 = vand.u32 4294901760, %v13547_v22  ;;  %v12864_v29 = vand.u32 4294901760, %v8706_v58  ;;  %v12872_v59 = vand.u32 4294901760, %v8712_v3  ;;  %v365_v36 = vand.u32 4294901760, %v94_v21 }
  0x8d   :  { %13543 = vst [vmem:[#allocation180_spill] sm:$0xff] %v9377_v33  ;;  %13544 = vst [vmem:[#allocation181_spill] sm:$0xff] %v9385_v17  ;;  %v12867_v33 = vand.u32 4294901760, %v8710_v9  ;;  %7194 = vmatprep.subr.bf16.mxu0 %v7193_v61  ;;  %v7195_v2 = vpack.c.bf16 %v2008_v37, %v1996_v10  ;;  %6752 = vmatpush1.bf16.msra.mxu1 %v9385_v17  ;;  %v369_v28 = vand.u32 4294901760, %v96_v44  ;;  %v367_v61 = vand.u32 4294901760, %v93_v16 }
  0x8e   :  { %13545 = vst [vmem:[#allocation182_spill] sm:$0xff] %v9387_v43  ;;  %13546 = vst [vmem:[#allocation183_spill] sm:$0xff] %v9393_v46  ;;  %v2013_v19 = vsub.f32 %v13547_v22, %v12861_v27  ;;  %v2025_v0 = vsub.f32 %v8706_v58, %v12864_v29  ;;  %v2031_v37 = vsub.f32 %v8712_v3, %v12872_v59  ;;  %v371_v29 = vand.u32 4294901760, %v95_v14 }
  0x8f   :  { %v2019_v10 = vsub.f32 %v8710_v9, %v12867_v33  ;;  %7196 = vmatpush1.bf16.msra.mxu0 %v7195_v2  ;;  %v9415_v17 = vpack.c.bf16 %v369_v28, %v365_v36  ;;  %v9417_v49 = vsub.f32 %v94_v21, %v365_v36  ;;  %v9419_v46 = vsub.f32 %v96_v44, %v369_v28  ;;  %v27_v21 = vld [vmem:[%s12543_s0 + $0x8] sm:$0xff] }
  0x90   :  { %v2014_v27 = vand.u32 4294901760, %v2013_v19  ;;  %v2026_v22 = vand.u32 4294901760, %v2025_v0  ;;  %v2032_v58 = vand.u32 4294901760, %v2031_v37  ;;  %v9422_v33 = vsub.f32 %v93_v16, %v367_v61  ;;  %v26_v16 = vld [vmem:[%s12543_s0] sm:$0xff] }
  0x91   :  { %13548 = vst [vmem:[#allocation184_spill] sm:$0xff] %v9415_v17  ;;  %13549 = vst [vmem:[#allocation185_spill] sm:$0xff] %v9417_v49  ;;  %v2020_v43 = vand.u32 4294901760, %v2019_v10  ;;  %6754 = vmatprep.subr.bf16.mxu1 %v9415_v17  ;;  %v12871_v2 = vand.u32 4294901760, %v8717_v38  ;;  %v12870_v9 = vand.u32 4294901760, %v8719_v5  ;;  %v9429_v44 = vpack.c.bf16 %v371_v29, %v367_v61 }
  0x92   :  { %13550 = vst [vmem:[#allocation186_spill] sm:$0xff] %v9419_v46  ;;  %v7197_v36 = vpack.c.bf16 %v2026_v22, %v2014_v27  ;;  %v9431_v28 = vsub.f32 %v95_v14, %v371_v29  ;;  %v12873_v19 = vand.u32 4294901760, %v8730_v32  ;;  %v12876_v22 = vand.u32 4294901760, %v8732_v55 }
  0x93   :  { %13551 = vst [vmem:[#allocation187_spill] sm:$0xff] %v9429_v44  ;;  %v7199_v0 = vpack.c.bf16 %v2032_v58, %v2020_v43  ;;  %v2037_v10 = vsub.f32 %v8717_v38, %v12871_v2  ;;  %v2049_v37 = vsub.f32 %v8719_v5, %v12870_v9  ;;  %6756 = vmatpush1.bf16.msra.mxu1 %v9429_v44  ;;  %v9448_v29 = vand.u32 4294901760, %v27_v21 }
  0x94   :  { %7198 = vmatprep.subr.bf16.mxu0 %v7197_v36  ;;  %v2043_v27 = vsub.f32 %v8730_v32, %v12873_v19  ;;  %v12885_v58 = vand.u32 4294901760, %v8736_v51  ;;  %v12886_v43 = vand.u32 4294901760, %v8745_v42  ;;  %v2055_v9 = vsub.f32 %v8732_v55, %v12876_v22  ;;  %v13556_v55 = vld [vmem:[#allocation100_spill] sm:$0xff] }
  0x95   :  { %13552 = vst [vmem:[#allocation188_spill] sm:$0xff] %v9448_v29  ;;  %7200 = vmatpush1.bf16.msra.mxu0 %v7199_v0  ;;  %v2038_v14 = vand.u32 4294901760, %v2037_v10  ;;  %v2050_v61 = vand.u32 4294901760, %v2049_v37  ;;  %v9455_v36 = vand.u32 4294901760, %v26_v16  ;;  %v9458_v59 = vsub.f32 %v27_v21, %v9448_v29 }
  0x96   :  { %v2044_v2 = vand.u32 4294901760, %v2043_v27  ;;  %v393_v19 = vsub.f32 %v8736_v51, %v12885_v58  ;;  %v405_v0 = vsub.f32 %v8745_v42, %v12886_v43  ;;  %v2056_v37 = vand.u32 4294901760, %v2055_v9  ;;  %v13557_v9 = vld [vmem:[#allocation3_spill] sm:$0xff] }
  0x97   :  { %13553 = vst [vmem:[#allocation189_spill] sm:$0xff] %v9455_v36  ;;  %13554 = vst [vmem:[#allocation190_spill] sm:$0xff] %v9458_v59  ;;  %v7201_v10 = vpack.c.bf16 %v2050_v61, %v2038_v14  ;;  %v9467_v44 = vsub.f32 %v26_v16, %v9455_v36  ;;  %v12889_v22 = vand.u32 4294901760, %v8749_v30  ;;  %v12891_v27 = vand.u32 4294901760, %v9458_v59  ;;  %v13558_v61 = vld [vmem:[#allocation4_spill] sm:$0xff] }
  0x98   :  { %v394_v17 = vand.u32 4294901760, %v393_v19  ;;  %v406_v21 = vand.u32 4294901760, %v405_v0  ;;  %v12890_v32 = vand.u32 4294901760, %v13556_v55  ;;  %v7203_v5 = vpack.c.bf16 %v2056_v37, %v2044_v2  ;;  %v13559_v0 = vld [vmem:[#allocation5_spill] sm:$0xff] }
  0x99   :  { %13555 = vst [vmem:[#allocation191_spill] sm:$0xff] %v9467_v44  ;;  %7202 = vmatprep.subr.bf16.mxu0 %v7201_v10  ;;  %v12894_v58 = vand.u32 4294901760, %v9467_v44  ;;  %v399_v14 = vsub.f32 %v8749_v30, %v12889_v22  ;;  %v7205_v16 = vpack.c.bf16 %v13558_v61, %v13557_v9  ;;  %v376_v43 = vsub.f32 %v9458_v59, %v12891_v27 }
  0x9a   :  { %v6757_v36 = vpack.c.bf16 %v406_v21, %v394_v17  ;;  %v411_v19 = vsub.f32 %v13556_v55, %v12890_v32  ;;  %v7207_v2 = vpack.c.bf16 %v8358_v23, %v13559_v0  ;;  %7204 = vmatpush1.bf16.msra.mxu0 %v7203_v5  ;;  %v12899_v22 = vand.u32 4294901760, %v8788_v7  ;;  %v13560_v32 = vld [vmem:[#allocation107_spill] sm:$0xff]  ;;  %v13588_v0 = vld [vmem:[#allocation46_spill] sm:$0xff] }
  0x9b   :  { %v382_v10 = vsub.f32 %v9467_v44, %v12894_v58  ;;  %v400_v37 = vand.u32 4294901760, %v399_v14  ;;  %v12898_v61 = vand.u32 4294901760, %v8796_v18  ;;  %v377_v9 = vand.u32 4294901760, %v376_v43  ;;  %7206 = vmatprep.subr.bf16.mxu0 %v7205_v16  ;;  %v13561_v58 = vld [vmem:[#allocation9_spill] sm:$0xff]  ;;  %v13562_v44 = vld [vmem:[#allocation10_spill] sm:$0xff] }
  0x9c   :  { %6758 = vmatprep.subr.bf16.mxu1 %v6757_v36  ;;  %v412_v17 = vand.u32 4294901760, %v411_v19  ;;  %v12900_v21 = vand.u32 4294901760, %v8815_v56  ;;  %v12901_v27 = vand.u32 4294901760, %v13560_v32  ;;  %v417_v5 = vsub.f32 %v8788_v7, %v12899_v22  ;;  %v13563_v36 = vld [vmem:[#allocation102_spill] sm:$0xff] }
  0x9d   :  { %v383_v59 = vand.u32 4294901760, %v382_v10  ;;  %v429_v14 = vsub.f32 %v8796_v18, %v12898_v61  ;;  %v7209_v23 = vpack.c.bf16 %v13562_v44, %v13561_v58  ;;  %378 = vmatprep.mubr.f32.mxu1 %v377_v9  ;;  %2061 = vmatmul.mubr.f32.vlgmr.msra.gmra.mrb[0].mxu0 %v13563_v36  ;;  %v12904_v10 = vand.u32 4294901760, %v8852_v15  ;;  %v13587_v58 = vld [vmem:[#allocation45_spill] sm:$0xff] }
  0x9e   :  { %v6759_v43 = vpack.c.bf16 %v412_v17, %v400_v37  ;;  %v423_v16 = vsub.f32 %v8815_v56, %v12900_v21  ;;  %v435_v19 = vsub.f32 %v13560_v32, %v12901_v27  ;;  %7208 = vmatpush1.bf16.msra.mxu0 %v7207_v2  ;;  %v418_v61 = vand.u32 4294901760, %v417_v5  ;;  %v13564_v5 = vld [vmem:[#allocation14_spill] sm:$0xff] }
  0x9f   :  { %384 = vmatmul.mubr.f32.vlgmr.msra.gmra.mrb[0].mxu1 %v383_v59  ;;  %v430_v22 = vand.u32 4294901760, %v429_v14  ;;  %v7211_v9 = vpack.c.bf16 %v8385_v40, %v8383_v39  ;;  %v12903_v37 = vand.u32 4294901760, %v8854_v25  ;;  %7210 = vmatprep.subr.bf16.mxu0 %v7209_v23  ;;  %v441_v21 = vsub.f32 %v8852_v15, %v12904_v10  ;;  %v13565_v14 = vld [vmem:[#allocation16_spill] sm:$0xff] }
  0xa0   :  { %6760 = vmatpush1.bf16.msra.mxu1 %v6759_v43  ;;  %v424_v17 = vand.u32 4294901760, %v423_v16  ;;  %v436_v36 = vand.u32 4294901760, %v435_v19  ;;  %v12907_v27 = vand.u32 4294901760, %v8866_v31  ;;  %v12909_v2 = vand.u32 4294901760, %v8873_v47  ;;  %775 = vmatprep.mubr.f32.mxu1 %v9448_v29  ;;  %v13566_v43 = vld [vmem:[#allocation103_spill] sm:$0xff] }
  0xa1   :  { %v6761_v44 = vpack.c.bf16 %v430_v22, %v418_v61  ;;  %v453_v59 = vsub.f32 %v8854_v25, %v12903_v37  ;;  %v7213_v40 = vpack.c.bf16 %v13565_v14, %v13564_v5  ;;  %2261 = vmatprep.mubr.f32.mxu0 %v13566_v43  ;;  %v442_v16 = vand.u32 4294901760, %v441_v21  ;;  %v13567_v22 = vld [vmem:[#allocation18_spill] sm:$0xff]  ;;  %v13592_v43 = vld [vmem:[#allocation144_spill] sm:$0xff] }
  0xa2   :  { %v6763_v23 = vpack.c.bf16 %v436_v36, %v424_v17  ;;  %v447_v19 = vsub.f32 %v8866_v31, %v12907_v27  ;;  %v7215_v61 = vpack.c.bf16 %v8409_v50, %v13567_v22  ;;  %7212 = vmatpush1.bf16.msra.mxu0 %v7211_v9  ;;  %v459_v10 = vsub.f32 %v8873_v47, %v12909_v2  ;;  %v13568_v27 = vld [vmem:[#allocation20_spill] sm:$0xff]  ;;  %v13569_v50 = vld [vmem:[#allocation22_spill] sm:$0xff] }
  0xa3   :  { %6762 = vmatprep.subr.bf16.mxu1 %v6761_v44  ;;  %v454_v37 = vand.u32 4294901760, %v453_v59  ;;  %v12910_v29 = vand.u32 4294901760, %v8900_v45  ;;  %v12911_v14 = vand.u32 4294901760, %v8902_v20  ;;  %7214 = vmatprep.subr.bf16.mxu0 %v7213_v40  ;;  %v12912_v36 = vand.u32 4294901760, %v8907_v48 }
  0xa4   :  { %6764 = vmatpush1.bf16.msra.mxu1 %v6763_v23  ;;  %v448_v21 = vand.u32 4294901760, %v447_v19  ;;  %v12913_v17 = vand.u32 4294901760, %v8922_v60  ;;  %v7217_v44 = vpack.c.bf16 %v13569_v50, %v13568_v27  ;;  %v460_v59 = vand.u32 4294901760, %v459_v10  ;;  %v13570_v19 = vld [vmem:[#allocation25_spill] sm:$0xff] }
  0xa5   :  { %v6765_v9 = vpack.c.bf16 %v454_v37, %v442_v16  ;;  %v465_v2 = vsub.f32 %v8900_v45, %v12910_v29  ;;  %v477_v22 = vsub.f32 %v8902_v20, %v12911_v14  ;;  %v471_v40 = vsub.f32 %v8907_v48, %v12912_v36 }
  0xa6   :  { %v483_v23 = vsub.f32 %v8922_v60, %v12913_v17  ;;  %v7219_v37 = vpack.c.bf16 %v13570_v19, %v8425_v62  ;;  %v12916_v10 = vand.u32 4294901760, %v8948_v11  ;;  %v6767_v16 = vpack.c.bf16 %v460_v59, %v448_v21  ;;  %7216 = vmatpush1.bf16.msra.mxu0 %v7215_v61 }
  0xa7   :  { %6766 = vmatprep.subr.bf16.mxu1 %v6765_v9  ;;  %v466_v29 = vand.u32 4294901760, %v465_v2  ;;  %v478_v50 = vand.u32 4294901760, %v477_v22  ;;  %v12914_v14 = vand.u32 4294901760, %v8950_v52  ;;  %v472_v27 = vand.u32 4294901760, %v471_v40  ;;  %7218 = vmatprep.subr.bf16.mxu0 %v7217_v44  ;;  %v13571_v22 = vld [vmem:[#allocation28_spill] sm:$0xff]  ;;  %v13572_v40 = vld [vmem:[#allocation31_spill] sm:$0xff] }
  0xa8   :  { %v484_v5 = vand.u32 4294901760, %v483_v23  ;;  %v489_v36 = vsub.f32 %v8948_v11, %v12916_v10  ;;  %v12915_v17 = vand.u32 4294901760, %v8962_v4  ;;  %6768 = vmatpush1.bf16.msra.mxu1 %v6767_v16  ;;  %v12917_v2 = vand.u32 4294901760, %v8969_v26 }
  0xa9   :  { %v6769_v19 = vpack.c.bf16 %v478_v50, %v466_v29  ;;  %v501_v21 = vsub.f32 %v8950_v52, %v12914_v14  ;;  %v7221_v61 = vpack.c.bf16 %v13571_v22, %v8442_v6  ;;  %v7223_v23 = vpack.c.bf16 %v13572_v40, %v8457_v12  ;;  %v13577_v12 = vld [vmem:[#allocation132_spill] sm:$0xff] }
  0xaa   :  { %v6771_v9 = vpack.c.bf16 %v484_v5, %v472_v27  ;;  %v490_v59 = vand.u32 4294901760, %v489_v36  ;;  %v495_v44 = vsub.f32 %v8962_v4, %v12915_v17  ;;  %7220 = vmatpush1.bf16.msra.mxu0 %v7219_v37  ;;  %v507_v29 = vsub.f32 %v8969_v26, %v12917_v2  ;;  %v13573_v17 = vld [vmem:[#allocation34_spill] sm:$0xff] }
  0xab   :  { %6770 = vmatprep.subr.bf16.mxu1 %v6769_v19  ;;  %v502_v50 = vand.u32 4294901760, %v501_v21  ;;  %v12919_v16 = vand.u32 4294901760, %v8995_v63  ;;  %v12921_v14 = vand.u32 4294901760, %v8997_v24  ;;  %7222 = vmatprep.subr.bf16.mxu0 %v7221_v61  ;;  %v12923_v5 = vand.u32 4294901760, %v9001_v8 }
  0xac   :  { %v496_v27 = vand.u32 4294901760, %v495_v44  ;;  %v12924_v36 = vand.u32 4294901760, %v9016_v1  ;;  %v7225_v10 = vpack.c.bf16 %v13573_v17, %v8471_v34  ;;  %6772 = vmatpush1.bf16.msra.mxu1 %v6771_v9  ;;  %v508_v37 = vand.u32 4294901760, %v507_v29  ;;  %v13574_v17 = vld [vmem:[#allocation36_spill] sm:$0xff]  ;;  %v13575_v9 = vld [vmem:[#allocation37_spill] sm:$0xff] }
  0xad   :  { %v6773_v19 = vpack.c.bf16 %v502_v50, %v490_v59  ;;  %v513_v21 = vsub.f32 %v8995_v63, %v12919_v16  ;;  %v525_v2 = vsub.f32 %v8997_v24, %v12921_v14  ;;  %v519_v61 = vsub.f32 %v9001_v8, %v12923_v5  ;;  %v13576_v50 = vld [vmem:[#allocation131_spill] sm:$0xff] }
  0xae   :  { %v531_v44 = vsub.f32 %v9016_v1, %v12924_v36  ;;  %v7227_v59 = vpack.c.bf16 %v13575_v9, %v13574_v17  ;;  %v12926_v29 = vand.u32 4294901760, %v13576_v50  ;;  %v6775_v34 = vpack.c.bf16 %v508_v37, %v496_v27  ;;  %7224 = vmatpush1.bf16.msra.mxu0 %v7223_v23  ;;  %v13578_v36 = vld [vmem:[#allocation134_spill] sm:$0xff]  ;;  %v13579_v23 = vld [vmem:[#allocation135_spill] sm:$0xff]  ;;  %v13581_v37 = vld [vmem:[#allocation40_spill] sm:$0xff] }
  0xaf   :  { %6774 = vmatprep.subr.bf16.mxu1 %v6773_v19  ;;  %v514_v16 = vand.u32 4294901760, %v513_v21  ;;  %v526_v40 = vand.u32 4294901760, %v525_v2  ;;  %v12928_v14 = vand.u32 4294901760, %v13577_v12  ;;  %v520_v22 = vand.u32 4294901760, %v519_v61  ;;  %7226 = vmatprep.subr.bf16.mxu0 %v7225_v10  ;;  %v13580_v2 = vld [vmem:[#allocation39_spill] sm:$0xff] }
  0xb0   :  { %v532_v6 = vand.u32 4294901760, %v531_v44  ;;  %v537_v5 = vsub.f32 %v13576_v50, %v12926_v29  ;;  %v12929_v62 = vand.u32 4294901760, %v13578_v36  ;;  %6776 = vmatpush1.bf16.msra.mxu1 %v6775_v34  ;;  %v12930_v19 = vand.u32 4294901760, %v13579_v23  ;;  %v13582_v29 = vld [vmem:[#allocation42_spill] sm:$0xff]  ;;  %v13583_v17 = vld [vmem:[#allocation43_spill] sm:$0xff] }
  0xb1   :  { %v6777_v9 = vpack.c.bf16 %v526_v40, %v514_v16  ;;  %v549_v27 = vsub.f32 %v13577_v12, %v12928_v14  ;;  %v7229_v21 = vpack.c.bf16 %v13581_v37, %v13580_v2  ;;  %v7231_v39 = vpack.c.bf16 %v13583_v17, %v13582_v29  ;;  %v13584_v14 = vld [vmem:[#allocation138_spill] sm:$0xff]  ;;  %v13586_v2 = vld [vmem:[#allocation141_spill] sm:$0xff] }
  0xb2   :  { %v6779_v61 = vpack.c.bf16 %v532_v6, %v520_v22  ;;  %v538_v44 = vand.u32 4294901760, %v537_v5  ;;  %v543_v10 = vsub.f32 %v13578_v36, %v12929_v62  ;;  %7228 = vmatpush1.bf16.msra.mxu0 %v7227_v59  ;;  %v555_v40 = vsub.f32 %v13579_v23, %v12930_v19  ;;  %v13585_v22 = vld [vmem:[#allocation139_spill] sm:$0xff] }
  0xb3   :  { %6778 = vmatprep.subr.bf16.mxu1 %v6777_v9  ;;  %v550_v34 = vand.u32 4294901760, %v549_v27  ;;  %v12931_v16 = vand.u32 4294901760, %v9081_v35  ;;  %v12932_v37 = vand.u32 4294901760, %v13584_v14  ;;  %7230 = vmatprep.subr.bf16.mxu0 %v7229_v21  ;;  %v12936_v5 = vand.u32 4294901760, %v13585_v22 }
  0xb4   :  { %v544_v6 = vand.u32 4294901760, %v543_v10  ;;  %v12937_v62 = vand.u32 4294901760, %v13586_v2  ;;  %v7233_v17 = vpack.c.bf16 %v13588_v0, %v13587_v58  ;;  %6780 = vmatpush1.bf16.msra.mxu1 %v6779_v61  ;;  %v556_v59 = vand.u32 4294901760, %v555_v40  ;;  %v13589_v0 = vld [vmem:[#allocation48_spill] sm:$0xff]  ;;  %v13590_v61 = vld [vmem:[#allocation49_spill] sm:$0xff] }
  0xb5   :  { %v6781_v9 = vpack.c.bf16 %v550_v34, %v538_v44  ;;  %v561_v27 = vsub.f32 %v9081_v35, %v12931_v16  ;;  %v573_v19 = vsub.f32 %v13584_v14, %v12932_v37  ;;  %v567_v21 = vsub.f32 %v13585_v22, %v12936_v5  ;;  %v13591_v34 = vld [vmem:[#allocation143_spill] sm:$0xff]  ;;  %v13604_v22 = vld [vmem:[#allocation58_spill] sm:$0xff] }
  0xb6   :  { %v579_v10 = vsub.f32 %v13586_v2, %v12937_v62  ;;  %v7235_v44 = vpack.c.bf16 %v13590_v61, %v13589_v0  ;;  %v12939_v40 = vand.u32 4294901760, %v13591_v34  ;;  %v6783_v58 = vpack.c.bf16 %v556_v59, %v544_v6  ;;  %7232 = vmatpush1.bf16.msra.mxu0 %v7231_v39  ;;  %v13593_v62 = vld [vmem:[#allocation146_spill] sm:$0xff]  ;;  %v13594_v39 = vld [vmem:[#allocation147_spill] sm:$0xff]  ;;  %v13596_v59 = vld [vmem:[#allocation52_spill] sm:$0xff] }
  0xb7   :  { %6782 = vmatprep.subr.bf16.mxu1 %v6781_v9  ;;  %v562_v16 = vand.u32 4294901760, %v561_v27  ;;  %v574_v29 = vand.u32 4294901760, %v573_v19  ;;  %v12941_v37 = vand.u32 4294901760, %v13592_v43  ;;  %v568_v14 = vand.u32 4294901760, %v567_v21  ;;  %7234 = vmatprep.subr.bf16.mxu0 %v7233_v17  ;;  %v13595_v19 = vld [vmem:[#allocation51_spill] sm:$0xff] }
  0xb8   :  { %v580_v35 = vand.u32 4294901760, %v579_v10  ;;  %v585_v5 = vsub.f32 %v13591_v34, %v12939_v40  ;;  %v12943_v2 = vand.u32 4294901760, %v13593_v62  ;;  %6784 = vmatpush1.bf16.msra.mxu1 %v6783_v58  ;;  %v12946_v9 = vand.u32 4294901760, %v13594_v39  ;;  %v13597_v40 = vld [vmem:[#allocation54_spill] sm:$0xff]  ;;  %v13598_v0 = vld [vmem:[#allocation55_spill] sm:$0xff] }
  0xb9   :  { %v6785_v61 = vpack.c.bf16 %v574_v29, %v562_v16  ;;  %v597_v6 = vsub.f32 %v13592_v43, %v12941_v37  ;;  %v7237_v27 = vpack.c.bf16 %v13596_v59, %v13595_v19  ;;  %v7239_v34 = vpack.c.bf16 %v13598_v0, %v13597_v40  ;;  %v13599_v16 = vld [vmem:[#allocation149_spill] sm:$0xff]  ;;  %v13600_v43 = vld [vmem:[#allocation150_spill] sm:$0xff] }
  0xba   :  { %v6787_v21 = vpack.c.bf16 %v580_v35, %v568_v14  ;;  %v586_v10 = vand.u32 4294901760, %v585_v5  ;;  %v591_v17 = vsub.f32 %v13593_v62, %v12943_v2  ;;  %7236 = vmatpush1.bf16.msra.mxu0 %v7235_v44  ;;  %v603_v29 = vsub.f32 %v13594_v39, %v12946_v9  ;;  %v13601_v14 = vld [vmem:[#allocation151_spill] sm:$0xff]  ;;  %v13602_v19 = vld [vmem:[#allocation153_spill] sm:$0xff] }
  0xbb   :  { %6786 = vmatprep.subr.bf16.mxu1 %v6785_v61  ;;  %v598_v58 = vand.u32 4294901760, %v597_v6  ;;  %v12947_v37 = vand.u32 4294901760, %v13599_v16  ;;  %v12949_v59 = vand.u32 4294901760, %v13600_v43  ;;  %7238 = vmatprep.subr.bf16.mxu0 %v7237_v27  ;;  %v12952_v5 = vand.u32 4294901760, %v13601_v14  ;;  %v13603_v62 = vld [vmem:[#allocation57_spill] sm:$0xff] }
  0xbc   :  { %v592_v35 = vand.u32 4294901760, %v591_v17  ;;  %v12953_v2 = vand.u32 4294901760, %v13602_v19  ;;  %v7241_v0 = vpack.c.bf16 %v13604_v22, %v13603_v62  ;;  %6788 = vmatpush1.bf16.msra.mxu1 %v6787_v21  ;;  %v604_v44 = vand.u32 4294901760, %v603_v29  ;;  %v13605_v22 = vld [vmem:[#allocation60_spill] sm:$0xff]  ;;  %v13606_v21 = vld [vmem:[#allocation61_spill] sm:$0xff] }
  0xbd   :  { %v6789_v61 = vpack.c.bf16 %v598_v58, %v586_v10  ;;  %v609_v6 = vsub.f32 %v13599_v16, %v12947_v37  ;;  %v621_v9 = vsub.f32 %v13600_v43, %v12949_v59  ;;  %v615_v27 = vsub.f32 %v13601_v14, %v12952_v5  ;;  %v13607_v58 = vld [vmem:[#allocation155_spill] sm:$0xff]  ;;  %v13608_v16 = vld [vmem:[#allocation156_spill] sm:$0xff]  ;;  %v13620_v14 = vld [vmem:[#allocation70_spill] sm:$0xff] }
  0xbe   :  { %v627_v17 = vsub.f32 %v13602_v19, %v12953_v2  ;;  %v7243_v10 = vpack.c.bf16 %v13606_v21, %v13605_v22  ;;  %v12955_v29 = vand.u32 4294901760, %v13607_v58  ;;  %v6791_v62 = vpack.c.bf16 %v604_v44, %v592_v35  ;;  %7240 = vmatpush1.bf16.msra.mxu0 %v7239_v34  ;;  %v13609_v2 = vld [vmem:[#allocation158_spill] sm:$0xff]  ;;  %v13610_v34 = vld [vmem:[#allocation159_spill] sm:$0xff]  ;;  %v13612_v44 = vld [vmem:[#allocation64_spill] sm:$0xff] }
  0xbf   :  { %6790 = vmatprep.subr.bf16.mxu1 %v6789_v61  ;;  %v610_v37 = vand.u32 4294901760, %v609_v6  ;;  %v622_v40 = vand.u32 4294901760, %v621_v9  ;;  %v12957_v59 = vand.u32 4294901760, %v13608_v16  ;;  %v616_v43 = vand.u32 4294901760, %v615_v27  ;;  %7242 = vmatprep.subr.bf16.mxu0 %v7241_v0  ;;  %v13611_v9 = vld [vmem:[#allocation63_spill] sm:$0xff] }
  0xc0   :  { %v628_v39 = vand.u32 4294901760, %v627_v17  ;;  %v633_v5 = vsub.f32 %v13607_v58, %v12955_v29  ;;  %v12959_v19 = vand.u32 4294901760, %v13609_v2  ;;  %6792 = vmatpush1.bf16.msra.mxu1 %v6791_v62  ;;  %v12962_v61 = vand.u32 4294901760, %v13610_v34  ;;  %v13613_v29 = vld [vmem:[#allocation66_spill] sm:$0xff]  ;;  %v13614_v22 = vld [vmem:[#allocation67_spill] sm:$0xff] }
  0xc1   :  { %v6793_v21 = vpack.c.bf16 %v622_v40, %v610_v37  ;;  %v645_v35 = vsub.f32 %v13608_v16, %v12957_v59  ;;  %v7245_v6 = vpack.c.bf16 %v13612_v44, %v13611_v9  ;;  %v7247_v58 = vpack.c.bf16 %v13614_v22, %v13613_v29  ;;  %v13615_v40 = vld [vmem:[#allocation161_spill] sm:$0xff]  ;;  %v13616_v16 = vld [vmem:[#allocation162_spill] sm:$0xff] }
  0xc2   :  { %v6795_v27 = vpack.c.bf16 %v628_v39, %v616_v43  ;;  %v634_v17 = vand.u32 4294901760, %v633_v5  ;;  %v639_v0 = vsub.f32 %v13609_v2, %v12959_v19  ;;  %7244 = vmatpush1.bf16.msra.mxu0 %v7243_v10  ;;  %v651_v37 = vsub.f32 %v13610_v34, %v12962_v61  ;;  %v13617_v39 = vld [vmem:[#allocation163_spill] sm:$0xff]  ;;  %v13618_v9 = vld [vmem:[#allocation165_spill] sm:$0xff] }
  0xc3   :  { %6794 = vmatprep.subr.bf16.mxu1 %v6793_v21  ;;  %v646_v62 = vand.u32 4294901760, %v645_v35  ;;  %v12963_v59 = vand.u32 4294901760, %v13615_v40  ;;  %v12965_v44 = vand.u32 4294901760, %v13616_v16  ;;  %7246 = vmatprep.subr.bf16.mxu0 %v7245_v6  ;;  %v12968_v5 = vand.u32 4294901760, %v13617_v39  ;;  %v13619_v2 = vld [vmem:[#allocation69_spill] sm:$0xff] }
  0xc4   :  { %v640_v43 = vand.u32 4294901760, %v639_v0  ;;  %v12969_v19 = vand.u32 4294901760, %v13618_v9  ;;  %v7249_v22 = vpack.c.bf16 %v13620_v14, %v13619_v2  ;;  %6796 = vmatpush1.bf16.msra.mxu1 %v6795_v27  ;;  %v652_v10 = vand.u32 4294901760, %v651_v37  ;;  %v13621_v14 = vld [vmem:[#allocation72_spill] sm:$0xff]  ;;  %v13622_v27 = vld [vmem:[#allocation73_spill] sm:$0xff] }
  0xc5   :  { %v6797_v21 = vpack.c.bf16 %v646_v62, %v634_v17  ;;  %v657_v35 = vsub.f32 %v13615_v40, %v12963_v59  ;;  %v669_v61 = vsub.f32 %v13616_v16, %v12965_v44  ;;  %v663_v6 = vsub.f32 %v13617_v39, %v12968_v5  ;;  %v13623_v62 = vld [vmem:[#allocation167_spill] sm:$0xff]  ;;  %v13624_v40 = vld [vmem:[#allocation168_spill] sm:$0xff] }
  0xc6   :  { %v675_v0 = vsub.f32 %v13618_v9, %v12969_v19  ;;  %v7251_v17 = vpack.c.bf16 %v13622_v27, %v13621_v14  ;;  %v12971_v37 = vand.u32 4294901760, %v13623_v62  ;;  %v6799_v2 = vpack.c.bf16 %v652_v10, %v640_v43  ;;  %7248 = vmatpush1.bf16.msra.mxu0 %v7247_v58  ;;  %v13625_v19 = vld [vmem:[#allocation170_spill] sm:$0xff]  ;;  %v13626_v58 = vld [vmem:[#allocation171_spill] sm:$0xff]  ;;  %v13628_v10 = vld [vmem:[#allocation76_spill] sm:$0xff] }
  0xc7   :  { %6798 = vmatprep.subr.bf16.mxu1 %v6797_v21  ;;  %v658_v59 = vand.u32 4294901760, %v657_v35  ;;  %v670_v29 = vand.u32 4294901760, %v669_v61  ;;  %v12972_v44 = vand.u32 4294901760, %v13624_v40  ;;  %v664_v16 = vand.u32 4294901760, %v663_v6  ;;  %7250 = vmatprep.subr.bf16.mxu0 %v7249_v22  ;;  %v13627_v61 = vld [vmem:[#allocation75_spill] sm:$0xff] }
  0xc8   :  { %v676_v34 = vand.u32 4294901760, %v675_v0  ;;  %v681_v5 = vsub.f32 %v13623_v62, %v12971_v37  ;;  %v12973_v9 = vand.u32 4294901760, %v13625_v19  ;;  %6800 = vmatpush1.bf16.msra.mxu1 %v6799_v2  ;;  %v12976_v21 = vand.u32 4294901760, %v13626_v58  ;;  %v13629_v37 = vld [vmem:[#allocation78_spill] sm:$0xff] }
  0xc9   :  { %v6801_v27 = vpack.c.bf16 %v670_v29, %v658_v59  ;;  %v693_v43 = vsub.f32 %v13624_v40, %v12972_v44  ;;  %v7253_v35 = vpack.c.bf16 %v13628_v10, %v13627_v61  ;;  %v7255_v14 = vpack.c.bf16 %v13529_v53, %v13629_v37  ;;  %v13631_v10 = vld [vmem:[#allocation177_spill] sm:$0xff] }
  0xca   :  { %v6803_v6 = vpack.c.bf16 %v676_v34, %v664_v16  ;;  %v682_v0 = vand.u32 4294901760, %v681_v5  ;;  %v687_v22 = vsub.f32 %v13625_v19, %v12973_v9  ;;  %7252 = vmatpush1.bf16.msra.mxu0 %v7251_v17  ;;  %v699_v59 = vsub.f32 %v13626_v58, %v12976_v21  ;;  %v13630_v34 = vld [vmem:[#allocation175_spill] sm:$0xff]  ;;  %v13632_v61 = vld [vmem:[#allocation81_spill] sm:$0xff]  ;;  %v13633_v19 = vld [vmem:[#allocation82_spill] sm:$0xff] }
  0xcb   :  { %6802 = vmatprep.subr.bf16.mxu1 %v6801_v27  ;;  %v694_v2 = vand.u32 4294901760, %v693_v43  ;;  %v12977_v29 = vand.u32 4294901760, %v9333_v54  ;;  %v12978_v44 = vand.u32 4294901760, %v9335_v57  ;;  %7254 = vmatprep.subr.bf16.mxu0 %v7253_v35  ;;  %v12981_v5 = vand.u32 4294901760, %v13630_v34 }
  0xcc   :  { %v688_v16 = vand.u32 4294901760, %v687_v22  ;;  %v12982_v9 = vand.u32 4294901760, %v13631_v10  ;;  %v7257_v53 = vpack.c.bf16 %v13633_v19, %v13632_v61  ;;  %6804 = vmatpush1.bf16.msra.mxu1 %v6803_v6  ;;  %v700_v17 = vand.u32 4294901760, %v699_v59  ;;  %v13634_v19 = vld [vmem:[#allocation84_spill] sm:$0xff] }
  0xcd   :  { %v6805_v27 = vpack.c.bf16 %v694_v2, %v682_v0  ;;  %v705_v43 = vsub.f32 %v9333_v54, %v12977_v29  ;;  %v717_v21 = vsub.f32 %v9335_v57, %v12978_v44  ;;  %v711_v35 = vsub.f32 %v13630_v34, %v12981_v5  ;;  %v13635_v61 = vld [vmem:[#allocation180_spill] sm:$0xff] }
  0xce   :  { %v723_v22 = vsub.f32 %v13631_v10, %v12982_v9  ;;  %v7259_v6 = vpack.c.bf16 %v13540_v13, %v13634_v19  ;;  %v12985_v0 = vand.u32 4294901760, %v9375_v41  ;;  %v6807_v2 = vpack.c.bf16 %v700_v17, %v688_v16  ;;  %7256 = vmatpush1.bf16.msra.mxu0 %v7255_v14  ;;  %v13636_v9 = vld [vmem:[#allocation182_spill] sm:$0xff]  ;;  %v13637_v14 = vld [vmem:[#allocation183_spill] sm:$0xff]  ;;  %v13639_v17 = vld [vmem:[#allocation88_spill] sm:$0xff] }
  0xcf   :  { %6806 = vmatprep.subr.bf16.mxu1 %v6805_v27  ;;  %v706_v59 = vand.u32 4294901760, %v705_v43  ;;  %v718_v29 = vand.u32 4294901760, %v717_v21  ;;  %v12986_v44 = vand.u32 4294901760, %v13635_v61  ;;  %v712_v37 = vand.u32 4294901760, %v711_v35  ;;  %7258 = vmatprep.subr.bf16.mxu0 %v7257_v53  ;;  %v13638_v21 = vld [vmem:[#allocation87_spill] sm:$0xff] }
  0xd0   :  { %v724_v57 = vand.u32 4294901760, %v723_v22  ;;  %v729_v5 = vsub.f32 %v9375_v41, %v12985_v0  ;;  %v12987_v10 = vand.u32 4294901760, %v13636_v9  ;;  %6808 = vmatpush1.bf16.msra.mxu1 %v6807_v2  ;;  %v12989_v27 = vand.u32 4294901760, %v13637_v14  ;;  %v13640_v0 = vld [vmem:[#allocation90_spill] sm:$0xff] }
  0xd1   :  { %v6809_v13 = vpack.c.bf16 %v718_v29, %v706_v59  ;;  %v741_v16 = vsub.f32 %v13635_v61, %v12986_v44  ;;  %v7261_v43 = vpack.c.bf16 %v13639_v17, %v13638_v21  ;;  %v7263_v19 = vpack.c.bf16 %v8712_v3, %v13640_v0 }
  0xd2   :  { %v6811_v35 = vpack.c.bf16 %v724_v57, %v712_v37  ;;  %v730_v22 = vand.u32 4294901760, %v729_v5  ;;  %v735_v53 = vsub.f32 %v13636_v9, %v12987_v10  ;;  %7260 = vmatpush1.bf16.msra.mxu0 %v7259_v6  ;;  %v747_v2 = vsub.f32 %v13637_v14, %v12989_v27  ;;  %v13641_v10 = vld [vmem:[#allocation94_spill] sm:$0xff] }
  0xd3   :  { %6810 = vmatprep.subr.bf16.mxu1 %v6809_v13  ;;  %v742_v29 = vand.u32 4294901760, %v741_v16  ;;  %v12990_v59 = vand.u32 4294901760, %v9417_v49  ;;  %v12992_v44 = vand.u32 4294901760, %v9419_v46  ;;  %7262 = vmatprep.subr.bf16.mxu0 %v7261_v43  ;;  %v12993_v37 = vand.u32 4294901760, %v9422_v33 }
  0xd4   :  { %v736_v57 = vand.u32 4294901760, %v735_v53  ;;  %v12994_v5 = vand.u32 4294901760, %v9431_v28  ;;  %v7265_v3 = vpack.c.bf16 %v13641_v10, %v8717_v38  ;;  %6812 = vmatpush1.bf16.msra.mxu1 %v6811_v35  ;;  %v748_v6 = vand.u32 4294901760, %v747_v2  ;;  %v13642_v10 = vld [vmem:[#allocation96_spill] sm:$0xff]  ;;  %v13643_v35 = vld [vmem:[#allocation97_spill] sm:$0xff] }
  0xd5   :  { %v6813_v13 = vpack.c.bf16 %v742_v29, %v730_v22  ;;  %v753_v16 = vsub.f32 %v9417_v49, %v12990_v59  ;;  %v765_v27 = vsub.f32 %v9419_v46, %v12992_v44  ;;  %v759_v43 = vsub.f32 %v9422_v33, %v12993_v37 }
  0xd6   :  { %v771_v53 = vsub.f32 %v9431_v28, %v12994_v5  ;;  %v7267_v22 = vpack.c.bf16 %v13643_v35, %v13642_v10  ;;  %v6821_v29 = vpack.c.bf16 %v8745_v42, %v8736_v51  ;;  %v6815_v2 = vpack.c.bf16 %v748_v6, %v736_v57  ;;  %7264 = vmatpush1.bf16.msra.mxu0 %v7263_v19 }
  0xd7   :  { %6814 = vmatprep.subr.bf16.mxu1 %v6813_v13  ;;  %v754_v59 = vand.u32 4294901760, %v753_v16  ;;  %v766_v38 = vand.u32 4294901760, %v765_v27  ;;  %v6823_v44 = vpack.c.bf16 %v13556_v55, %v8749_v30  ;;  %v760_v0 = vand.u32 4294901760, %v759_v43  ;;  %7266 = vmatprep.subr.bf16.mxu0 %v7265_v3 }
  0xd8   :  { %v772_v37 = vand.u32 4294901760, %v771_v53  ;;  %v6825_v5 = vpack.c.bf16 %v8796_v18, %v8788_v7  ;;  %v6827_v35 = vpack.c.bf16 %v13560_v32, %v8815_v56  ;;  %6816 = vmatpush1.bf16.msra.mxu1 %v6815_v2  ;;  %v6829_v57 = vpack.c.bf16 %v8854_v25, %v8852_v15  ;;  %v13645_v53 = vld [vmem:[#allocation137_spill] sm:$0xff]  ;;  %v13646_v2 = vld [vmem:[#allocation138_spill] sm:$0xff] }
  0xd9   :  { %v6817_v10 = vpack.c.bf16 %v766_v38, %v754_v59  ;;  %v6831_v19 = vpack.c.bf16 %v8873_v47, %v8866_v31  ;;  %v6833_v27 = vpack.c.bf16 %v8902_v20, %v8900_v45  ;;  %v6835_v3 = vpack.c.bf16 %v8922_v60, %v8907_v48  ;;  %v13653_v60 = vld [vmem:[#allocation149_spill] sm:$0xff]  ;;  %v13655_v48 = vld [vmem:[#allocation151_spill] sm:$0xff]  ;;  %v13665_v31 = vld [vmem:[#allocation6_spill] sm:$0xff] }
  0xda   :  { %v6819_v13 = vpack.c.bf16 %v772_v37, %v760_v0  ;;  %v6837_v6 = vpack.c.bf16 %v8950_v52, %v8948_v11  ;;  %v6839_v16 = vpack.c.bf16 %v8969_v26, %v8962_v4  ;;  %7268 = vmatpush1.bf16.msra.mxu0 %v7267_v22  ;;  %v6841_v38 = vpack.c.bf16 %v8997_v24, %v8995_v63  ;;  %v13644_v37 = vld [vmem:[#allocation2_spill] sm:$0xff]  ;;  %v13647_v26 = vld [vmem:[#allocation139_spill] sm:$0xff]  ;;  %v13650_v11 = vld [vmem:[#allocation144_spill] sm:$0xff] }
  0xdb   :  { %6818 = vmatprep.subr.bf16.mxu1 %v6817_v10  ;;  %v6843_v59 = vpack.c.bf16 %v9016_v1, %v9001_v8  ;;  %v6845_v0 = vpack.c.bf16 %v13577_v12, %v13576_v50  ;;  %7270 = vmatprep.subr.bf16.mxu0 %v13644_v37  ;;  %v6847_v43 = vpack.c.bf16 %v13579_v23, %v13578_v36  ;;  %v13648_v10 = vld [vmem:[#allocation141_spill] sm:$0xff]  ;;  %v13649_v4 = vld [vmem:[#allocation143_spill] sm:$0xff]  ;;  %v13651_v63 = vld [vmem:[#allocation146_spill] sm:$0xff] }
  0xdc   :  { %v6849_v52 = vpack.c.bf16 %v13646_v2, %v13645_v53  ;;  %v6851_v22 = vpack.c.bf16 %v13648_v10, %v13647_v26  ;;  %v6853_v24 = vpack.c.bf16 %v13650_v11, %v13649_v4  ;;  %6820 = vmatpush1.bf16.msra.mxu1 %v6819_v13  ;;  %v13652_v1 = vld [vmem:[#allocation147_spill] sm:$0xff]  ;;  %v13654_v12 = vld [vmem:[#allocation150_spill] sm:$0xff]  ;;  %v13656_v20 = vld [vmem:[#allocation153_spill] sm:$0xff] }
  0xdd   :  { %v6855_v8 = vpack.c.bf16 %v13652_v1, %v13651_v63  ;;  %v6857_v50 = vpack.c.bf16 %v13654_v12, %v13653_v60  ;;  %v6859_v45 = vpack.c.bf16 %v13656_v20, %v13655_v48  ;;  %v13657_v23 = vld [vmem:[#allocation155_spill] sm:$0xff]  ;;  %v13658_v36 = vld [vmem:[#allocation156_spill] sm:$0xff]  ;;  %6822 = vmatprep.subr.bf16.mxu1 %v6821_v29  ;;  %v13660_v10 = vld [vmem:[#allocation158_spill] sm:$0xff]  ;;  %v6869_v20 = vpack.c.bf16 %v13624_v40, %v13623_v62 }
  0xde   :  { %v6861_v47 = vpack.c.bf16 %v13658_v36, %v13657_v23  ;;  %v13659_v2 = vld [vmem:[#allocation104_spill] sm:$0xff]  ;;  %v13661_v26 = vld [vmem:[#allocation159_spill] sm:$0xff]  ;;  %v13662_v11 = vld [vmem:[#allocation161_spill] sm:$0xff]  ;;  %v6881_v40 = vpack.c.bf16 %v9419_v46, %v9417_v49 }
  0xdf   :  { %2264 = vmatmul.mubr.f32.vlgmr.msra.gmra.mrb[0].mxu0 %v13659_v2  ;;  %v6863_v53 = vpack.c.bf16 %v13661_v26, %v13660_v10  ;;  %v13663_v13 = vld [vmem:[#allocation162_spill] sm:$0xff]  ;;  %v13664_v1 = vld [vmem:[#allocation165_spill] sm:$0xff] }
  0xe0   :  { %v6865_v4 = vpack.c.bf16 %v13663_v13, %v13662_v11  ;;  %v6867_v63 = vpack.c.bf16 %v13664_v1, %v13617_v39  ;;  %7272 = vmatpush1.bf16.msra.mxu0 %v13665_v31  ;;  %v13666_v48 = vld [vmem:[#allocation170_spill] sm:$0xff]  ;;  %v13668_v12 = vld [vmem:[#allocation177_spill] sm:$0xff]  ;;  %v13670_v13 = vld [vmem:[#allocation8_spill] sm:$0xff]  ;;  %v6877_v1 = vpack.c.bf16 %v13635_v61, %v9375_v41  ;;  %v6879_v39 = vpack.c.bf16 %v13637_v14, %v13636_v9 }
  0xe1   :  { %v6871_v36 = vpack.c.bf16 %v13626_v58, %v13666_v48  ;;  %v13667_v29 = vld [vmem:[#allocation174_spill] sm:$0xff]  ;;  %v6875_v26 = vpack.c.bf16 %v13668_v12, %v13630_v34  ;;  %v13669_v10 = vld [vmem:[#allocation189_spill] sm:$0xff]  ;;  %7274 = vmatprep.subr.bf16.mxu0 %v13670_v13  ;;  %v13672_v12 = vld [vmem:[#allocation103_spill] sm:$0xff] }
  0xe2   :  { %v6873_v23 = vpack.c.bf16 %v13667_v29, %v9333_v54  ;;  %777 = vmatmul.mubr.f32.vlgmr.msra.gmra.mrb[0].mxu1 %v13669_v10  ;;  %v13671_v54 = vld [vmem:[#allocation190_spill] sm:$0xff]  ;;  %v13673_v10 = vand.u32 4294901760, %v13672_v12  ;;  %v13674_v34 = vld [vmem:[#allocation11_spill] sm:$0xff]  ;;  %v13676_v14 = vld [vmem:[#allocation17_spill] sm:$0xff] }
  0xe3   :  { %6824 = vmatpush1.bf16.msra.mxu1 %v6823_v44  ;;  %977 = vmatprep.mubr.f32.mxu1 %v13671_v54  ;;  %v13675_v58 = vld [vmem:[#allocation15_spill] sm:$0xff]  ;;  %v13677_v9 = vld [vmem:[#allocation21_spill] sm:$0xff]  ;;  %v13678_v44 = vld [vmem:[#allocation24_spill] sm:$0xff] }
  0xe4   :  { %6826 = vmatprep.subr.bf16.mxu1 %v6825_v5  ;;  %2401 = vmatprep.mubr.f32.mxu0 %v13673_v10  ;;  %v13679_v29 = vld [vmem:[#allocation26_spill] sm:$0xff]  ;;  %v13680_v12 = vld [vmem:[#allocation29_spill] sm:$0xff]  ;;  %v13681_v5 = vld [vmem:[#allocation32_spill] sm:$0xff] }
  0xe5   :  { %7276 = vmatpush1.bf16.msra.mxu0 %v13674_v34  ;;  %v13694_v10 = vld [vmem:[#allocation71_spill] sm:$0xff] }
  0xe6   :  { %7278 = vmatprep.subr.bf16.mxu0 %v13675_v58  ;;  %v13706_v61 = vld [vmem:[#allocation95_spill] sm:$0xff] }
  0xe7   :  { %6828 = vmatpush1.bf16.msra.mxu1 %v6827_v35  ;;  %v13682_v35 = vld [vmem:[#allocation35_spill] sm:$0xff] }
  0xe8   :  { %6830 = vmatprep.subr.bf16.mxu1 %v6829_v57  ;;  %v13683_v57 = vld [vmem:[#allocation38_spill] sm:$0xff] }
  0xe9   :  { %7280 = vmatpush1.bf16.msra.mxu0 %v13676_v14 }
  0xea   :  { %7282 = vmatprep.subr.bf16.mxu0 %v13677_v9 }
  0xeb   :  { %6832 = vmatpush1.bf16.msra.mxu1 %v6831_v19  ;;  %v13684_v19 = vld [vmem:[#allocation41_spill] sm:$0xff] }
  0xec   :  { %6834 = vmatprep.subr.bf16.mxu1 %v6833_v27  ;;  %v13685_v27 = vld [vmem:[#allocation44_spill] sm:$0xff] }
  0xed   :  { %7284 = vmatpush1.bf16.msra.mxu0 %v13678_v44 }
  0xee   :  { %7286 = vmatprep.subr.bf16.mxu0 %v13679_v29 }
  0xef   :  { %6836 = vmatpush1.bf16.msra.mxu1 %v6835_v3  ;;  %v13686_v3 = vld [vmem:[#allocation47_spill] sm:$0xff] }
  0xf0   :  { %6838 = vmatprep.subr.bf16.mxu1 %v6837_v6  ;;  %v13687_v6 = vld [vmem:[#allocation50_spill] sm:$0xff] }
  0xf1   :  { %7288 = vmatpush1.bf16.msra.mxu0 %v13680_v12 }
  0xf2   :  { %7290 = vmatprep.subr.bf16.mxu0 %v13681_v5 }
  0xf3   :  { %6840 = vmatpush1.bf16.msra.mxu1 %v6839_v16  ;;  %v13688_v16 = vld [vmem:[#allocation53_spill] sm:$0xff] }
  0xf4   :  { %6842 = vmatprep.subr.bf16.mxu1 %v6841_v38  ;;  %v13689_v38 = vld [vmem:[#allocation56_spill] sm:$0xff] }
  0xf5   :  { %7292 = vmatpush1.bf16.msra.mxu0 %v13682_v35 }
  0xf6   :  { %7294 = vmatprep.subr.bf16.mxu0 %v13683_v57 }
  0xf7   :  { %6844 = vmatpush1.bf16.msra.mxu1 %v6843_v59  ;;  %v13690_v59 = vld [vmem:[#allocation59_spill] sm:$0xff] }
  0xf8   :  { %6846 = vmatprep.subr.bf16.mxu1 %v6845_v0  ;;  %v13691_v0 = vld [vmem:[#allocation62_spill] sm:$0xff] }
  0xf9   :  { %7296 = vmatpush1.bf16.msra.mxu0 %v13684_v19 }
  0xfa   :  { %7298 = vmatprep.subr.bf16.mxu0 %v13685_v27 }
  0xfb   :  { %6848 = vmatpush1.bf16.msra.mxu1 %v6847_v43  ;;  %v13692_v43 = vld [vmem:[#allocation65_spill] sm:$0xff] }
  0xfc   :  { %6850 = vmatprep.subr.bf16.mxu1 %v6849_v52  ;;  %v13693_v52 = vld [vmem:[#allocation68_spill] sm:$0xff] }
  0xfd   :  { %7300 = vmatpush1.bf16.msra.mxu0 %v13686_v3 }
  0xfe   :  { %7302 = vmatprep.subr.bf16.mxu0 %v13687_v6 }
  0xff   :  { %6852 = vmatpush1.bf16.msra.mxu1 %v6851_v22  ;;  %v13702_v22 = vld [vmem:[#allocation3_spill] sm:$0xff] }
 0x100   :  { %6854 = vmatprep.subr.bf16.mxu1 %v6853_v24  ;;  %v13695_v24 = vld [vmem:[#allocation74_spill] sm:$0xff]  ;;  %v13703_v46 = vand.u32 4294901760, %v13702_v22  ;;  %v13715_v22 = vpack.c.bf16 %v9431_v28, %v9422_v33 }
 0x101   :  { %7304 = vmatpush1.bf16.msra.mxu0 %v13688_v16 }
 0x102   :  { %7306 = vmatprep.subr.bf16.mxu0 %v13689_v38 }
 0x103   :  { %6856 = vmatpush1.bf16.msra.mxu1 %v6855_v8  ;;  %v13696_v8 = vld [vmem:[#allocation77_spill] sm:$0xff] }
 0x104   :  { %6858 = vmatprep.subr.bf16.mxu1 %v6857_v50  ;;  %v13697_v50 = vld [vmem:[#allocation80_spill] sm:$0xff] }
 0x105   :  { %7308 = vmatpush1.bf16.msra.mxu0 %v13690_v59 }
 0x106   :  { %7310 = vmatprep.subr.bf16.mxu0 %v13691_v0 }
 0x107   :  { %6860 = vmatpush1.bf16.msra.mxu1 %v6859_v45  ;;  %v13698_v45 = vld [vmem:[#allocation83_spill] sm:$0xff] }
 0x108   :  { %6862 = vmatprep.subr.bf16.mxu1 %v6861_v47  ;;  %v13699_v47 = vld [vmem:[#allocation86_spill] sm:$0xff] }
 0x109   :  { %7312 = vmatpush1.bf16.msra.mxu0 %v13692_v43 }
 0x10a   :  { %7314 = vmatprep.subr.bf16.mxu0 %v13693_v52 }
 0x10b   :  { %6864 = vmatpush1.bf16.msra.mxu1 %v6863_v53  ;;  %v13700_v53 = vld [vmem:[#allocation89_spill] sm:$0xff] }
 0x10c   :  { %6866 = vmatprep.subr.bf16.mxu1 %v6865_v4  ;;  %v13701_v4 = vld [vmem:[#allocation92_spill] sm:$0xff] }
 0x10d   :  { %7316 = vmatpush1.bf16.msra.mxu0 %v13694_v10 }
 0x10e   :  { %7318 = vmatprep.subr.bf16.mxu0 %v13695_v24 }
 0x10f   :  { %6868 = vmatpush1.bf16.msra.mxu1 %v6867_v63  ;;  %v13704_v63 = vld [vmem:[#allocation4_spill] sm:$0xff] }
 0x110   :  { %6870 = vmatprep.subr.bf16.mxu1 %v6869_v20  ;;  %v13705_v20 = vand.u32 4294901760, %v13704_v63 }
 0x111   :  { %7320 = vmatpush1.bf16.msra.mxu0 %v13696_v8 }
 0x112   :  { %7322 = vmatprep.subr.bf16.mxu0 %v13697_v50  ;;  %v7333_v49 = vpack.c.bf16 %v13705_v20, %v13703_v46  ;;  %v13716_v46 = vld [vmem:[#allocation98_spill] sm:$0xff]  ;;  %v13722_v20 = vld [vmem:[#allocation101_spill] sm:$0xff] }
 0x113   :  { %6872 = vmatpush1.bf16.msra.mxu1 %v6871_v36  ;;  %v13707_v36 = vld [vmem:[#allocation5_spill] sm:$0xff] }
 0x114   :  { %6874 = vmatprep.subr.bf16.mxu1 %v6873_v23  ;;  %v13708_v23 = vand.u32 4294901760, %v13707_v36  ;;  %v13723_v36 = vld [vmem:[#allocation191_spill] sm:$0xff] }
 0x115   :  { %7324 = vmatpush1.bf16.msra.mxu0 %v13698_v45  ;;  %v13709_v45 = vld [vmem:[#allocation7_spill] sm:$0xff] }
 0x116   :  { %7326 = vmatprep.subr.bf16.mxu0 %v13699_v47  ;;  %v13710_v41 = vand.u32 4294901760, %v13709_v45  ;;  %v13720_v45 = vld [vmem:[#allocation13_spill] sm:$0xff] }
 0x117   :  { %6876 = vmatpush1.bf16.msra.mxu1 %v6875_v26  ;;  %v13711_v26 = vld [vmem:[#allocation9_spill] sm:$0xff] }
 0x118   :  { %6878 = vmatprep.subr.bf16.mxu1 %v6877_v1  ;;  %v7335_v47 = vpack.c.bf16 %v13710_v41, %v13708_v23  ;;  %v13712_v1 = vand.u32 4294901760, %v13711_v26  ;;  %v13721_v41 = vand.u32 4294901760, %v13720_v45  ;;  %v13726_v23 = vld [vmem:[#allocation16_spill] sm:$0xff] }
 0x119   :  { %7328 = vmatpush1.bf16.msra.mxu0 %v13700_v53  ;;  %v13713_v53 = vld [vmem:[#allocation10_spill] sm:$0xff]  ;;  %v13727_v26 = vand.u32 4294901760, %v13726_v23 }
 0x11a   :  { %7330 = vmatprep.subr.bf16.mxu0 %v13701_v4  ;;  %v13714_v50 = vand.u32 4294901760, %v13713_v53 }
 0x11b   :  { %6880 = vmatpush1.bf16.msra.mxu1 %v6879_v39  ;;  %v13718_v39 = vld [vmem:[#allocation12_spill] sm:$0xff] }
 0x11c   :  { %6882 = vmatprep.subr.bf16.mxu1 %v6881_v40  ;;  %v7337_v4 = vpack.c.bf16 %v13714_v50, %v13712_v1  ;;  %v13717_v40 = vand.u32 4294901760, %v13659_v2  ;;  %v13719_v63 = vand.u32 4294901760, %v13718_v39  ;;  %v13724_v50 = vld [vmem:[#allocation14_spill] sm:$0xff]  ;;  %v13729_v2 = vand.u32 4294901760, %v13671_v54  ;;  %v13741_v54 = vld [vmem:[#allocation23_spill] sm:$0xff] }
 0x11d   :  { %7332 = vmatpush1.bf16.msra.mxu0 %v13706_v61  ;;  %v13725_v53 = vand.u32 4294901760, %v13724_v50  ;;  %v13737_v50 = vld [vmem:[#allocation22_spill] sm:$0xff] }
 0x11e   :  { %7334 = vmatprep.subr.bf16.mxu0 %v7333_v49  ;;  %v7339_v49 = vpack.c.bf16 %v13721_v41, %v13719_v63  ;;  %v13733_v63 = vld [vmem:[#allocation19_spill] sm:$0xff]  ;;  %v13738_v61 = vand.u32 4294901760, %v13737_v50  ;;  %v13750_v50 = vld [vmem:[#allocation112_spill] sm:$0xff] }
 0x11f   :  { %6884 = vmatpush1.bf16.msra.mxu1 %v13715_v22  ;;  %v7341_v1 = vpack.c.bf16 %v13727_v26, %v13725_v53  ;;  %v13728_v22 = vld [vmem:[#allocation99_spill] sm:$0xff]  ;;  %v13734_v45 = vand.u32 4294901760, %v13733_v63  ;;  %v13739_v53 = vld [vmem:[#allocation106_spill] sm:$0xff]  ;;  %v13740_v26 = vld [vmem:[#allocation108_spill] sm:$0xff] }
 0x120   :  { %6886 = vmatprep.subr.bf16.mxu1 %v13716_v46  ;;  %2405 = vmatmul.mubr.f32.vlgmr.msra.gmra.mrb[0].mxu0 %v13717_v40  ;;  %v13731_v40 = vld [vmem:[#allocation18_spill] sm:$0xff] }
 0x121   :  { %7336 = vmatpush1.bf16.msra.mxu0 %v7335_v47  ;;  %2668 = vmatprep.mubr.f32.mxu0 %v13722_v20  ;;  %v13730_v47 = vld [vmem:[#allocation105_spill] sm:$0xff]  ;;  %v13732_v39 = vand.u32 4294901760, %v13731_v40  ;;  %v13745_v40 = vld [vmem:[#allocation27_spill] sm:$0xff] }
 0x122   :  { %980 = vmatmul.mubr.f32.vlgmr.msra.gmra.mrb[0].mxu1 %v13723_v36  ;;  %7338 = vmatprep.subr.bf16.mxu0 %v7337_v4  ;;  %v13735_v4 = vld [vmem:[#allocation20_spill] sm:$0xff]  ;;  %v13746_v63 = vand.u32 4294901760, %v13745_v40 }
 0x123   :  { %6888 = vmatpush1.bf16.msra.mxu1 %v13728_v22  ;;  %1117 = vmatprep.mubr.f32.mxu1 %v13729_v2  ;;  %v7343_v41 = vpack.c.bf16 %v13734_v45, %v13732_v39  ;;  %v13736_v46 = vand.u32 4294901760, %v13735_v4  ;;  %v13742_v2 = vand.u32 4294901760, %v13741_v54  ;;  %v13747_v39 = vld [vmem:[#allocation28_spill] sm:$0xff]  ;;  %v13749_v4 = vld [vmem:[#allocation109_spill] sm:$0xff] }
 0x124   :  { %6890 = vmatprep.subr.bf16.mxu1 %v13730_v47  ;;  %v13743_v47 = vld [vmem:[#allocation25_spill] sm:$0xff]  ;;  %v13759_v40 = vld [vmem:[#allocation116_spill] sm:$0xff] }
 0x125   :  { %7340 = vmatpush1.bf16.msra.mxu0 %v7339_v49  ;;  %v7345_v23 = vpack.c.bf16 %v13738_v61, %v13736_v46  ;;  %v13744_v49 = vand.u32 4294901760, %v13743_v47  ;;  %v13751_v61 = vld [vmem:[#allocation30_spill] sm:$0xff]  ;;  %v13755_v54 = vld [vmem:[#allocation33_spill] sm:$0xff] }
 0x126   :  { %7342 = vmatprep.subr.bf16.mxu0 %v7341_v1  ;;  %v13748_v1 = vand.u32 4294901760, %v13747_v39  ;;  %v13752_v46 = vand.u32 4294901760, %v13751_v61  ;;  %v13756_v47 = vand.u32 4294901760, %v13755_v54  ;;  %v13760_v39 = vld [vmem:[#allocation118_spill] sm:$0xff]  ;;  %v13765_v61 = vld [vmem:[#allocation39_spill] sm:$0xff]  ;;  %v13769_v54 = vld [vmem:[#allocation121_spill] sm:$0xff] }
 0x127   :  { %6892 = vmatpush1.bf16.msra.mxu1 %v13739_v53  ;;  %v7347_v22 = vpack.c.bf16 %v13744_v49, %v13742_v2  ;;  %v13757_v2 = vld [vmem:[#allocation34_spill] sm:$0xff] }
 0x128   :  { %6894 = vmatprep.subr.bf16.mxu1 %v13740_v26  ;;  %v7349_v45 = vpack.c.bf16 %v13748_v1, %v13746_v63  ;;  %v13753_v26 = vld [vmem:[#allocation31_spill] sm:$0xff]  ;;  %v13761_v63 = vld [vmem:[#allocation36_spill] sm:$0xff] }
 0x129   :  { %7344 = vmatpush1.bf16.msra.mxu0 %v7343_v41  ;;  %v13754_v41 = vand.u32 4294901760, %v13753_v26  ;;  %v13762_v1 = vand.u32 4294901760, %v13761_v63  ;;  %v13766_v26 = vand.u32 4294901760, %v13765_v61  ;;  %v13775_v63 = vld [vmem:[#allocation45_spill] sm:$0xff]  ;;  %v13779_v61 = vld [vmem:[#allocation128_spill] sm:$0xff] }
 0x12a   :  { %7346 = vmatprep.subr.bf16.mxu0 %v7345_v23  ;;  %v13758_v23 = vand.u32 4294901760, %v13757_v2  ;;  %v13770_v2 = vld [vmem:[#allocation124_spill] sm:$0xff] }
 0x12b   :  { %6896 = vmatpush1.bf16.msra.mxu1 %v13749_v4  ;;  %v7351_v53 = vpack.c.bf16 %v13754_v41, %v13752_v46  ;;  %v13767_v46 = vld [vmem:[#allocation40_spill] sm:$0xff] }
 0x12c   :  { %6898 = vmatprep.subr.bf16.mxu1 %v13750_v50  ;;  %v7353_v49 = vpack.c.bf16 %v13758_v23, %v13756_v47  ;;  %v13763_v50 = vld [vmem:[#allocation37_spill] sm:$0xff]  ;;  %v13771_v47 = vld [vmem:[#allocation42_spill] sm:$0xff] }
 0x12d   :  { %7348 = vmatpush1.bf16.msra.mxu0 %v7347_v22  ;;  %v13764_v22 = vand.u32 4294901760, %v13763_v50  ;;  %v13772_v23 = vand.u32 4294901760, %v13771_v47  ;;  %v13776_v50 = vand.u32 4294901760, %v13775_v63  ;;  %v13785_v47 = vld [vmem:[#allocation51_spill] sm:$0xff]  ;;  %v13789_v63 = vld [vmem:[#allocation133_spill] sm:$0xff] }
 0x12e   :  { %7350 = vmatprep.subr.bf16.mxu0 %v7349_v45  ;;  %v13768_v45 = vand.u32 4294901760, %v13767_v46  ;;  %v13780_v46 = vld [vmem:[#allocation130_spill] sm:$0xff] }
 0x12f   :  { %6900 = vmatpush1.bf16.msra.mxu1 %v13759_v40  ;;  %v7355_v4 = vpack.c.bf16 %v13764_v22, %v13762_v1  ;;  %v13777_v1 = vld [vmem:[#allocation46_spill] sm:$0xff] }
 0x130   :  { %6902 = vmatprep.subr.bf16.mxu1 %v13760_v39  ;;  %v7357_v41 = vpack.c.bf16 %v13768_v45, %v13766_v26  ;;  %v13773_v39 = vld [vmem:[#allocation43_spill] sm:$0xff]  ;;  %v13781_v26 = vld [vmem:[#allocation48_spill] sm:$0xff] }
 0x131   :  { %7352 = vmatpush1.bf16.msra.mxu0 %v7351_v53  ;;  %v13774_v53 = vand.u32 4294901760, %v13773_v39  ;;  %v13782_v45 = vand.u32 4294901760, %v13781_v26  ;;  %v13786_v39 = vand.u32 4294901760, %v13785_v47  ;;  %v13795_v26 = vld [vmem:[#allocation57_spill] sm:$0xff]  ;;  %v13799_v47 = vld [vmem:[#allocation140_spill] sm:$0xff] }
 0x132   :  { %7354 = vmatprep.subr.bf16.mxu0 %v7353_v49  ;;  %v13778_v49 = vand.u32 4294901760, %v13777_v1  ;;  %v13790_v1 = vld [vmem:[#allocation136_spill] sm:$0xff] }
 0x133   :  { %6904 = vmatpush1.bf16.msra.mxu1 %v13769_v54  ;;  %v7359_v40 = vpack.c.bf16 %v13774_v53, %v13772_v23  ;;  %v13787_v23 = vld [vmem:[#allocation52_spill] sm:$0xff] }
 0x134   :  { %6906 = vmatprep.subr.bf16.mxu1 %v13770_v2  ;;  %v7361_v22 = vpack.c.bf16 %v13778_v49, %v13776_v50  ;;  %v13783_v2 = vld [vmem:[#allocation49_spill] sm:$0xff]  ;;  %v13791_v50 = vld [vmem:[#allocation54_spill] sm:$0xff] }
 0x135   :  { %7356 = vmatpush1.bf16.msra.mxu0 %v7355_v4  ;;  %v13784_v4 = vand.u32 4294901760, %v13783_v2  ;;  %v13792_v49 = vand.u32 4294901760, %v13791_v50  ;;  %v13796_v2 = vand.u32 4294901760, %v13795_v26  ;;  %v13805_v50 = vld [vmem:[#allocation63_spill] sm:$0xff]  ;;  %v13809_v26 = vld [vmem:[#allocation145_spill] sm:$0xff] }
 0x136   :  { %7358 = vmatprep.subr.bf16.mxu0 %v7357_v41  ;;  %v13788_v41 = vand.u32 4294901760, %v13787_v23  ;;  %v13800_v23 = vld [vmem:[#allocation142_spill] sm:$0xff] }
 0x137   :  { %6908 = vmatpush1.bf16.msra.mxu1 %v13779_v61  ;;  %v7363_v54 = vpack.c.bf16 %v13784_v4, %v13782_v45  ;;  %v13797_v45 = vld [vmem:[#allocation58_spill] sm:$0xff] }
 0x138   :  { %6910 = vmatprep.subr.bf16.mxu1 %v13780_v46  ;;  %v7365_v53 = vpack.c.bf16 %v13788_v41, %v13786_v39  ;;  %v13793_v46 = vld [vmem:[#allocation55_spill] sm:$0xff]  ;;  %v13801_v39 = vld [vmem:[#allocation60_spill] sm:$0xff] }
 0x139   :  { %7360 = vmatpush1.bf16.msra.mxu0 %v7359_v40  ;;  %v13794_v40 = vand.u32 4294901760, %v13793_v46  ;;  %v13802_v41 = vand.u32 4294901760, %v13801_v39  ;;  %v13806_v46 = vand.u32 4294901760, %v13805_v50  ;;  %v13815_v39 = vld [vmem:[#allocation69_spill] sm:$0xff]  ;;  %v13819_v50 = vld [vmem:[#allocation152_spill] sm:$0xff] }
 0x13a   :  { %7362 = vmatprep.subr.bf16.mxu0 %v7361_v22  ;;  %v13798_v22 = vand.u32 4294901760, %v13797_v45  ;;  %v13810_v45 = vld [vmem:[#allocation148_spill] sm:$0xff] }
 0x13b   :  { %6912 = vmatpush1.bf16.msra.mxu1 %v13789_v63  ;;  %v7367_v61 = vpack.c.bf16 %v13794_v40, %v13792_v49  ;;  %v13807_v49 = vld [vmem:[#allocation64_spill] sm:$0xff] }
 0x13c   :  { %6914 = vmatprep.subr.bf16.mxu1 %v13790_v1  ;;  %v7369_v4 = vpack.c.bf16 %v13798_v22, %v13796_v2  ;;  %v13803_v1 = vld [vmem:[#allocation61_spill] sm:$0xff]  ;;  %v13811_v2 = vld [vmem:[#allocation66_spill] sm:$0xff] }
 0x13d   :  { %7364 = vmatpush1.bf16.msra.mxu0 %v7363_v54  ;;  %v13804_v54 = vand.u32 4294901760, %v13803_v1  ;;  %v13812_v22 = vand.u32 4294901760, %v13811_v2  ;;  %v13816_v1 = vand.u32 4294901760, %v13815_v39  ;;  %v13825_v2 = vld [vmem:[#allocation75_spill] sm:$0xff]  ;;  %v13829_v39 = vld [vmem:[#allocation157_spill] sm:$0xff] }
 0x13e   :  { %7366 = vmatprep.subr.bf16.mxu0 %v7365_v53  ;;  %v13808_v53 = vand.u32 4294901760, %v13807_v49  ;;  %v13820_v49 = vld [vmem:[#allocation154_spill] sm:$0xff] }
 0x13f   :  { %6916 = vmatpush1.bf16.msra.mxu1 %v13799_v47  ;;  %v7371_v63 = vpack.c.bf16 %v13804_v54, %v13802_v41  ;;  %v13817_v41 = vld [vmem:[#allocation70_spill] sm:$0xff] }
 0x140   :  { %6918 = vmatprep.subr.bf16.mxu1 %v13800_v23  ;;  %v7373_v40 = vpack.c.bf16 %v13808_v53, %v13806_v46  ;;  %v13813_v23 = vld [vmem:[#allocation67_spill] sm:$0xff]  ;;  %v13821_v46 = vld [vmem:[#allocation72_spill] sm:$0xff] }
 0x141   :  { %7368 = vmatpush1.bf16.msra.mxu0 %v7367_v61  ;;  %v13814_v61 = vand.u32 4294901760, %v13813_v23  ;;  %v13822_v53 = vand.u32 4294901760, %v13821_v46  ;;  %v13826_v23 = vand.u32 4294901760, %v13825_v2  ;;  %v13835_v46 = vld [vmem:[#allocation81_spill] sm:$0xff]  ;;  %v13839_v2 = vld [vmem:[#allocation164_spill] sm:$0xff] }
 0x142   :  { %7370 = vmatprep.subr.bf16.mxu0 %v7369_v4  ;;  %v13818_v4 = vand.u32 4294901760, %v13817_v41  ;;  %v13830_v41 = vld [vmem:[#allocation160_spill] sm:$0xff] }
 0x143   :  { %6920 = vmatpush1.bf16.msra.mxu1 %v13809_v26  ;;  %v7375_v47 = vpack.c.bf16 %v13814_v61, %v13812_v22  ;;  %v13827_v22 = vld [vmem:[#allocation76_spill] sm:$0xff] }
 0x144   :  { %6922 = vmatprep.subr.bf16.mxu1 %v13810_v45  ;;  %v7377_v54 = vpack.c.bf16 %v13818_v4, %v13816_v1  ;;  %v13823_v45 = vld [vmem:[#allocation73_spill] sm:$0xff]  ;;  %v13831_v1 = vld [vmem:[#allocation78_spill] sm:$0xff] }
 0x145   :  { %7372 = vmatpush1.bf16.msra.mxu0 %v7371_v63  ;;  %v13824_v63 = vand.u32 4294901760, %v13823_v45  ;;  %v13832_v4 = vand.u32 4294901760, %v13831_v1  ;;  %v13836_v45 = vand.u32 4294901760, %v13835_v46  ;;  %v13849_v46 = vld [vmem:[#allocation90_spill] sm:$0xff] }
 0x146   :  { %7374 = vmatprep.subr.bf16.mxu0 %v7373_v40  ;;  %v13828_v40 = vand.u32 4294901760, %v13827_v22  ;;  %v13840_v22 = vld [vmem:[#allocation166_spill] sm:$0xff] }
 0x147   :  { %6924 = vmatpush1.bf16.msra.mxu1 %v13819_v50  ;;  %v7379_v26 = vpack.c.bf16 %v13824_v63, %v13822_v53  ;;  %v13837_v53 = vld [vmem:[#allocation82_spill] sm:$0xff] }
 0x148   :  { %6926 = vmatprep.subr.bf16.mxu1 %v13820_v49  ;;  %v7381_v61 = vpack.c.bf16 %v13828_v40, %v13826_v23  ;;  %v13833_v49 = vld [vmem:[#allocation79_spill] sm:$0xff]  ;;  %v13841_v23 = vld [vmem:[#allocation84_spill] sm:$0xff] }
 0x149   :  { %7376 = vmatpush1.bf16.msra.mxu0 %v7375_v47  ;;  %v13834_v47 = vand.u32 4294901760, %v13833_v49  ;;  %v13842_v40 = vand.u32 4294901760, %v13841_v23  ;;  %v13845_v49 = vand.u32 4294901760, %v13638_v21  ;;  %v13853_v23 = vld [vmem:[#allocation93_spill] sm:$0xff]  ;;  %v13857_v21 = vld [vmem:[#allocation176_spill] sm:$0xff] }
 0x14a   :  { %7378 = vmatprep.subr.bf16.mxu0 %v7377_v54  ;;  %v13838_v54 = vand.u32 4294901760, %v13837_v53  ;;  %v13851_v53 = vld [vmem:[#allocation91_spill] sm:$0xff] }
 0x14b   :  { %6928 = vmatpush1.bf16.msra.mxu1 %v13829_v39  ;;  %v7383_v50 = vpack.c.bf16 %v13834_v47, %v13832_v4  ;;  %v13847_v4 = vld [vmem:[#allocation169_spill] sm:$0xff]  ;;  %v13848_v47 = vld [vmem:[#allocation172_spill] sm:$0xff] }
 0x14c   :  { %6930 = vmatprep.subr.bf16.mxu1 %v13830_v41  ;;  %v7385_v63 = vpack.c.bf16 %v13838_v54, %v13836_v45  ;;  %v13843_v41 = vld [vmem:[#allocation85_spill] sm:$0xff]  ;;  %v13850_v45 = vand.u32 4294901760, %v13849_v46 }
 0x14d   :  { %7380 = vmatpush1.bf16.msra.mxu0 %v7379_v26  ;;  %v13844_v26 = vand.u32 4294901760, %v13843_v41  ;;  %v13854_v41 = vand.u32 4294901760, %v13853_v23  ;;  %v13863_v46 = vld [vmem:[#allocation181_spill] sm:$0xff]  ;;  %v13867_v23 = vld [vmem:[#allocation187_spill] sm:$0xff] }
 0x14e   :  { %7382 = vmatprep.subr.bf16.mxu0 %v7381_v61  ;;  %v13846_v61 = vand.u32 4294901760, %v13639_v17  ;;  %v13858_v17 = vld [vmem:[#allocation178_spill] sm:$0xff] }
 0x14f   :  { %6932 = vmatpush1.bf16.msra.mxu1 %v13839_v2  ;;  %v7387_v39 = vpack.c.bf16 %v13844_v26, %v13842_v40  ;;  %v13855_v40 = vld [vmem:[#allocation94_spill] sm:$0xff] }
 0x150   :  { %6934 = vmatprep.subr.bf16.mxu1 %v13840_v22  ;;  %v7389_v1 = vpack.c.bf16 %v13846_v61, %v13845_v49  ;;  %v13859_v49 = vld [vmem:[#allocation96_spill] sm:$0xff] }
 0x151   :  { %7384 = vmatpush1.bf16.msra.mxu0 %v7383_v50  ;;  %v13852_v50 = vand.u32 4294901760, %v13851_v53  ;;  %v13860_v61 = vand.u32 4294901760, %v13859_v49  ;;  %v13866_v53 = vand.u32 4294901760, %v8745_v42  ;;  %v13873_v42 = vand.u32 4294901760, %v13723_v36  ;;  %v13881_v36 = vld [vmem:[#allocation111_spill] sm:$0xff] }
 0x152   :  { %7386 = vmatprep.subr.bf16.mxu0 %v7385_v63  ;;  %v13856_v63 = vand.u32 4294901760, %v13855_v40  ;;  %v13870_v40 = vld [vmem:[#allocation102_spill] sm:$0xff] }
 0x153   :  { %6936 = vmatpush1.bf16.msra.mxu1 %v13847_v4  ;;  %v7391_v54 = vpack.c.bf16 %v13852_v50, %v13850_v45  ;;  %v13864_v45 = vld [vmem:[#allocation184_spill] sm:$0xff] }
 0x154   :  { %6938 = vmatprep.subr.bf16.mxu1 %v13848_v47  ;;  %v7393_v26 = vpack.c.bf16 %v13856_v63, %v13854_v41  ;;  %v13861_v47 = vld [vmem:[#allocation97_spill] sm:$0xff]  ;;  %v13871_v63 = vand.u32 4294901760, %v8788_v7 }
 0x155   :  { %7388 = vmatpush1.bf16.msra.mxu0 %v7387_v39  ;;  %v13862_v39 = vand.u32 4294901760, %v13861_v47  ;;  %v13869_v47 = vand.u32 4294901760, %v13556_v55  ;;  %v13874_v55 = vand.u32 4294901760, %v8815_v56  ;;  %v13882_v56 = vand.u32 4294901760, %v13881_v36 }
 0x156   :  { %7390 = vmatprep.subr.bf16.mxu0 %v7389_v1  ;;  %v13865_v1 = vand.u32 4294901760, %v8736_v51  ;;  %v13872_v51 = vand.u32 4294901760, %v8796_v18  ;;  %v13877_v18 = vand.u32 4294901760, %v8852_v15 }
 0x157   :  { %6940 = vmatpush1.bf16.msra.mxu1 %v13857_v21  ;;  %v7395_v4 = vpack.c.bf16 %v13862_v39, %v13860_v61  ;;  %v13885_v39 = vld [vmem:[#allocation114_spill] sm:$0xff] }
 0x158   :  { %6942 = vmatprep.subr.bf16.mxu1 %v13858_v17  ;;  %v6949_v50 = vpack.c.bf16 %v13866_v53, %v13865_v1  ;;  %v13886_v1 = vand.u32 4294901760, %v13885_v39 }
 0x159   :  { %7392 = vmatpush1.bf16.msra.mxu0 %v7391_v54  ;;  %v13868_v54 = vand.u32 4294901760, %v8749_v30  ;;  %v13875_v30 = vand.u32 4294901760, %v13560_v32  ;;  %v13883_v32 = vld [vmem:[#allocation113_spill] sm:$0xff] }
 0x15a   :  { %7394 = vmatprep.subr.bf16.mxu0 %v7393_v26  ;;  %v6953_v26 = vpack.c.bf16 %v13872_v51, %v13871_v63  ;;  %v13884_v61 = vand.u32 4294901760, %v13883_v32  ;;  %v13909_v32 = vld [vmem:[#allocation132_spill] sm:$0xff] }
 0x15b   :  { %6944 = vmatpush1.bf16.msra.mxu1 %v13863_v46  ;;  %v6951_v41 = vpack.c.bf16 %v13869_v47, %v13868_v54  ;;  %v13891_v54 = vld [vmem:[#allocation119_spill] sm:$0xff] }
 0x15c   :  { %6946 = vmatprep.subr.bf16.mxu1 %v13864_v45  ;;  %v6961_v53 = vpack.c.bf16 %v13886_v1, %v13884_v61  ;;  %v13892_v47 = vand.u32 4294901760, %v13891_v54  ;;  %v13910_v61 = vand.u32 4294901760, %v13909_v32 }
 0x15d   :  { %7396 = vmatpush1.bf16.msra.mxu0 %v7395_v4  ;;  %v13876_v4 = vld [vmem:[#allocation188_spill] sm:$0xff] }
 0x15e   :  { %7398 = vmatprep.subr.bf16.mxu0 %v13644_v37  ;;  %v6955_v37 = vpack.c.bf16 %v13875_v30, %v13874_v55  ;;  %v13899_v30 = vld [vmem:[#allocation125_spill] sm:$0xff] }
 0x15f   :  { %6948 = vmatpush1.bf16.msra.mxu1 %v13867_v23 }
 0x160   :  { %6950 = vmatprep.subr.bf16.mxu1 %v6949_v50  ;;  %2670 = vmatmul.mubr.f32.vlgmr.msra.gmra.mrb[0].mxu0 %v13870_v40 }
 0x161   :  { %7400 = vmatpush1.bf16.msra.mxu0 %v13665_v31  ;;  %2805 = vmatprep.mubr.f32.mxu0 %v13722_v20  ;;  %v13878_v31 = vand.u32 4294901760, %v8854_v25  ;;  %v13887_v25 = vld [vmem:[#allocation115_spill] sm:$0xff] }
 0x162   :  { %1121 = vmatmul.mubr.f32.vlgmr.msra.gmra.mrb[0].mxu1 %v13873_v42  ;;  %7402 = vmatprep.subr.bf16.mxu0 %v13670_v13  ;;  %v13879_v13 = vld [vmem:[#allocation110_spill] sm:$0xff]  ;;  %v13888_v15 = vand.u32 4294901760, %v13887_v25 }
 0x163   :  { %6952 = vmatpush1.bf16.msra.mxu1 %v6951_v41  ;;  %1384 = vmatprep.mubr.f32.mxu1 %v13876_v4  ;;  %v6957_v7 = vpack.c.bf16 %v13878_v31, %v13877_v18  ;;  %v13880_v20 = vand.u32 4294901760, %v13879_v13  ;;  %v13893_v41 = vld [vmem:[#allocation120_spill] sm:$0xff]  ;;  %v13901_v18 = vld [vmem:[#allocation126_spill] sm:$0xff] }
 0x164   :  { %6954 = vmatprep.subr.bf16.mxu1 %v6953_v26  ;;  %v13894_v63 = vand.u32 4294901760, %v13893_v41  ;;  %v13902_v31 = vand.u32 4294901760, %v13901_v18  ;;  %v13931_v18 = vand.u32 4294901760, %v13653_v60  ;;  %v13942_v60 = vld [vmem:[#allocation158_spill] sm:$0xff] }
 0x165   :  { %7404 = vmatpush1.bf16.msra.mxu0 %v13674_v34  ;;  %v6959_v49 = vpack.c.bf16 %v13882_v56, %v13880_v20  ;;  %v13907_v56 = vld [vmem:[#allocation131_spill] sm:$0xff] }
 0x166   :  { %7406 = vmatprep.subr.bf16.mxu0 %v13675_v58  ;;  %v13889_v58 = vld [vmem:[#allocation117_spill] sm:$0xff]  ;;  %v6965_v51 = vpack.c.bf16 %v13894_v63, %v13892_v47 }
 0x167   :  { %6956 = vmatpush1.bf16.msra.mxu1 %v6955_v37  ;;  %v13890_v34 = vand.u32 4294901760, %v13889_v58  ;;  %v13900_v37 = vand.u32 4294901760, %v13899_v30 }
 0x168   :  { %6958 = vmatprep.subr.bf16.mxu1 %v6957_v7 }
 0x169   :  { %7408 = vmatpush1.bf16.msra.mxu0 %v13676_v14  ;;  %v6963_v50 = vpack.c.bf16 %v13890_v34, %v13888_v15  ;;  %v13895_v14 = vld [vmem:[#allocation122_spill] sm:$0xff]  ;;  %v6969_v7 = vpack.c.bf16 %v13902_v31, %v13900_v37  ;;  %v13915_v15 = vld [vmem:[#allocation137_spill] sm:$0xff] }
 0x16a   :  { %7410 = vmatprep.subr.bf16.mxu0 %v13677_v9  ;;  %v13896_v26 = vand.u32 4294901760, %v13895_v14  ;;  %v13897_v9 = vld [vmem:[#allocation123_spill] sm:$0xff]  ;;  %v13916_v58 = vand.u32 4294901760, %v13915_v15  ;;  %v13917_v34 = vld [vmem:[#allocation138_spill] sm:$0xff] }
 0x16b   :  { %6960 = vmatpush1.bf16.msra.mxu1 %v6959_v49  ;;  %v13898_v42 = vand.u32 4294901760, %v13897_v9  ;;  %v13908_v49 = vand.u32 4294901760, %v13907_v56  ;;  %v13932_v31 = vld [vmem:[#allocation150_spill] sm:$0xff] }
 0x16c   :  { %6962 = vmatprep.subr.bf16.mxu1 %v6961_v53 }
 0x16d   :  { %7412 = vmatpush1.bf16.msra.mxu0 %v13678_v44  ;;  %v6967_v55 = vpack.c.bf16 %v13898_v42, %v13896_v26  ;;  %v13903_v44 = vld [vmem:[#allocation127_spill] sm:$0xff]  ;;  %v6973_v39 = vpack.c.bf16 %v13910_v61, %v13908_v49  ;;  %v13925_v26 = vld [vmem:[#allocation144_spill] sm:$0xff] }
 0x16e   :  { %7414 = vmatprep.subr.bf16.mxu0 %v13679_v29  ;;  %v13904_v13 = vand.u32 4294901760, %v13903_v44  ;;  %v13905_v29 = vld [vmem:[#allocation129_spill] sm:$0xff]  ;;  %v13926_v9 = vand.u32 4294901760, %v13925_v26  ;;  %v13940_v49 = vld [vmem:[#allocation156_spill] sm:$0xff]  ;;  %v13962_v26 = vld [vmem:[#allocation174_spill] sm:$0xff] }
 0x16f   :  { %6964 = vmatpush1.bf16.msra.mxu1 %v6963_v50  ;;  %v13906_v20 = vand.u32 4294901760, %v13905_v29  ;;  %v13918_v50 = vand.u32 4294901760, %v13917_v34  ;;  %v13941_v32 = vand.u32 4294901760, %v13940_v49  ;;  %v13976_v49 = vld [vmem:[#allocation182_spill] sm:$0xff] }
 0x170   :  { %6966 = vmatprep.subr.bf16.mxu1 %v6965_v51  ;;  %v13923_v51 = vld [vmem:[#allocation143_spill] sm:$0xff] }
 0x171   :  { %7416 = vmatpush1.bf16.msra.mxu0 %v13680_v12  ;;  %v6971_v36 = vpack.c.bf16 %v13906_v20, %v13904_v13  ;;  %v13911_v12 = vld [vmem:[#allocation134_spill] sm:$0xff]  ;;  %v6977_v54 = vpack.c.bf16 %v13918_v50, %v13916_v58  ;;  %v13924_v14 = vand.u32 4294901760, %v13923_v51  ;;  %v13951_v58 = vld [vmem:[#allocation165_spill] sm:$0xff] }
 0x172   :  { %7418 = vmatprep.subr.bf16.mxu0 %v13681_v5  ;;  %v13912_v1 = vand.u32 4294901760, %v13911_v12  ;;  %v13913_v5 = vld [vmem:[#allocation135_spill] sm:$0xff]  ;;  %v13952_v34 = vand.u32 4294901760, %v13951_v58  ;;  %v13960_v51 = vld [vmem:[#allocation173_spill] sm:$0xff] }
 0x173   :  { %6968 = vmatpush1.bf16.msra.mxu1 %v6967_v55  ;;  %v13914_v53 = vand.u32 4294901760, %v13913_v5  ;;  %v6981_v42 = vpack.c.bf16 %v13926_v9, %v13924_v14  ;;  %v13947_v5 = vld [vmem:[#allocation162_spill] sm:$0xff]  ;;  %v13961_v14 = vand.u32 4294901760, %v13960_v51 }
 0x174   :  { %6970 = vmatprep.subr.bf16.mxu1 %v6969_v7  ;;  %v13933_v7 = vand.u32 4294901760, %v13932_v31  ;;  %v13972_v31 = vld [vmem:[#allocation180_spill] sm:$0xff] }
 0x175   :  { %7420 = vmatpush1.bf16.msra.mxu0 %v13682_v35  ;;  %v6975_v25 = vpack.c.bf16 %v13914_v53, %v13912_v1  ;;  %v13919_v35 = vld [vmem:[#allocation139_spill] sm:$0xff]  ;;  %v13946_v1 = vand.u32 4294901760, %v13662_v11  ;;  %v13948_v53 = vand.u32 4294901760, %v13947_v5  ;;  %v13953_v11 = vand.u32 4294901760, %v13623_v62  ;;  %v13982_v5 = vld [vmem:[#allocation186_spill] sm:$0xff] }
 0x176   :  { %7422 = vmatprep.subr.bf16.mxu0 %v13683_v57  ;;  %v13920_v47 = vand.u32 4294901760, %v13919_v35  ;;  %v13921_v57 = vld [vmem:[#allocation141_spill] sm:$0xff]  ;;  %v6985_v44 = vpack.c.bf16 %v13933_v7, %v13931_v18  ;;  %v13963_v62 = vand.u32 4294901760, %v13962_v26  ;;  %v13973_v7 = vand.u32 4294901760, %v13972_v31 }
 0x177   :  { %6972 = vmatpush1.bf16.msra.mxu1 %v6971_v36  ;;  %v13922_v41 = vand.u32 4294901760, %v13921_v57  ;;  %v13938_v36 = vld [vmem:[#allocation155_spill] sm:$0xff]  ;;  %v172_v26 = vld [vmem:[%s12542_s1 + $0x458] sm:$0xff] }
 0x178   :  { %6974 = vmatprep.subr.bf16.mxu1 %v6973_v39  ;;  %v13939_v56 = vand.u32 4294901760, %v13938_v36  ;;  %v13958_v57 = vld [vmem:[#allocation171_spill] sm:$0xff]  ;;  %v7001_v9 = vpack.c.bf16 %v13963_v62, %v13961_v14  ;;  %v176_v31 = vld [vmem:[%s12542_s1 + $0x478] sm:$0xff] }
 0x179   :  { %7424 = vmatpush1.bf16.msra.mxu0 %v13684_v19  ;;  %v6979_v63 = vpack.c.bf16 %v13922_v41, %v13920_v47  ;;  %v13927_v19 = vld [vmem:[#allocation146_spill] sm:$0xff]  ;;  %v13959_v41 = vand.u32 4294901760, %v13958_v57  ;;  %v13988_v57 = vand.u32 4294901760, %v9431_v28  ;;  %v170_v14 = vld [vmem:[%s12542_s1 + $0x448] sm:$0xff] }
 0x17a   :  { %7426 = vmatprep.subr.bf16.mxu0 %v13685_v27  ;;  %v13928_v55 = vand.u32 4294901760, %v13927_v19  ;;  %v13929_v27 = vld [vmem:[#allocation147_spill] sm:$0xff]  ;;  %v6989_v61 = vpack.c.bf16 %v13941_v32, %v13939_v56  ;;  %v13977_v32 = vand.u32 4294901760, %v13976_v49  ;;  %v10455_v49 = vld [vmem:[%s12542_s1 + $0x4f8] sm:$0xff] }
 0x17b   :  { %6976 = vmatpush1.bf16.msra.mxu1 %v6975_v25  ;;  %v13930_v30 = vand.u32 4294901760, %v13929_v27  ;;  %v6993_v25 = vpack.c.bf16 %v13948_v53, %v13946_v1  ;;  %v13983_v53 = vand.u32 4294901760, %v13982_v5  ;;  %v13991_v28 = vld [vmem:[#allocation95_spill] sm:$0xff] }
 0x17c   :  { %6978 = vmatprep.subr.bf16.mxu1 %v6977_v54  ;;  %v13954_v54 = vld [vmem:[#allocation168_spill] sm:$0xff] }
 0x17d   :  { %7428 = vmatpush1.bf16.msra.mxu0 %v13686_v3  ;;  %v6983_v37 = vpack.c.bf16 %v13930_v30, %v13928_v55  ;;  %v13934_v3 = vld [vmem:[#allocation151_spill] sm:$0xff]  ;;  %v13955_v35 = vand.u32 4294901760, %v13954_v54 }
 0x17e   :  { %7430 = vmatprep.subr.bf16.mxu0 %v13687_v6  ;;  %v13935_v13 = vand.u32 4294901760, %v13934_v3  ;;  %v13936_v6 = vld [vmem:[#allocation153_spill] sm:$0xff]  ;;  %v162_v30 = vld [vmem:[%s12542_s1 + $0x408] sm:$0xff] }
 0x17f   :  { %6980 = vmatpush1.bf16.msra.mxu1 %v6979_v63  ;;  %v13937_v29 = vand.u32 4294901760, %v13936_v6  ;;  %v6997_v47 = vpack.c.bf16 %v13955_v35, %v13953_v11  ;;  %v13974_v3 = vld [vmem:[#allocation83_spill] sm:$0xff]  ;;  %v10233_v6 = vld [vmem:[%s12542_s1 + $0x410] sm:$0xff]  ;;  %v2813_v36 = vand.u32 4294901760, %v162_v30  ;;  %v165_v35 = vld [vmem:[%s12542_s1 + $0x420] sm:$0xff] }
 0x180   :  { %6982 = vmatprep.subr.bf16.mxu1 %v6981_v42  ;;  %v13965_v42 = vld [vmem:[#allocation80_spill] sm:$0xff]  ;;  %v2823_v62 = vand.u32 4294901760, %v165_v35 }
 0x181   :  { %7432 = vmatpush1.bf16.msra.mxu0 %v13688_v16  ;;  %v6987_v20 = vpack.c.bf16 %v13937_v29, %v13935_v13  ;;  %v13943_v16 = vand.u32 4294901760, %v13942_v60  ;;  %v10228_v13 = vld [vmem:[%s12542_s1 + $0x400] sm:$0xff] }
 0x182   :  { %7434 = vmatprep.subr.bf16.mxu0 %v13689_v38  ;;  %v13944_v38 = vld [vmem:[#allocation159_spill] sm:$0xff] }
 0x183   :  { %6984 = vmatpush1.bf16.msra.mxu1 %v6983_v37  ;;  %v13945_v39 = vand.u32 4294901760, %v13944_v38  ;;  %v164_v37 = vld [vmem:[%s12542_s1 + $0x418] sm:$0xff]  ;;  %v166_v38 = vld [vmem:[%s12542_s1 + $0x428] sm:$0xff] }
 0x184   :  { %6986 = vmatprep.subr.bf16.mxu1 %v6985_v44  ;;  %v2817_v56 = vand.u32 4294901760, %v164_v37  ;;  %v2821_v11 = vand.u32 4294901760, %v166_v38 }
 0x185   :  { %7436 = vmatpush1.bf16.msra.mxu0 %v13690_v59  ;;  %v6991_v12 = vpack.c.bf16 %v13945_v39, %v13943_v16  ;;  %v31_v59 = vld [vmem:[%s12543_s0 + $0x28] sm:$0xff]  ;;  %v168_v39 = vld [vmem:[%s12542_s1 + $0x438] sm:$0xff] }
 0x186   :  { %7438 = vmatprep.subr.bf16.mxu0 %v13691_v0  ;;  %v13949_v0 = vld [vmem:[#allocation163_spill] sm:$0xff]  ;;  %v2825_v54 = vand.u32 4294901760, %v168_v39  ;;  %v10272_v51 = vsub.f32 %v164_v37, %v2817_v56  ;;  %v10298_v37 = vsub.f32 %v166_v38, %v2821_v11  ;;  %v175_v38 = vld [vmem:[%s12542_s1 + $0x470] sm:$0xff] }
 0x187   :  { %6988 = vmatpush1.bf16.msra.mxu1 %v6987_v20  ;;  %v13950_v15 = vand.u32 4294901760, %v13949_v0  ;;  %v13975_v20 = vld [vmem:[#allocation86_spill] sm:$0xff]  ;;  %v13029_v0 = vand.u32 4294901760, %v10233_v6 }
 0x188   :  { %6990 = vmatprep.subr.bf16.mxu1 %v6989_v61  ;;  %v13978_v61 = vld [vmem:[#allocation183_spill] sm:$0xff]  ;;  %13993 = vst [vmem:[#allocation149_spill] sm:$0xff] %v10298_v37 }
 0x189   :  { %7440 = vmatpush1.bf16.msra.mxu0 %v13692_v43  ;;  %v6995_v50 = vpack.c.bf16 %v13952_v34, %v13950_v15  ;;  %v10194_v43 = vand.u32 4294901760, %v31_v59  ;;  %v13979_v60 = vand.u32 4294901760, %v13978_v61  ;;  %v13984_v15 = vld [vmem:[#allocation89_spill] sm:$0xff]  ;;  %v13985_v34 = vld [vmem:[#allocation92_spill] sm:$0xff] }
 0x18a   :  { %7442 = vmatprep.subr.bf16.mxu0 %v13693_v52  ;;  %v13957_v52 = vand.u32 4294901760, %v13666_v48  ;;  %v13968_v48 = vld [vmem:[#allocation177_spill] sm:$0xff] }
 0x18b   :  { %6992 = vmatpush1.bf16.msra.mxu1 %v6991_v12  ;;  %13956 = vst [vmem:[#allocation100_spill] sm:$0xff] %v10194_v43  ;;  %v13969_v55 = vand.u32 4294901760, %v13968_v48  ;;  %v7007_v16 = vpack.c.bf16 %v13979_v60, %v13977_v32  ;;  %v13980_v12 = vld [vmem:[#allocation185_spill] sm:$0xff]  ;;  %v2829_v48 = vand.u32 4294901760, %v170_v14  ;;  %v2841_v60 = vand.u32 4294901760, %v176_v31 }
 0x18c   :  { %6994 = vmatprep.subr.bf16.mxu1 %v6993_v25  ;;  %v6999_v63 = vpack.c.bf16 %v13959_v41, %v13957_v52  ;;  %v13981_v1 = vand.u32 4294901760, %v13980_v12  ;;  %v13987_v52 = vand.u32 4294901760, %v9422_v33  ;;  %v13997_v32 = vld [vmem:[#allocation189_spill] sm:$0xff]  ;;  %v13999_v12 = vld [vmem:[#allocation99_spill] sm:$0xff] }
 0x18d   :  { %7444 = vmatpush1.bf16.msra.mxu0 %v13694_v10  ;;  %v10207_v10 = vsub.f32 %v31_v59, %v10194_v43  ;;  %v13030_v59 = vand.u32 4294901760, %v10228_v13 }
 0x18e   :  { %7446 = vmatprep.subr.bf16.mxu0 %v13695_v24  ;;  %v13966_v24 = vld [vmem:[#allocation175_spill] sm:$0xff]  ;;  %v7009_v25 = vpack.c.bf16 %v13983_v53, %v13981_v1  ;;  %v7011_v41 = vpack.c.bf16 %v13988_v57, %v13987_v52  ;;  %v10332_v1 = vsub.f32 %v170_v14, %v2829_v48  ;;  %v179_v14 = vld [vmem:[%s12542_s1 + $0x490] sm:$0xff] }
 0x18f   :  { %6996 = vmatpush1.bf16.msra.mxu1 %v6995_v50  ;;  %13964 = vst [vmem:[#allocation107_spill] sm:$0xff] %v10207_v10  ;;  %v13967_v19 = vand.u32 4294901760, %v13966_v24  ;;  %v13024_v29 = vand.u32 4294901760, %v10207_v10  ;;  %v10258_v50 = vpack.c.bf16 %v2817_v56, %v2813_v36  ;;  %v10284_v33 = vpack.c.bf16 %v13029_v0, %v13030_v59  ;;  %v10339_v53 = vld [vmem:[%s12542_s1 + $0x488] sm:$0xff]  ;;  %v14016_v24 = vld [vmem:[#allocation118_spill] sm:$0xff] }
 0x190   :  { %6998 = vmatprep.subr.bf16.mxu1 %v6997_v47  ;;  %v167_v47 = vld [vmem:[%s12542_s1 + $0x430] sm:$0xff] }
 0x191   :  { %7448 = vmatpush1.bf16.msra.mxu0 %v13696_v8  ;;  %v7003_v27 = vpack.c.bf16 %v13969_v55, %v13967_v19  ;;  %v13970_v8 = vld [vmem:[#allocation179_spill] sm:$0xff]  ;;  %v2944_v58 = vsub.f32 %v10207_v10, %v13024_v29  ;;  %13986 = vst [vmem:[#allocation167_spill] sm:$0xff] %v10258_v50  ;;  %13990 = vst [vmem:[#allocation88_spill] sm:$0xff] %v10284_v33  ;;  %v10290_v19 = vpack.c.bf16 %v2825_v54, %v2821_v11 }
 0x192   :  { %7450 = vmatprep.subr.bf16.mxu0 %v13965_v42  ;;  %v13971_v18 = vand.u32 4294901760, %v13970_v8  ;;  %v2833_v55 = vand.u32 4294901760, %v172_v26  ;;  %v10300_v8 = vsub.f32 %v168_v39, %v2825_v54  ;;  %v10450_v39 = vld [vmem:[%s12542_s1 + $0x4e8] sm:$0xff] }
 0x193   :  { %7000 = vmatpush1.bf16.msra.mxu1 %v6999_v63  ;;  %v10270_v63 = vsub.f32 %v162_v30, %v2813_v36  ;;  %v2945_v42 = vand.u32 4294901760, %v2944_v58  ;;  %13992 = vst [vmem:[#allocation2_spill] sm:$0xff] %v10290_v19  ;;  %v171_v30 = vld [vmem:[%s12542_s1 + $0x450] sm:$0xff] }
 0x194   :  { %7002 = vmatprep.subr.bf16.mxu1 %v7001_v9  ;;  %v7005_v44 = vpack.c.bf16 %v13973_v7, %v13971_v18  ;;  %v2827_v9 = vand.u32 4294901760, %v167_v47  ;;  %v174_v18 = vld [vmem:[%s12542_s1 + $0x468] sm:$0xff]  ;;  %v13994_v7 = vld [vmem:[#allocation98_spill] sm:$0xff]  ;;  %v2835_v56 = vand.u32 4294901760, %v171_v30  ;;  %v10321_v61 = vpack.c.bf16 %v2833_v55, %v2829_v48  ;;  %v10383_v48 = vld [vmem:[%s12542_s1 + $0x4b8] sm:$0xff] }
 0x195   :  { %7452 = vmatpush1.bf16.msra.mxu0 %v13974_v3  ;;  %13989 = vst [vmem:[#allocation87_spill] sm:$0xff] %v10270_v63  ;;  %v10334_v5 = vsub.f32 %v172_v26, %v2833_v55  ;;  %v14004_v55 = vld [vmem:[#allocation108_spill] sm:$0xff] }
 0x196   :  { %7454 = vmatprep.subr.bf16.mxu0 %v13975_v20  ;;  %v10312_v3 = vsub.f32 %v167_v47, %v2827_v9  ;;  %v10315_v20 = vpack.c.bf16 %v2827_v9, %v2823_v62  ;;  %13998 = vst [vmem:[#allocation6_spill] sm:$0xff] %v10321_v61  ;;  %v10373_v9 = vsub.f32 %v176_v31, %v2841_v60 }
 0x197   :  { %7004 = vmatpush1.bf16.msra.mxu1 %v7003_v27  ;;  %v169_v27 = vld [vmem:[%s12542_s1 + $0x440] sm:$0xff] }
 0x198   :  { %7006 = vmatprep.subr.bf16.mxu1 %v7005_v44  ;;  %v10310_v44 = vsub.f32 %v165_v35, %v2823_v62  ;;  %13996 = vst [vmem:[#allocation161_spill] sm:$0xff] %v10315_v20  ;;  %v2831_v36 = vand.u32 4294901760, %v169_v27  ;;  %v2843_v35 = vand.u32 4294901760, %v175_v38 }
 0x199   :  { %7456 = vmatpush1.bf16.msra.mxu0 %v13984_v15  ;;  %v14000_v15 = vld [vmem:[#allocation105_spill] sm:$0xff] }
 0x19a   :  { %7458 = vmatprep.subr.bf16.mxu0 %v13985_v34  ;;  %13995 = vst [vmem:[#allocation104_spill] sm:$0xff] %v10310_v44  ;;  %v10348_v58 = vsub.f32 %v169_v27, %v2831_v36  ;;  %v10350_v34 = vsub.f32 %v171_v30, %v2835_v56  ;;  %v10353_v11 = vpack.c.bf16 %v2835_v56, %v2831_v36 }
 0x19b   :  { %7008 = vmatpush1.bf16.msra.mxu1 %v7007_v16  ;;  %v173_v16 = vld [vmem:[%s12542_s1 + $0x460] sm:$0xff]  ;;  %v10388_v30 = vsub.f32 %v175_v38, %v2843_v35  ;;  %v183_v38 = vld [vmem:[%s12542_s1 + $0x4b0] sm:$0xff] }
 0x19c   :  { %7010 = vmatprep.subr.bf16.mxu1 %v7009_v25  ;;  %v10344_v25 = vld [vmem:[%s12542_s1 + $0x498] sm:$0xff]  ;;  %14001 = vst [vmem:[#allocation170_spill] sm:$0xff] %v10353_v11  ;;  %v2839_v54 = vand.u32 4294901760, %v173_v16 }
 0x19d   :  { %7460 = vmatpush1.bf16.msra.mxu0 %v13991_v28  ;;  %v13027_v57 = vand.u32 4294901760, %v10344_v25  ;;  %v14003_v28 = vld [vmem:[#allocation106_spill] sm:$0xff]  ;;  %14006 = vst [vmem:[#allocation103_spill] sm:$0xff] %v10388_v30 }
 0x19e   :  { %7462 = vmatprep.subr.bf16.mxu0 %v10258_v50  ;;  %v10386_v27 = vsub.f32 %v173_v16, %v2839_v54  ;;  %v181_v16 = vld [vmem:[%s12542_s1 + $0x4a0] sm:$0xff] }
 0x19f   :  { %7012 = vmatpush1.bf16.msra.mxu1 %v7011_v41  ;;  %v177_v41 = vld [vmem:[%s12542_s1 + $0x480] sm:$0xff] }
 0x1a0   :  { %7014 = vmatprep.subr.bf16.mxu1 %v13994_v7  ;;  %2807 = vmatmul.mubr.f32.vlgmr.msra.gmra.mrb[0].mxu0 %v13870_v40  ;;  %v2837_v40 = vand.u32 4294901760, %v174_v18  ;;  %14005 = vst [vmem:[#allocation190_spill] sm:$0xff] %v10386_v27  ;;  %v2847_v31 = vand.u32 4294901760, %v177_v41  ;;  %v2851_v7 = vand.u32 4294901760, %v179_v14 }
 0x1a1   :  { %7464 = vmatpush1.bf16.msra.mxu0 %v10284_v33  ;;  %2946 = vmatprep.mubr.f32.mxu0 %v2945_v42  ;;  %v10378_v42 = vld [vmem:[%s12542_s1 + $0x4a8] sm:$0xff] }
 0x1a2   :  { %1386 = vmatmul.mubr.f32.vlgmr.msra.gmra.mrb[0].mxu1 %v13997_v32  ;;  %7466 = vmatprep.subr.bf16.mxu0 %v10290_v19  ;;  %v10358_v52 = vpack.c.bf16 %v2841_v60, %v2837_v40  ;;  %v10371_v62 = vsub.f32 %v174_v18, %v2837_v40  ;;  %v10391_v18 = vpack.c.bf16 %v2843_v35, %v2839_v54  ;;  %v13026_v40 = vand.u32 4294901760, %v10378_v42  ;;  %v186_v54 = vld [vmem:[%s12542_s1 + $0x4c8] sm:$0xff]  ;;  %v188_v35 = vld [vmem:[%s12542_s1 + $0x4d8] sm:$0xff] }
 0x1a3   :  { %7016 = vmatpush1.bf16.msra.mxu1 %v13999_v12  ;;  %1521 = vmatprep.mubr.f32.mxu1 %v13876_v4  ;;  %v13028_v4 = vand.u32 4294901760, %v10339_v53  ;;  %v13025_v60 = vand.u32 4294901760, %v10383_v48  ;;  %v10422_v29 = vsub.f32 %v179_v14, %v2851_v7  ;;  %v10425_v36 = vpack.c.bf16 %v2851_v7, %v2847_v31  ;;  %v10442_v14 = vld [vmem:[%s12542_s1 + $0x4d0] sm:$0xff] }
 0x1a4   :  { %7018 = vmatprep.subr.bf16.mxu1 %v14000_v15  ;;  %14002 = vst [vmem:[#allocation8_spill] sm:$0xff] %v10358_v52  ;;  %14007 = vst [vmem:[#allocation11_spill] sm:$0xff] %v10391_v18  ;;  %v14009_v15 = vld [vmem:[#allocation109_spill] sm:$0xff]  ;;  %v2855_v12 = vand.u32 4294901760, %v181_v16  ;;  %v2861_v47 = vand.u32 4294901760, %v186_v54  ;;  %v14015_v7 = vld [vmem:[#allocation116_spill] sm:$0xff] }
 0x1a5   :  { %7468 = vmatpush1.bf16.msra.mxu0 %v10315_v20  ;;  %v10400_v56 = vpack.c.bf16 %v13027_v57, %v13028_v4  ;;  %14012 = vst [vmem:[#allocation21_spill] sm:$0xff] %v10422_v29  ;;  %14013 = vst [vmem:[#allocation24_spill] sm:$0xff] %v10425_v36  ;;  %v10432_v26 = vpack.c.bf16 %v13025_v60, %v13026_v40  ;;  %v196_v57 = vld [vmem:[%s12542_s1 + $0x518] sm:$0xff] }
 0x1a6   :  { %7470 = vmatprep.subr.bf16.mxu0 %v10321_v61  ;;  %v10458_v60 = vsub.f32 %v181_v16, %v2855_v12  ;;  %v10475_v16 = vld [vmem:[%s12542_s1 + $0x4e0] sm:$0xff]  ;;  %v10485_v59 = vsub.f32 %v186_v54, %v2861_v47  ;;  %v204_v61 = vld [vmem:[%s12542_s1 + $0x558] sm:$0xff] }
 0x1a7   :  { %7020 = vmatpush1.bf16.msra.mxu1 %v14003_v28  ;;  %14008 = vst [vmem:[#allocation15_spill] sm:$0xff] %v10400_v56  ;;  %v14010_v28 = vld [vmem:[#allocation112_spill] sm:$0xff]  ;;  %14014 = vst [vmem:[#allocation26_spill] sm:$0xff] %v10432_v26  ;;  %v13051_v54 = vand.u32 4294901760, %v10475_v16  ;;  %v2897_v50 = vand.u32 4294901760, %v204_v61 }
 0x1a8   :  { %7022 = vmatprep.subr.bf16.mxu1 %v14004_v55  ;;  %v10420_v55 = vsub.f32 %v177_v41, %v2847_v31  ;;  %v10437_v41 = vld [vmem:[%s12542_s1 + $0x4c0] sm:$0xff]  ;;  %14017 = vst [vmem:[#allocation29_spill] sm:$0xff] %v10458_v60  ;;  %14022 = vst [vmem:[#allocation41_spill] sm:$0xff] %v10485_v59  ;;  %v218_v60 = vld [vmem:[%s12542_s1 + $0x5c8] sm:$0xff] }
 0x1a9   :  { %7472 = vmatpush1.bf16.msra.mxu0 %v10353_v11 }
 0x1aa   :  { %7474 = vmatprep.subr.bf16.mxu0 %v10358_v52  ;;  %14011 = vst [vmem:[#allocation17_spill] sm:$0xff] %v10420_v55 }
 0x1ab   :  { %7024 = vmatpush1.bf16.msra.mxu1 %v14009_v15  ;;  %v2859_v15 = vand.u32 4294901760, %v183_v38 }
 0x1ac   :  { %7026 = vmatprep.subr.bf16.mxu1 %v14010_v28  ;;  %v2865_v28 = vand.u32 4294901760, %v188_v35 }
 0x1ad   :  { %7476 = vmatpush1.bf16.msra.mxu0 %v10391_v18  ;;  %v10460_v40 = vsub.f32 %v183_v38, %v2859_v15  ;;  %v10463_v31 = vpack.c.bf16 %v2859_v15, %v2855_v12  ;;  %v10480_v38 = vld [vmem:[%s12542_s1 + $0x4f0] sm:$0xff]  ;;  %v14021_v15 = vld [vmem:[#allocation121_spill] sm:$0xff]  ;;  %v14025_v12 = vand.u32 4294901760, %v10437_v41 }
 0x1ae   :  { %7478 = vmatprep.subr.bf16.mxu0 %v10400_v56  ;;  %v10468_v4 = vpack.c.bf16 %v2865_v28, %v2861_v47  ;;  %v10487_v0 = vsub.f32 %v188_v35, %v2865_v28  ;;  %v2881_v56 = vand.u32 4294901760, %v196_v57  ;;  %v14031_v28 = vld [vmem:[#allocation128_spill] sm:$0xff]  ;;  %v10528_v35 = vld [vmem:[%s12542_s1 + $0x528] sm:$0xff] }
 0x1af   :  { %7028 = vmatpush1.bf16.msra.mxu1 %v14015_v7  ;;  %14018 = vst [vmem:[#allocation32_spill] sm:$0xff] %v10460_v40  ;;  %14019 = vst [vmem:[#allocation35_spill] sm:$0xff] %v10463_v31  ;;  %v14024_v7 = vld [vmem:[#allocation124_spill] sm:$0xff]  ;;  %v14046_v19 = vand.u32 4294901760, %v10528_v35 }
 0x1b0   :  { %7030 = vmatprep.subr.bf16.mxu1 %v14016_v24  ;;  %14020 = vst [vmem:[#allocation38_spill] sm:$0xff] %v10468_v4  ;;  %14023 = vst [vmem:[#allocation44_spill] sm:$0xff] %v10487_v0  ;;  %v194_v24 = vld [vmem:[%s12542_s1 + $0x508] sm:$0xff]  ;;  %v212_v0 = vld [vmem:[%s12542_s1 + $0x598] sm:$0xff] }
 0x1b1   :  { %7480 = vmatpush1.bf16.msra.mxu0 %v10425_v36  ;;  %v2877_v36 = vand.u32 4294901760, %v194_v24  ;;  %v2913_v40 = vand.u32 4294901760, %v212_v0 }
 0x1b2   :  { %7482 = vmatprep.subr.bf16.mxu0 %v10432_v26  ;;  %v14028_v26 = vand.u32 4294901760, %v10450_v39 }
 0x1b3   :  { %7032 = vmatpush1.bf16.msra.mxu1 %v14021_v15  ;;  %v14026_v15 = vand.u32 4294901760, %v10442_v14  ;;  %v10546_v11 = vpack.c.bf16 %v2881_v56, %v2877_v36  ;;  %v10561_v52 = vsub.f32 %v194_v24, %v2877_v36  ;;  %v14051_v24 = vld [vmem:[#allocation140_spill] sm:$0xff] }
 0x1b4   :  { %7034 = vmatprep.subr.bf16.mxu1 %v14024_v7  ;;  %v14029_v7 = vand.u32 4294901760, %v10455_v49 }
 0x1b5   :  { %7484 = vmatpush1.bf16.msra.mxu0 %v10463_v31  ;;  %v10501_v47 = vpack.c.bf16 %v14026_v15, %v14025_v12  ;;  %v10517_v12 = vld [vmem:[%s12542_s1 + $0x500] sm:$0xff]  ;;  %v10522_v15 = vld [vmem:[%s12542_s1 + $0x510] sm:$0xff]  ;;  %14036 = vst [vmem:[#allocation59_spill] sm:$0xff] %v10546_v11  ;;  %14040 = vst [vmem:[#allocation68_spill] sm:$0xff] %v10561_v52 }
 0x1b6   :  { %7486 = vmatprep.subr.bf16.mxu0 %v10468_v4  ;;  %v10512_v31 = vpack.c.bf16 %v14029_v7, %v14028_v26  ;;  %v10533_v26 = vld [vmem:[%s12542_s1 + $0x538] sm:$0xff]  ;;  %v14033_v7 = vld [vmem:[#allocation130_spill] sm:$0xff]  ;;  %v14034_v4 = vand.u32 4294901760, %v10480_v38  ;;  %v14043_v20 = vand.u32 4294901760, %v10517_v12 }
 0x1b7   :  { %14027 = vst [vmem:[#allocation47_spill] sm:$0xff] %v10501_v47  ;;  %7036 = vmatpush1.bf16.msra.mxu1 %v14031_v28  ;;  %14032 = vst [vmem:[#allocation53_spill] sm:$0xff] %v10533_v26  ;;  %v10563_v28 = vsub.f32 %v196_v57, %v2881_v56  ;;  %v10604_v56 = vld [vmem:[%s12542_s1 + $0x568] sm:$0xff] }
 0x1b8   :  { %14030 = vst [vmem:[#allocation50_spill] sm:$0xff] %v10512_v31  ;;  %7038 = vmatprep.subr.bf16.mxu1 %v14033_v7  ;;  %v10541_v18 = vpack.c.bf16 %v14034_v4, %v13051_v54  ;;  %v10558_v4 = vld [vmem:[%s12542_s1 + $0x530] sm:$0xff]  ;;  %v14039_v54 = vld [vmem:[#allocation133_spill] sm:$0xff]  ;;  %v202_v7 = vld [vmem:[%s12542_s1 + $0x548] sm:$0xff] }
 0x1b9   :  { %7488 = vmatpush1.bf16.msra.mxu0 %v10501_v47  ;;  %v10553_v47 = vld [vmem:[%s12542_s1 + $0x520] sm:$0xff]  ;;  %14038 = vst [vmem:[#allocation65_spill] sm:$0xff] %v10558_v4  ;;  %14041 = vst [vmem:[#allocation71_spill] sm:$0xff] %v10563_v28  ;;  %v2893_v33 = vand.u32 4294901760, %v202_v7 }
 0x1ba   :  { %14035 = vst [vmem:[#allocation56_spill] sm:$0xff] %v10541_v18  ;;  %7490 = vmatprep.subr.bf16.mxu0 %v10512_v31  ;;  %14037 = vst [vmem:[#allocation62_spill] sm:$0xff] %v10553_v47  ;;  %v14042_v31 = vld [vmem:[#allocation136_spill] sm:$0xff]  ;;  %v13076_v57 = vand.u32 4294901760, %v10553_v47 }
 0x1bb   :  { %7040 = vmatpush1.bf16.msra.mxu1 %v14039_v54  ;;  %v14044_v54 = vand.u32 4294901760, %v10522_v15  ;;  %14052 = vst [vmem:[#allocation5_spill] sm:$0xff] %v10604_v56  ;;  %v10622_v52 = vpack.c.bf16 %v2897_v50, %v2893_v33  ;;  %v10637_v28 = vsub.f32 %v202_v7, %v2893_v33  ;;  %v14070_v7 = vand.u32 4294901760, %v10228_v13 }
 0x1bc   :  { %7042 = vmatprep.subr.bf16.mxu1 %v14042_v31  ;;  %v14047_v31 = vand.u32 4294901760, %v10533_v26 }
 0x1bd   :  { %7492 = vmatpush1.bf16.msra.mxu0 %v10541_v18  ;;  %v10577_v36 = vpack.c.bf16 %v14044_v54, %v14043_v20  ;;  %v10593_v20 = vld [vmem:[%s12542_s1 + $0x540] sm:$0xff]  ;;  %v10598_v54 = vld [vmem:[%s12542_s1 + $0x550] sm:$0xff]  ;;  %14057 = vst [vmem:[#allocation10_spill] sm:$0xff] %v10622_v52  ;;  %14061 = vst [vmem:[#allocation101_spill] sm:$0xff] %v10637_v28 }
 0x1be   :  { %7494 = vmatprep.subr.bf16.mxu0 %v10546_v11  ;;  %v10588_v18 = vpack.c.bf16 %v14047_v31, %v14046_v19  ;;  %14049 = vst [vmem:[#allocation3_spill] sm:$0xff] %v10593_v20  ;;  %14050 = vst [vmem:[#allocation4_spill] sm:$0xff] %v10598_v54  ;;  %v10609_v19 = vld [vmem:[%s12542_s1 + $0x578] sm:$0xff]  ;;  %v14054_v31 = vld [vmem:[#allocation142_spill] sm:$0xff]  ;;  %v14055_v11 = vand.u32 4294901760, %v10558_v4  ;;  %v14064_v59 = vand.u32 4294901760, %v10593_v20 }
 0x1bf   :  { %14045 = vst [vmem:[#allocation74_spill] sm:$0xff] %v10577_v36  ;;  %7044 = vmatpush1.bf16.msra.mxu1 %v14051_v24  ;;  %14053 = vst [vmem:[#allocation7_spill] sm:$0xff] %v10609_v19  ;;  %v10639_v24 = vsub.f32 %v204_v61, %v2897_v50  ;;  %v14067_v4 = vand.u32 4294901760, %v10604_v56  ;;  %v10679_v61 = vsub.f32 %v10228_v13, %v14070_v7  ;;  %v14072_v50 = vld [vmem:[#allocation152_spill] sm:$0xff]  ;;  %v14073_v13 = vand.u32 4294901760, %v10339_v53 }
 0x1c0   :  { %14048 = vst [vmem:[#allocation77_spill] sm:$0xff] %v10588_v18  ;;  %7046 = vmatprep.subr.bf16.mxu1 %v14054_v31  ;;  %v10617_v10 = vpack.c.bf16 %v14055_v11, %v13076_v57  ;;  %v10634_v11 = vld [vmem:[%s12542_s1 + $0x570] sm:$0xff]  ;;  %v14060_v57 = vld [vmem:[#allocation145_spill] sm:$0xff]  ;;  %v210_v31 = vld [vmem:[%s12542_s1 + $0x588] sm:$0xff] }
 0x1c1   :  { %7496 = vmatpush1.bf16.msra.mxu0 %v10577_v36  ;;  %v10629_v36 = vld [vmem:[%s12542_s1 + $0x560] sm:$0xff]  ;;  %14059 = vst [vmem:[#allocation13_spill] sm:$0xff] %v10634_v11  ;;  %14062 = vst [vmem:[#allocation191_spill] sm:$0xff] %v10639_v24  ;;  %v2909_v20 = vand.u32 4294901760, %v210_v31  ;;  %v10695_v24 = vld [vmem:[%s12542_s1 + $0x5b8] sm:$0xff]  ;;  %v10700_v7 = vsub.f32 %v10339_v53, %v14073_v13 }
 0x1c2   :  { %14056 = vst [vmem:[#allocation9_spill] sm:$0xff] %v10617_v10  ;;  %7498 = vmatprep.subr.bf16.mxu0 %v10588_v18  ;;  %14058 = vst [vmem:[#allocation12_spill] sm:$0xff] %v10629_v36  ;;  %v14063_v18 = vld [vmem:[#allocation148_spill] sm:$0xff]  ;;  %v10721_v53 = vld [vmem:[%s12542_s1 + $0x5a0] sm:$0xff] }
 0x1c3   :  { %7048 = vmatpush1.bf16.msra.mxu1 %v14060_v57  ;;  %v14065_v57 = vand.u32 4294901760, %v10598_v54  ;;  %14074 = vst [vmem:[#allocation18_spill] sm:$0xff] %v10700_v7  ;;  %v14081_v54 = vld [vmem:[#allocation154_spill] sm:$0xff]  ;;  %14082 = vst [vmem:[#allocation23_spill] sm:$0xff] %v10721_v53 }
 0x1c4   :  { %7050 = vmatprep.subr.bf16.mxu1 %v14063_v18  ;;  %v14068_v18 = vand.u32 4294901760, %v10609_v19  ;;  %v14079_v19 = vand.u32 4294901760, %v10383_v48 }
 0x1c5   :  { %7500 = vmatpush1.bf16.msra.mxu0 %v10617_v10  ;;  %v10653_v33 = vpack.c.bf16 %v14065_v57, %v14064_v59  ;;  %v10669_v59 = vld [vmem:[%s12542_s1 + $0x580] sm:$0xff]  ;;  %v10674_v57 = vld [vmem:[%s12542_s1 + $0x590] sm:$0xff] }
 0x1c6   :  { %7502 = vmatprep.subr.bf16.mxu0 %v10622_v52  ;;  %v10664_v10 = vpack.c.bf16 %v14068_v18, %v14067_v4  ;;  %v14071_v4 = vand.u32 4294901760, %v10233_v6  ;;  %v10690_v52 = vld [vmem:[%s12542_s1 + $0x5a8] sm:$0xff]  ;;  %v10715_v56 = vsub.f32 %v10383_v48, %v14079_v19  ;;  %v14086_v48 = vand.u32 4294901760, %v10629_v36 }
 0x1c7   :  { %14066 = vst [vmem:[#allocation14_spill] sm:$0xff] %v10653_v33  ;;  %7052 = vmatpush1.bf16.msra.mxu1 %v14072_v50  ;;  %v14077_v50 = vand.u32 4294901760, %v10378_v42  ;;  %v10762_v36 = vsub.f32 %v210_v31, %v2909_v20  ;;  %v14098_v47 = vand.u32 4294901760, %v10669_v59 }
 0x1c8   :  { %14069 = vst [vmem:[#allocation16_spill] sm:$0xff] %v10664_v10  ;;  %v10684_v18 = vsub.f32 %v10233_v6, %v14071_v4  ;;  %v14075_v6 = vand.u32 4294901760, %v10344_v25  ;;  %14080 = vst [vmem:[#allocation22_spill] sm:$0xff] %v10715_v56  ;;  %7054 = vmatprep.subr.bf16.mxu1 %v14081_v54  ;;  %v14087_v54 = vand.u32 4294901760, %v10634_v11  ;;  %v14092_v11 = vld [vmem:[#allocation157_spill] sm:$0xff] }
 0x1c9   :  { %v10710_v28 = vsub.f32 %v10378_v42, %v14077_v50  ;;  %v14084_v42 = vand.u32 4294901760, %v10437_v41  ;;  %7504 = vmatpush1.bf16.msra.mxu0 %v10653_v33  ;;  %v14089_v33 = vand.u32 4294901760, %v10442_v14  ;;  %14093 = vst [vmem:[#allocation33_spill] sm:$0xff] %v10762_v36  ;;  %v14099_v50 = vand.u32 4294901760, %v10674_v57 }
 0x1ca   :  { %v10705_v4 = vsub.f32 %v10344_v25, %v14075_v6  ;;  %v10726_v25 = vld [vmem:[%s12542_s1 + $0x5b0] sm:$0xff]  ;;  %v10738_v19 = vpack.c.bf16 %v14087_v54, %v14086_v48  ;;  %7506 = vmatprep.subr.bf16.mxu0 %v10664_v10  ;;  %v10757_v54 = vpack.c.bf16 %v2913_v40, %v2909_v20  ;;  %v2925_v20 = vand.u32 4294901760, %v218_v60 }
 0x1cb   :  { %14078 = vst [vmem:[#allocation20_spill] sm:$0xff] %v10710_v28  ;;  %14083 = vst [vmem:[#allocation25_spill] sm:$0xff] %v10726_v25  ;;  %v10731_v13 = vsub.f32 %v10437_v41, %v14084_v42  ;;  %v220_v41 = vld [vmem:[%s12542_s1 + $0x5d8] sm:$0xff]  ;;  %v30_v42 = vld [vmem:[%s12543_s0 + $0x20] sm:$0xff]  ;;  %v10754_v48 = vsub.f32 %v10442_v14, %v14089_v33  ;;  %7056 = vmatpush1.bf16.msra.mxu1 %v14092_v11  ;;  %v14097_v11 = vand.u32 4294901760, %v10450_v39  ;;  %v14122_v36 = vand.u32 4294901760, %v10679_v61 }
 0x1cc   :  { %14076 = vst [vmem:[#allocation19_spill] sm:$0xff] %v10705_v4  ;;  %14088 = vst [vmem:[#allocation28_spill] sm:$0xff] %v10738_v19  ;;  %v10771_v14 = vld [vmem:[%s12542_s1 + $0x5c0] sm:$0xff]  ;;  %v10776_v33 = vld [vmem:[%s12542_s1 + $0x5d0] sm:$0xff]  ;;  %v2929_v31 = vand.u32 4294901760, %v220_v41  ;;  %v10792_v10 = vpack.c.bf16 %v14099_v50, %v14098_v47 }
 0x1cd   :  { %14085 = vst [vmem:[#allocation27_spill] sm:$0xff] %v10731_v13  ;;  %14090 = vst [vmem:[#allocation30_spill] sm:$0xff] %v10754_v48  ;;  %v10764_v13 = vsub.f32 %v212_v0, %v2913_v40  ;;  %v14095_v6 = vld [vmem:[#allocation160_spill] sm:$0xff]  ;;  %v10780_v40 = vand.u32 4294901760, %v30_v42  ;;  %v10785_v32 = vsub.f32 %v10450_v39, %v14097_v11  ;;  %7508 = vmatpush1.bf16.msra.mxu0 %v10738_v19  ;;  %v14101_v48 = vand.u32 4294901760, %v10455_v49  ;;  %v10846_v47 = vld [vmem:[%s12542_s1 + $0x5e0] sm:$0xff] }
 0x1ce   :  { %14091 = vst [vmem:[#allocation31_spill] sm:$0xff] %v10757_v54  ;;  %7058 = vmatprep.subr.bf16.mxu1 %v14095_v6  ;;  %14100 = vst [vmem:[#allocation37_spill] sm:$0xff] %v10792_v10  ;;  %7510 = vmatprep.subr.bf16.mxu0 %v10757_v54  ;;  %v14102_v39 = vand.u32 4294901760, %v10690_v52  ;;  %v14103_v11 = vand.u32 4294901760, %v10695_v24  ;;  %v14105_v6 = vand.u32 4294901760, %v10475_v16  ;;  %v10841_v50 = vpack.c.bf16 %v2929_v31, %v2925_v20 }
 0x1cf   :  { %14094 = vst [vmem:[#allocation34_spill] sm:$0xff] %v10764_v13  ;;  %14096 = vst [vmem:[#allocation36_spill] sm:$0xff] %v10780_v40  ;;  %v10800_v26 = vsub.f32 %v10455_v49, %v14101_v48  ;;  %v14107_v49 = vand.u32 4294901760, %v10480_v38  ;;  %7060 = vmatpush1.bf16.msra.mxu1 %v13839_v2  ;;  %v14110_v2 = vand.u32 4294901760, %v10726_v25  ;;  %v10857_v54 = vsub.f32 %v30_v42, %v10780_v40 }
 0x1d0   :  { %v10807_v19 = vpack.c.bf16 %v14103_v11, %v14102_v39  ;;  %v10814_v0 = vsub.f32 %v10475_v16, %v14105_v6  ;;  %v10825_v39 = vld [vmem:[%s12542_s1 + $0x5e8] sm:$0xff]  ;;  %v10830_v11 = vld [vmem:[%s12542_s1 + $0x5f8] sm:$0xff]  ;;  %7062 = vmatprep.subr.bf16.mxu1 %v13840_v22  ;;  %14112 = vst [vmem:[#allocation45_spill] sm:$0xff] %v10841_v50  ;;  %v10851_v16 = vld [vmem:[%s12542_s1 + $0x5f0] sm:$0xff]  ;;  %v14113_v22 = vand.u32 4294901760, %v10270_v63  ;;  %v14119_v42 = vand.u32 4294901760, %v10776_v33 }
 0x1d1   :  { %v10819_v48 = vsub.f32 %v10480_v38, %v14107_v49  ;;  %v14109_v38 = vand.u32 4294901760, %v10721_v53  ;;  %14114 = vst [vmem:[#allocation46_spill] sm:$0xff] %v10857_v54  ;;  %7512 = vmatpush1.bf16.msra.mxu0 %v10792_v10  ;;  %v10868_v53 = vsub.f32 %v220_v41, %v2929_v31  ;;  %v14121_v10 = vld [vmem:[#allocation169_spill] sm:$0xff]  ;;  %v2967_v41 = vsub.f32 %v10679_v61, %v14122_v36 }
 0x1d2   :  { %14104 = vst [vmem:[#allocation39_spill] sm:$0xff] %v10807_v19  ;;  %14106 = vst [vmem:[#allocation40_spill] sm:$0xff] %v10814_v0  ;;  %v2961_v6 = vsub.f32 %v10270_v63, %v14113_v22  ;;  %7514 = vmatprep.subr.bf16.mxu0 %v10807_v19  ;;  %v14118_v22 = vand.u32 4294901760, %v10771_v14  ;;  %v14123_v31 = vand.u32 4294901760, %v10684_v18  ;;  %v14126_v63 = vand.u32 4294901760, %v10300_v8 }
 0x1d3   :  { %14108 = vst [vmem:[#allocation42_spill] sm:$0xff] %v10819_v48  ;;  %v10839_v49 = vpack.c.bf16 %v14110_v2, %v14109_v38  ;;  %v10860_v38 = vsub.f32 %v218_v60, %v2925_v20  ;;  %v14116_v2 = vand.u32 4294901760, %v10272_v51  ;;  %14117 = vst [vmem:[#allocation49_spill] sm:$0xff] %v10868_v53  ;;  %7064 = vmatpush1.bf16.msra.mxu1 %v14121_v10  ;;  %v14129_v10 = vand.u32 4294901760, %v10830_v11 }
 0x1d4   :  { %v10874_v40 = vpack.c.bf16 %v14119_v42, %v14118_v22  ;;  %v2979_v19 = vsub.f32 %v10684_v18, %v14123_v31  ;;  %v14124_v22 = vld [vmem:[#allocation172_spill] sm:$0xff]  ;;  %v2962_v42 = vand.u32 4294901760, %v2961_v6  ;;  %v2997_v31 = vsub.f32 %v10300_v8, %v14126_v63 }
 0x1d5   :  { %14111 = vst [vmem:[#allocation43_spill] sm:$0xff] %v10839_v49  ;;  %14115 = vst [vmem:[#allocation48_spill] sm:$0xff] %v10860_v38  ;;  %v2973_v13 = vsub.f32 %v10272_v51, %v14116_v2  ;;  %7066 = vmatprep.subr.bf16.mxu1 %v14124_v22  ;;  %7516 = vmatpush1.bf16.msra.mxu0 %v10839_v49  ;;  %v14125_v2 = vand.u32 4294901760, %v10298_v37  ;;  %v14127_v22 = vand.u32 4294901760, %v10517_v12  ;;  %v2968_v6 = vand.u32 4294901760, %v2967_v41 }
 0x1d6   :  { %14120 = vst [vmem:[#allocation51_spill] sm:$0xff] %v10874_v40  ;;  %7518 = vmatprep.subr.bf16.mxu0 %v10841_v50  ;;  %v2980_v49 = vand.u32 4294901760, %v2979_v19  ;;  %v14134_v63 = vand.u32 4294901760, %v10310_v44  ;;  %v14135_v19 = vand.u32 4294901760, %v10312_v3 }
 0x1d7   :  { %v2974_v25 = vand.u32 4294901760, %v2973_v13  ;;  %v2985_v36 = vsub.f32 %v10298_v37, %v14125_v2  ;;  %v10903_v20 = vsub.f32 %v10517_v12, %v14127_v22  ;;  %v14128_v13 = vand.u32 4294901760, %v10825_v39  ;;  %7068 = vmatpush1.bf16.msra.mxu1 %v13857_v21 }
 0x1d8   :  { %v14131_v22 = vand.u32 4294901760, %v10522_v15  ;;  %7070 = vmatprep.subr.bf16.mxu1 %v13858_v17  ;;  %v2991_v21 = vsub.f32 %v10310_v44, %v14134_v63  ;;  %v3003_v41 = vsub.f32 %v10312_v3, %v14135_v19  ;;  %v14136_v12 = vand.u32 4294901760, %v10846_v47 }
 0x1d9   :  { %v10910_v60 = vpack.c.bf16 %v14129_v10, %v14128_v13  ;;  %v14133_v10 = vand.u32 4294901760, %v10857_v54  ;;  %7520 = vmatpush1.bf16.msra.mxu0 %v10874_v40  ;;  %v7525_v17 = vpack.c.bf16 %v2974_v25, %v2962_v42  ;;  %v2986_v37 = vand.u32 4294901760, %v2985_v36 }
 0x1da   :  { %v10920_v50 = vsub.f32 %v10522_v15, %v14131_v22  ;;  %v14137_v15 = vand.u32 4294901760, %v10851_v16  ;;  %v2998_v2 = vand.u32 4294901760, %v2997_v31  ;;  %v7527_v42 = vpack.c.bf16 %v2980_v49, %v2968_v6 }
 0x1db   :  { %14130 = vst [vmem:[#allocation52_spill] sm:$0xff] %v10910_v60  ;;  %v2950_v13 = vsub.f32 %v10857_v54, %v14133_v10  ;;  %7522 = vmatprep.subr.bf16.mxu0 %v10910_v60  ;;  %v14139_v10 = vand.u32 4294901760, %v10332_v1  ;;  %v14140_v54 = vand.u32 4294901760, %v10334_v5  ;;  %7072 = vmatpush1.bf16.msra.mxu1 %v13863_v46  ;;  %v14143_v36 = vand.u32 4294901760, %v10348_v58 }
 0x1dc   :  { %14132 = vst [vmem:[#allocation54_spill] sm:$0xff] %v10920_v50  ;;  %v10937_v22 = vpack.c.bf16 %v14137_v15, %v14136_v12  ;;  %v14141_v12 = vand.u32 4294901760, %v10528_v35  ;;  %v14144_v15 = vand.u32 4294901760, %v10350_v34  ;;  %7074 = vmatprep.subr.bf16.mxu1 %v13864_v45  ;;  %v2992_v44 = vand.u32 4294901760, %v2991_v21 }
 0x1dd   :  { %v3009_v63 = vsub.f32 %v10332_v1, %v14139_v10  ;;  %v3021_v19 = vsub.f32 %v10334_v5, %v14140_v54  ;;  %v3015_v31 = vsub.f32 %v10348_v58, %v14143_v36  ;;  %v2951_v10 = vand.u32 4294901760, %v2950_v13 }
 0x1de   :  { %14138 = vst [vmem:[#allocation55_spill] sm:$0xff] %v10937_v22  ;;  %v10951_v25 = vsub.f32 %v10528_v35, %v14141_v12  ;;  %v3027_v54 = vsub.f32 %v10350_v34, %v14144_v15  ;;  %v3004_v40 = vand.u32 4294901760, %v3003_v41  ;;  %v13151_v60 = vand.u32 4294901760, %v10386_v27  ;;  %7524 = vmatpush1.bf16.msra.mxu0 %v10937_v22 }
 0x1df   :  { %v7529_v35 = vpack.c.bf16 %v2998_v2, %v2986_v37  ;;  %v13152_v46 = vand.u32 4294901760, %v10388_v30  ;;  %v13153_v6 = vand.u32 4294901760, %v10705_v4  ;;  %7526 = vmatprep.subr.bf16.mxu0 %v7525_v17  ;;  %v3010_v12 = vand.u32 4294901760, %v3009_v63  ;;  %7076 = vmatpush1.bf16.msra.mxu1 %v13867_v23 }
 0x1e0   :  { %14142 = vst [vmem:[#allocation57_spill] sm:$0xff] %v10951_v25  ;;  %v3022_v36 = vand.u32 4294901760, %v3021_v19  ;;  %v14145_v15 = vand.u32 4294901760, %v10371_v62  ;;  %v14146_v13 = vand.u32 4294901760, %v10373_v9  ;;  %v3016_v37 = vand.u32 4294901760, %v3015_v31  ;;  %v14152_v19 = vld [vmem:[#allocation62_spill] sm:$0xff] }
 0x1e1   :  { %v3028_v2 = vand.u32 4294901760, %v3027_v54  ;;  %2952 = vmatmul.mubr.f32.vlgmr.msra.gmra.mrb[0].mxu0 %v2951_v10  ;;  %v7531_v17 = vpack.c.bf16 %v3004_v40, %v2992_v44  ;;  %v3039_v63 = vsub.f32 %v10386_v27, %v13151_v60  ;;  %v3051_v23 = vsub.f32 %v10388_v30, %v13152_v46  ;;  %v14148_v40 = vld [vmem:[#allocation53_spill] sm:$0xff]  ;;  %v14163_v30 = vld [vmem:[#allocation44_spill] sm:$0xff] }
 0x1e2   :  { %v3033_v45 = vsub.f32 %v10371_v62, %v14145_v15  ;;  %v3045_v21 = vsub.f32 %v10373_v9, %v14146_v13  ;;  %7528 = vmatpush1.bf16.msra.mxu0 %v7527_v42  ;;  %v14147_v31 = vand.u32 4294901760, %v10700_v7  ;;  %v3069_v44 = vsub.f32 %v10705_v4, %v13153_v6  ;;  %3343 = vmatprep.mubr.f32.mxu0 %v10194_v43  ;;  %v14151_v42 = vld [vmem:[#allocation189_spill] sm:$0xff]  ;;  %v14164_v4 = vld [vmem:[#allocation27_spill] sm:$0xff] }
 0x1e3   :  { %v14149_v10 = vand.u32 4294901760, %v14148_v40  ;;  %1523 = vmatmul.mubr.f32.vlgmr.msra.gmra.mrb[0].mxu1 %v14151_v42  ;;  %7530 = vmatprep.subr.bf16.mxu0 %v7529_v35  ;;  %v7533_v60 = vpack.c.bf16 %v3022_v36, %v3010_v12  ;;  %v14153_v49 = vand.u32 4294901760, %v14152_v19  ;;  %v7535_v41 = vpack.c.bf16 %v3028_v2, %v3016_v37 }
 0x1e4   :  { %v3057_v54 = vsub.f32 %v10700_v7, %v14147_v31  ;;  %v3034_v46 = vand.u32 4294901760, %v3033_v45  ;;  %v3046_v15 = vand.u32 4294901760, %v3045_v21  ;;  %v14154_v6 = vand.u32 4294901760, %v10420_v55  ;;  %v14158_v45 = vld [vmem:[#allocation29_spill] sm:$0xff]  ;;  %v14159_v21 = vld [vmem:[#allocation32_spill] sm:$0xff] }
 0x1e5   :  { %v10993_v13 = vsub.f32 %v14148_v40, %v14149_v10  ;;  %v10999_v31 = vsub.f32 %v14152_v19, %v14153_v49  ;;  %v14155_v22 = vand.u32 4294901760, %v10422_v29  ;;  %v14156_v10 = vand.u32 4294901760, %v10710_v28 }
 0x1e6   :  { %v3063_v43 = vsub.f32 %v10420_v55, %v14154_v6  ;;  %v14157_v12 = vand.u32 4294901760, %v10715_v56  ;;  %7532 = vmatpush1.bf16.msra.mxu0 %v7531_v17  ;;  %v3040_v2 = vand.u32 4294901760, %v3039_v63  ;;  %v3052_v19 = vand.u32 4294901760, %v3051_v23  ;;  %v14160_v55 = vld [vmem:[#allocation65_spill] sm:$0xff]  ;;  %v14165_v17 = vld [vmem:[#allocation30_spill] sm:$0xff] }
 0x1e7   :  { %14150 = vst [vmem:[#allocation58_spill] sm:$0xff] %v10993_v13  ;;  %v3075_v40 = vsub.f32 %v10422_v29, %v14155_v22  ;;  %v3081_v35 = vsub.f32 %v10710_v28, %v14156_v10  ;;  %v3058_v6 = vand.u32 4294901760, %v3057_v54  ;;  %v3070_v42 = vand.u32 4294901760, %v3069_v44  ;;  %7534 = vmatprep.subr.bf16.mxu0 %v7533_v60  ;;  %v14162_v29 = vld [vmem:[#allocation41_spill] sm:$0xff]  ;;  %v14168_v60 = vld [vmem:[#allocation3_spill] sm:$0xff] }
 0x1e8   :  { %v3093_v36 = vsub.f32 %v10715_v56, %v14157_v12  ;;  %v14161_v27 = vand.u32 4294901760, %v14160_v55  ;;  %v7537_v10 = vpack.c.bf16 %v3046_v15, %v3034_v46  ;;  %v13176_v28 = vand.u32 4294901760, %v14162_v29  ;;  %v14173_v63 = vld [vmem:[#allocation5_spill] sm:$0xff] }
 0x1e9   :  { %v13175_v12 = vand.u32 4294901760, %v14163_v30  ;;  %v3064_v56 = vand.u32 4294901760, %v3063_v43  ;;  %v3076_v49 = vand.u32 4294901760, %v3075_v40  ;;  %v3082_v23 = vand.u32 4294901760, %v3081_v35  ;;  %v14171_v43 = vld [vmem:[#allocation4_spill] sm:$0xff] }
 0x1ea   :  { %v11018_v22 = vsub.f32 %v14160_v55, %v14161_v27  ;;  %v3094_v54 = vand.u32 4294901760, %v3093_v36  ;;  %v14166_v44 = vand.u32 4294901760, %v14158_v45  ;;  %v14167_v27 = vand.u32 4294901760, %v14159_v21  ;;  %7536 = vmatpush1.bf16.msra.mxu0 %v7535_v41  ;;  %v14176_v41 = vld [vmem:[#allocation7_spill] sm:$0xff] }
 0x1eb   :  { %v14169_v46 = vand.u32 4294901760, %v14168_v60  ;;  %v14172_v40 = vand.u32 4294901760, %v14171_v43  ;;  %v7539_v35 = vpack.c.bf16 %v3052_v19, %v3040_v2  ;;  %v7541_v36 = vpack.c.bf16 %v3070_v42, %v3058_v6  ;;  %7538 = vmatprep.subr.bf16.mxu0 %v7537_v10 }
 0x1ec   :  { %v3087_v7 = vsub.f32 %v14158_v45, %v14166_v44  ;;  %v3099_v55 = vsub.f32 %v14159_v21, %v14167_v27  ;;  %v3105_v44 = vsub.f32 %v14162_v29, %v13176_v28  ;;  %v3117_v27 = vsub.f32 %v14163_v30, %v13175_v12  ;;  %v14181_v29 = vld [vmem:[#allocation68_spill] sm:$0xff] }
 0x1ed   :  { %v11033_v15 = vsub.f32 %v14168_v60, %v14169_v46  ;;  %v11038_v37 = vsub.f32 %v14171_v43, %v14172_v40  ;;  %v14174_v45 = vand.u32 4294901760, %v14173_v63  ;;  %v14177_v2 = vand.u32 4294901760, %v14176_v41 }
 0x1ee   :  { %v14179_v6 = vand.u32 4294901760, %v14164_v4  ;;  %v14180_v10 = vand.u32 4294901760, %v14165_v17  ;;  %v7543_v12 = vpack.c.bf16 %v3076_v49, %v3064_v56  ;;  %v7545_v28 = vpack.c.bf16 %v3094_v54, %v3082_v23  ;;  %7540 = vmatpush1.bf16.msra.mxu0 %v7539_v35  ;;  %v14185_v35 = vld [vmem:[#allocation12_spill] sm:$0xff] }
 0x1ef   :  { %14170 = vst [vmem:[#allocation60_spill] sm:$0xff] %v11033_v15  ;;  %v11051_v43 = vsub.f32 %v14173_v63, %v14174_v45  ;;  %v11056_v19 = vsub.f32 %v14176_v41, %v14177_v2  ;;  %v3088_v46 = vand.u32 4294901760, %v3087_v7  ;;  %v3100_v60 = vand.u32 4294901760, %v3099_v55  ;;  %v14182_v2 = vld [vmem:[#allocation71_spill] sm:$0xff]  ;;  %7542 = vmatprep.subr.bf16.mxu0 %v7541_v36 }
 0x1f0   :  { %v3111_v42 = vsub.f32 %v14164_v4, %v14179_v6  ;;  %v3123_v40 = vsub.f32 %v14165_v17, %v14180_v10  ;;  %v13181_v45 = vand.u32 4294901760, %v10814_v0  ;;  %v13182_v63 = vand.u32 4294901760, %v10819_v48 }
 0x1f1   :  { %14175 = vst [vmem:[#allocation61_spill] sm:$0xff] %v11051_v43  ;;  %14178 = vst [vmem:[#allocation63_spill] sm:$0xff] %v11056_v19  ;;  %v13184_v30 = vand.u32 4294901760, %v14182_v2  ;;  %v3106_v21 = vand.u32 4294901760, %v3105_v44  ;;  %v3118_v6 = vand.u32 4294901760, %v3117_v27  ;;  %v14183_v4 = vand.u32 4294901760, %v10785_v32 }
 0x1f2   :  { %v14184_v56 = vand.u32 4294901760, %v10800_v26  ;;  %v3112_v49 = vand.u32 4294901760, %v3111_v42  ;;  %v3124_v23 = vand.u32 4294901760, %v3123_v40  ;;  %v14186_v41 = vand.u32 4294901760, %v14185_v35  ;;  %7544 = vmatpush1.bf16.msra.mxu0 %v7543_v12 }
 0x1f3   :  { %v3129_v10 = vsub.f32 %v10785_v32, %v14183_v4  ;;  %v7547_v44 = vpack.c.bf16 %v3100_v60, %v3088_v46  ;;  %v3135_v42 = vsub.f32 %v10814_v0, %v13181_v45  ;;  %v3147_v40 = vsub.f32 %v10819_v48, %v13182_v63  ;;  %v14189_v46 = vld [vmem:[#allocation13_spill] sm:$0xff]  ;;  %7546 = vmatprep.subr.bf16.mxu0 %v7545_v28 }
 0x1f4   :  { %v3141_v7 = vsub.f32 %v10800_v26, %v14184_v56  ;;  %v11079_v36 = vsub.f32 %v14185_v35, %v14186_v41  ;;  %v14188_v56 = vand.u32 4294901760, %v14181_v29  ;;  %v3165_v60 = vsub.f32 %v14182_v2, %v13184_v30 }
 0x1f5   :  { %v14190_v41 = vand.u32 4294901760, %v14189_v46  ;;  %v7549_v35 = vpack.c.bf16 %v3118_v6, %v3106_v21  ;;  %v3130_v45 = vand.u32 4294901760, %v3129_v10  ;;  %v14192_v27 = vand.u32 4294901760, %v10669_v59 }
 0x1f6   :  { %14187 = vst [vmem:[#allocation64_spill] sm:$0xff] %v11079_v36  ;;  %v3153_v55 = vsub.f32 %v14181_v29, %v14188_v56  ;;  %v3142_v4 = vand.u32 4294901760, %v3141_v7  ;;  %v7551_v54 = vpack.c.bf16 %v3124_v23, %v3112_v49  ;;  %v14194_v56 = vand.u32 4294901760, %v10903_v20  ;;  %7548 = vmatpush1.bf16.msra.mxu0 %v7547_v44 }
 0x1f7   :  { %v11098_v12 = vsub.f32 %v14189_v46, %v14190_v41  ;;  %v11103_v63 = vsub.f32 %v10669_v59, %v14192_v27  ;;  %v14195_v30 = vand.u32 4294901760, %v10920_v50  ;;  %v14196_v46 = vand.u32 4294901760, %v10951_v25  ;;  %7550 = vmatprep.subr.bf16.mxu0 %v7549_v35 }
 0x1f8   :  { %v3159_v29 = vsub.f32 %v10903_v20, %v14194_v56  ;;  %v14197_v21 = vand.u32 4294901760, %v10993_v13  ;;  %v3136_v7 = vand.u32 4294901760, %v3135_v42  ;;  %v3148_v49 = vand.u32 4294901760, %v3147_v40 }
 0x1f9   :  { %14191 = vst [vmem:[#allocation66_spill] sm:$0xff] %v11098_v12  ;;  %14193 = vst [vmem:[#allocation67_spill] sm:$0xff] %v11103_v63  ;;  %v3171_v2 = vsub.f32 %v10920_v50, %v14195_v30  ;;  %v3177_v28 = vsub.f32 %v10951_v25, %v14196_v46  ;;  %v3154_v23 = vand.u32 4294901760, %v3153_v55  ;;  %v3166_v27 = vand.u32 4294901760, %v3165_v60  ;;  %v14200_v46 = vld [vmem:[#allocation101_spill] sm:$0xff]  ;;  %v14201_v50 = vld [vmem:[#allocation191_spill] sm:$0xff] }
 0x1fa   :  { %v3189_v6 = vsub.f32 %v10993_v13, %v14197_v21  ;;  %v14198_v41 = vand.u32 4294901760, %v10674_v57  ;;  %v7553_v56 = vpack.c.bf16 %v3142_v4, %v3130_v45  ;;  %v13193_v25 = vand.u32 4294901760, %v14200_v46  ;;  %7552 = vmatpush1.bf16.msra.mxu0 %v7551_v54  ;;  %v14211_v54 = vld [vmem:[#allocation25_spill] sm:$0xff] }
 0x1fb   :  { %v13192_v21 = vand.u32 4294901760, %v14201_v50  ;;  %v3160_v13 = vand.u32 4294901760, %v3159_v29  ;;  %v3172_v59 = vand.u32 4294901760, %v3171_v2  ;;  %v13196_v10 = vand.u32 4294901760, %v11033_v15 }
 0x1fc   :  { %v11122_v30 = vsub.f32 %v10674_v57, %v14198_v41  ;;  %v3178_v42 = vand.u32 4294901760, %v3177_v28  ;;  %v3190_v55 = vand.u32 4294901760, %v3189_v6  ;;  %v14202_v40 = vand.u32 4294901760, %v10999_v31  ;;  %7554 = vmatprep.subr.bf16.mxu0 %v7553_v56 }
 0x1fd   :  { %v14203_v57 = vand.u32 4294901760, %v11018_v22  ;;  %v14204_v4 = vand.u32 4294901760, %v10690_v52  ;;  %v14206_v29 = vand.u32 4294901760, %v10695_v24  ;;  %v7555_v28 = vpack.c.bf16 %v3148_v49, %v3136_v7 }
 0x1fe   :  { %14199 = vst [vmem:[#allocation69_spill] sm:$0xff] %v11122_v30  ;;  %v3183_v60 = vsub.f32 %v10999_v31, %v14202_v40  ;;  %v7557_v6 = vpack.c.bf16 %v3166_v27, %v3154_v23  ;;  %v3201_v41 = vsub.f32 %v14200_v46, %v13193_v25  ;;  %v3213_v40 = vsub.f32 %v14201_v50, %v13192_v21 }
 0x1ff   :  { %v3195_v45 = vsub.f32 %v11018_v22, %v14203_v57  ;;  %v11137_v35 = vsub.f32 %v10690_v52, %v14204_v4  ;;  %v11142_v2 = vsub.f32 %v10695_v24, %v14206_v29  ;;  %v14208_v4 = vld [vmem:[#allocation23_spill] sm:$0xff]  ;;  %v14212_v7 = vand.u32 4294901760, %v14211_v54  ;;  %7556 = vmatpush1.bf16.msra.mxu0 %v7555_v28  ;;  %v14215_v52 = vld [vmem:[#allocation33_spill] sm:$0xff] }
 0x200   :  { %v14209_v44 = vand.u32 4294901760, %v14208_v4  ;;  %v3207_v23 = vsub.f32 %v11033_v15, %v13196_v10  ;;  %v14214_v27 = vand.u32 4294901760, %v11038_v37  ;;  %v7559_v29 = vpack.c.bf16 %v3172_v59, %v3160_v13  ;;  %7558 = vmatprep.subr.bf16.mxu0 %v7557_v6 }
 0x201   :  { %14205 = vst [vmem:[#allocation70_spill] sm:$0xff] %v11137_v35  ;;  %14207 = vst [vmem:[#allocation72_spill] sm:$0xff] %v11142_v2  ;;  %v11160_v49 = vsub.f32 %v14211_v54, %v14212_v7  ;;  %v7561_v21 = vpack.c.bf16 %v3190_v55, %v3178_v42  ;;  %v3184_v25 = vand.u32 4294901760, %v3183_v60  ;;  %v3196_v57 = vand.u32 4294901760, %v3195_v45  ;;  %v14216_v7 = vld [vmem:[#allocation34_spill] sm:$0xff] }
 0x202   :  { %v11155_v24 = vsub.f32 %v14208_v4, %v14209_v44  ;;  %v3219_v56 = vsub.f32 %v11038_v37, %v14214_v27  ;;  %v13199_v44 = vand.u32 4294901760, %v11079_v36  ;;  %v13200_v4 = vand.u32 4294901760, %v11098_v12 }
 0x203   :  { %14213 = vst [vmem:[#allocation75_spill] sm:$0xff] %v11160_v49  ;;  %v13201_v54 = vand.u32 4294901760, %v14215_v52  ;;  %v13202_v46 = vand.u32 4294901760, %v14216_v7  ;;  %v3202_v50 = vand.u32 4294901760, %v3201_v41  ;;  %v3214_v10 = vand.u32 4294901760, %v3213_v40  ;;  %7560 = vmatpush1.bf16.msra.mxu0 %v7559_v29 }
 0x204   :  { %14210 = vst [vmem:[#allocation73_spill] sm:$0xff] %v11155_v24  ;;  %v14217_v15 = vand.u32 4294901760, %v11051_v43  ;;  %v14218_v13 = vand.u32 4294901760, %v11056_v19  ;;  %v3208_v42 = vand.u32 4294901760, %v3207_v23  ;;  %v3220_v55 = vand.u32 4294901760, %v3219_v56  ;;  %7562 = vmatprep.subr.bf16.mxu0 %v7561_v21 }
 0x205   :  { %v13204_v60 = vand.u32 4294901760, %v11103_v63  ;;  %v13203_v45 = vand.u32 4294901760, %v11122_v30  ;;  %v14219_v28 = vand.u32 4294901760, %v10771_v14  ;;  %v7563_v41 = vpack.c.bf16 %v3196_v57, %v3184_v25 }
 0x206   :  { %v3225_v27 = vsub.f32 %v11051_v43, %v14217_v15  ;;  %v3237_v59 = vsub.f32 %v11056_v19, %v14218_v13  ;;  %v3231_v23 = vsub.f32 %v11079_v36, %v13199_v44  ;;  %v3243_v56 = vsub.f32 %v11098_v12, %v13200_v4 }
 0x207   :  { %v11183_v6 = vsub.f32 %v10771_v14, %v14219_v28  ;;  %v3249_v13 = vsub.f32 %v14215_v52, %v13201_v54  ;;  %v3261_v14 = vsub.f32 %v14216_v7, %v13202_v46  ;;  %v14221_v25 = vand.u32 4294901760, %v10776_v33  ;;  %7564 = vmatpush1.bf16.msra.mxu0 %v7563_v41 }
 0x208   :  { %v7565_v29 = vpack.c.bf16 %v3214_v10, %v3202_v50  ;;  %v3226_v28 = vand.u32 4294901760, %v3225_v27  ;;  %v3238_v44 = vand.u32 4294901760, %v3237_v59  ;;  %v14223_v15 = vand.u32 4294901760, %v10825_v39 }
 0x209   :  { %14220 = vst [vmem:[#allocation76_spill] sm:$0xff] %v11183_v6  ;;  %v11202_v57 = vsub.f32 %v10776_v33, %v14221_v25  ;;  %v7567_v40 = vpack.c.bf16 %v3220_v55, %v3208_v42  ;;  %v3255_v54 = vsub.f32 %v11103_v63, %v13204_v60  ;;  %v3267_v46 = vsub.f32 %v11122_v30, %v13203_v45 }
 0x20a   :  { %v11207_v4 = vsub.f32 %v10825_v39, %v14223_v15  ;;  %v14225_v33 = vand.u32 4294901760, %v11137_v35  ;;  %v14226_v10 = vand.u32 4294901760, %v11142_v2  ;;  %v3232_v59 = vand.u32 4294901760, %v3231_v23  ;;  %7566 = vmatprep.subr.bf16.mxu0 %v7565_v29 }
 0x20b   :  { %14222 = vst [vmem:[#allocation78_spill] sm:$0xff] %v11202_v57  ;;  %v3244_v42 = vand.u32 4294901760, %v3243_v56  ;;  %v3250_v55 = vand.u32 4294901760, %v3249_v13  ;;  %v3262_v15 = vand.u32 4294901760, %v3261_v14  ;;  %v14227_v25 = vand.u32 4294901760, %v10830_v11  ;;  %7568 = vmatpush1.bf16.msra.mxu0 %v7567_v40 }
 0x20c   :  { %14224 = vst [vmem:[#allocation79_spill] sm:$0xff] %v11207_v4  ;;  %v3273_v50 = vsub.f32 %v11137_v35, %v14225_v33  ;;  %v3285_v21 = vsub.f32 %v11142_v2, %v14226_v10  ;;  %v7569_v33 = vpack.c.bf16 %v3238_v44, %v3226_v28  ;;  %v13205_v60 = vand.u32 4294901760, %v10860_v38 }
 0x20d   :  { %v11226_v45 = vsub.f32 %v10830_v11, %v14227_v25  ;;  %v14229_v39 = vand.u32 4294901760, %v10846_v47  ;;  %v14231_v41 = vand.u32 4294901760, %v10851_v16  ;;  %v3256_v56 = vand.u32 4294901760, %v3255_v54 }
 0x20e   :  { %v3268_v13 = vand.u32 4294901760, %v3267_v46  ;;  %v3274_v11 = vand.u32 4294901760, %v3273_v50  ;;  %v3286_v14 = vand.u32 4294901760, %v3285_v21  ;;  %v14233_v44 = vand.u32 4294901760, %v11155_v24  ;;  %7570 = vmatprep.subr.bf16.mxu0 %v7569_v33 }
 0x20f   :  { %14228 = vst [vmem:[#allocation81_spill] sm:$0xff] %v11226_v45  ;;  %v11233_v27 = vsub.f32 %v10846_v47, %v14229_v39  ;;  %v11238_v23 = vsub.f32 %v10851_v16, %v14231_v41  ;;  %v14234_v28 = vand.u32 4294901760, %v11160_v49  ;;  %v7571_v47 = vpack.c.bf16 %v3244_v42, %v3232_v59 }
 0x210   :  { %v3279_v29 = vsub.f32 %v11155_v24, %v14233_v44  ;;  %v7573_v39 = vpack.c.bf16 %v3262_v15, %v3250_v55  ;;  %v13211_v10 = vand.u32 4294901760, %v11183_v6  ;;  %v13207_v16 = vand.u32 4294901760, %v11202_v57 }
 0x211   :  { %14230 = vst [vmem:[#allocation82_spill] sm:$0xff] %v11233_v27  ;;  %14232 = vst [vmem:[#allocation164_spill] sm:$0xff] %v11238_v23  ;;  %v3291_v25 = vsub.f32 %v11160_v49, %v14234_v28  ;;  %v3297_v46 = vsub.f32 %v10860_v38, %v13205_v60  ;;  %v14235_v54 = vand.u32 4294901760, %v10868_v53  ;;  %v13206_v21 = vand.u32 4294901760, %v11207_v4  ;;  %7572 = vmatpush1.bf16.msra.mxu0 %v7571_v47 }
 0x212   :  { %v13208_v41 = vand.u32 4294901760, %v11226_v45  ;;  %v7575_v40 = vpack.c.bf16 %v3268_v13, %v3256_v56  ;;  %v7577_v59 = vpack.c.bf16 %v3286_v14, %v3274_v11  ;;  %v3280_v42 = vand.u32 4294901760, %v3279_v29  ;;  %7574 = vmatprep.subr.bf16.mxu0 %v7573_v39 }
 0x213   :  { %v3309_v50 = vsub.f32 %v10868_v53, %v14235_v54  ;;  %v3292_v55 = vand.u32 4294901760, %v3291_v25  ;;  %v3303_v15 = vsub.f32 %v11183_v6, %v13211_v10  ;;  %v3315_v33 = vsub.f32 %v11202_v57, %v13207_v16  ;;  %v14262_v10 = vld [vmem:[#allocation41_spill] sm:$0xff] }
 0x214   :  { %v13210_v44 = vand.u32 4294901760, %v11233_v27  ;;  %v13209_v28 = vand.u32 4294901760, %v11238_v23  ;;  %v3298_v54 = vand.u32 4294901760, %v3297_v46  ;;  %v3321_v56 = vsub.f32 %v11207_v4, %v13206_v21 }
 0x215   :  { %v3310_v60 = vand.u32 4294901760, %v3309_v50  ;;  %v3333_v13 = vsub.f32 %v11226_v45, %v13208_v41  ;;  %v7579_v11 = vpack.c.bf16 %v3292_v55, %v3280_v42  ;;  %7576 = vmatpush1.bf16.msra.mxu0 %v7575_v40  ;;  %v3304_v14 = vand.u32 4294901760, %v3303_v15  ;;  %v14236_v15 = vld [vmem:[#allocation87_spill] sm:$0xff] }
 0x216   :  { %v3316_v29 = vand.u32 4294901760, %v3315_v33  ;;  %v3327_v25 = vsub.f32 %v11233_v27, %v13210_v44  ;;  %v3339_v47 = vsub.f32 %v11238_v23, %v13209_v28  ;;  %7578 = vmatprep.subr.bf16.mxu0 %v7577_v59  ;;  %v3322_v46 = vand.u32 4294901760, %v3321_v56  ;;  %v14239_v59 = vld [vmem:[#allocation107_spill] sm:$0xff]  ;;  %v14261_v44 = vld [vmem:[#allocation44_spill] sm:$0xff] }
 0x217   :  { %v7581_v39 = vpack.c.bf16 %v3310_v60, %v3298_v54  ;;  %v3334_v50 = vand.u32 4294901760, %v3333_v13  ;;  %v7591_v55 = vpack.c.bf16 %v10684_v18, %v10679_v61  ;;  %v14237_v33 = vpack.c.bf16 %v10272_v51, %v14236_v15  ;;  %v14238_v60 = vld [vmem:[#allocation36_spill] sm:$0xff]  ;;  %v14240_v54 = vld [vmem:[#allocation149_spill] sm:$0xff] }
 0x218   :  { %v7583_v21 = vpack.c.bf16 %v3316_v29, %v3304_v14  ;;  %v3328_v16 = vand.u32 4294901760, %v3327_v25  ;;  %v3340_v41 = vand.u32 4294901760, %v3339_v47  ;;  %v14241_v56 = vpack.c.bf16 %v10300_v8, %v14240_v54  ;;  %v14247_v14 = vld [vmem:[#allocation18_spill] sm:$0xff]  ;;  %v14248_v29 = vld [vmem:[#allocation19_spill] sm:$0xff] }
 0x219   :  { %7580 = vmatpush1.bf16.msra.mxu0 %v7579_v11  ;;  %v7585_v40 = vpack.c.bf16 %v3334_v50, %v3322_v46  ;;  %v14245_v13 = vpack.c.bf16 %v10350_v34, %v10348_v58  ;;  %v14246_v11 = vpack.c.bf16 %v10373_v9, %v10371_v62  ;;  %v7605_v25 = vpack.c.bf16 %v14248_v29, %v14247_v14  ;;  %v14249_v47 = vld [vmem:[#allocation103_spill] sm:$0xff]  ;;  %v14252_v50 = vld [vmem:[#allocation20_spill] sm:$0xff] }
 0x21a   :  { %7582 = vmatprep.subr.bf16.mxu0 %v7581_v39  ;;  %v7587_v42 = vpack.c.bf16 %v3340_v41, %v3328_v16  ;;  %v14242_v16 = vld [vmem:[#allocation104_spill] sm:$0xff]  ;;  %v14244_v41 = vpack.c.bf16 %v10334_v5, %v10332_v1  ;;  %v14250_v39 = vld [vmem:[#allocation190_spill] sm:$0xff] }
 0x21b   :  { %v14251_v46 = vpack.c.bf16 %v14249_v47, %v14250_v39 }
 0x21d   :  { %7584 = vmatpush1.bf16.msra.mxu0 %v7583_v21  ;;  %v14243_v21 = vpack.c.bf16 %v10312_v3, %v14242_v16 }
 0x21e   :  { %7586 = vmatprep.subr.bf16.mxu0 %v7585_v40  ;;  %v14253_v40 = vld [vmem:[#allocation22_spill] sm:$0xff] }
 0x221   :  { %7588 = vmatpush1.bf16.msra.mxu0 %v7587_v42  ;;  %v7609_v42 = vpack.c.bf16 %v14253_v40, %v14252_v50 }
 0x222   :  { %7590 = vmatprep.subr.bf16.mxu0 %v14237_v33  ;;  %v14255_v33 = vld [vmem:[#allocation17_spill] sm:$0xff] }
 0x224   :  { %3345 = vmatmul.mubr.f32.vlgmr.msra.gmra.mrb[0].mxu0 %v14238_v60  ;;  %v14263_v60 = vpack.c.bf16 %v14261_v44, %v14262_v10 }
 0x225   :  { %7592 = vmatpush1.bf16.msra.mxu0 %v7591_v55  ;;  %3545 = vmatprep.mubr.f32.mxu0 %v14239_v59  ;;  %v14254_v55 = vld [vmem:[#allocation21_spill] sm:$0xff] }
 0x226   :  { %7594 = vmatprep.subr.bf16.mxu0 %v14241_v56  ;;  %v14256_v56 = vpack.c.bf16 %v14254_v55, %v14255_v33 }
 0x229   :  { %7596 = vmatpush1.bf16.msra.mxu0 %v14243_v21  ;;  %v14257_v21 = vld [vmem:[#allocation32_spill] sm:$0xff] }
 0x22a   :  { %7598 = vmatprep.subr.bf16.mxu0 %v14244_v41  ;;  %v14258_v41 = vld [vmem:[#allocation29_spill] sm:$0xff] }
 0x22d   :  { %7600 = vmatpush1.bf16.msra.mxu0 %v14245_v13  ;;  %v14259_v13 = vpack.c.bf16 %v14257_v21, %v14258_v41  ;;  %v14266_v21 = vld [vmem:[#allocation68_spill] sm:$0xff] }
 0x22e   :  { %7602 = vmatprep.subr.bf16.mxu0 %v14246_v11  ;;  %v14260_v11 = vld [vmem:[#allocation27_spill] sm:$0xff] }
 0x22f   :  { %v7615_v28 = vpack.c.bf16 %v14165_v17, %v14260_v11  ;;  %v14268_v17 = vld [vmem:[#allocation57_spill] sm:$0xff]  ;;  %v14269_v11 = vld [vmem:[#allocation58_spill] sm:$0xff] }
 0x230   :  { %v7625_v44 = vpack.c.bf16 %v14269_v11, %v14268_v17 }
 0x231   :  { %7604 = vmatpush1.bf16.msra.mxu0 %v14251_v46  ;;  %v7619_v46 = vpack.c.bf16 %v10819_v48, %v10814_v0  ;;  %v14272_v48 = vld [vmem:[#allocation101_spill] sm:$0xff] }
 0x232   :  { %7606 = vmatprep.subr.bf16.mxu0 %v7605_v25  ;;  %v7617_v25 = vpack.c.bf16 %v10800_v26, %v10785_v32 }
 0x235   :  { %7608 = vmatpush1.bf16.msra.mxu0 %v14256_v56 }
 0x236   :  { %7610 = vmatprep.subr.bf16.mxu0 %v7609_v42  ;;  %v14264_v42 = vld [vmem:[#allocation54_spill] sm:$0xff] }
 0x237   :  { %v7623_v56 = vpack.c.bf16 %v14264_v42, %v10903_v20  ;;  %v7633_v42 = vpack.c.bf16 %v11056_v19, %v11051_v43  ;;  %v14309_v19 = vld [vmem:[#allocation51_spill] sm:$0xff]  ;;  %v14311_v43 = vand.u32 4294901760, %v14236_v15  ;;  %v14324_v15 = vand.u32 4294901760, %v10348_v58 }
 0x238   :  { %v14330_v58 = vand.u32 4294901760, %v14247_v14 }
 0x239   :  { %7612 = vmatpush1.bf16.msra.mxu0 %v14259_v13  ;;  %v14265_v13 = vld [vmem:[#allocation71_spill] sm:$0xff] }
 0x23a   :  { %7614 = vmatprep.subr.bf16.mxu0 %v14263_v60  ;;  %v14267_v41 = vpack.c.bf16 %v14265_v13, %v14266_v21  ;;  %v7627_v60 = vpack.c.bf16 %v11018_v22, %v10999_v31 }
 0x23d   :  { %7616 = vmatpush1.bf16.msra.mxu0 %v7615_v28  ;;  %v14270_v28 = vld [vmem:[#allocation60_spill] sm:$0xff] }
 0x23e   :  { %7618 = vmatprep.subr.bf16.mxu0 %v7617_v25  ;;  %v7631_v25 = vpack.c.bf16 %v11038_v37, %v14270_v28 }
 0x241   :  { %7620 = vmatpush1.bf16.msra.mxu0 %v7619_v46  ;;  %v14271_v46 = vld [vmem:[#allocation191_spill] sm:$0xff] }
 0x242   :  { %7622 = vmatprep.subr.bf16.mxu0 %v14267_v41  ;;  %v14273_v0 = vpack.c.bf16 %v14271_v46, %v14272_v48  ;;  %v7635_v41 = vpack.c.bf16 %v11098_v12, %v11079_v36 }
 0x245   :  { %7624 = vmatpush1.bf16.msra.mxu0 %v7623_v56  ;;  %v14274_v56 = vpack.c.bf16 %v14216_v7, %v14215_v52  ;;  %v14306_v7 = vld [vmem:[#allocation39_spill] sm:$0xff]  ;;  %v14308_v52 = vld [vmem:[#allocation45_spill] sm:$0xff] }
 0x246   :  { %7626 = vmatprep.subr.bf16.mxu0 %v7625_v44  ;;  %v7639_v44 = vpack.c.bf16 %v11122_v30, %v11103_v63  ;;  %v14305_v30 = vld [vmem:[#allocation37_spill] sm:$0xff] }
 0x249   :  { %7628 = vmatpush1.bf16.msra.mxu0 %v7627_v60  ;;  %v7641_v60 = vpack.c.bf16 %v11142_v2, %v11137_v35 }
 0x24a   :  { %7630 = vmatprep.subr.bf16.mxu0 %v14273_v0  ;;  %v7643_v0 = vpack.c.bf16 %v11160_v49, %v11155_v24 }
 0x24d   :  { %7632 = vmatpush1.bf16.msra.mxu0 %v7631_v25  ;;  %v14275_v25 = vpack.c.bf16 %v10868_v53, %v10860_v38 }
 0x24e   :  { %7634 = vmatprep.subr.bf16.mxu0 %v7633_v42  ;;  %v7647_v42 = vpack.c.bf16 %v11202_v57, %v11183_v6  ;;  %v14279_v57 = vand.u32 4294901760, %v14239_v59  ;;  %v14280_v6 = vld [vmem:[#allocation2_spill] sm:$0xff]  ;;  %v14289_v59 = vld [vmem:[#allocation35_spill] sm:$0xff] }
 0x251   :  { %7636 = vmatpush1.bf16.msra.mxu0 %v7635_v41  ;;  %v7649_v41 = vpack.c.bf16 %v11226_v45, %v11207_v4  ;;  %v14282_v45 = vld [vmem:[#allocation6_spill] sm:$0xff] }
 0x252   :  { %7638 = vmatprep.subr.bf16.mxu0 %v14274_v56  ;;  %v7651_v56 = vpack.c.bf16 %v11238_v23, %v11233_v27  ;;  %v14284_v23 = vld [vmem:[#allocation8_spill] sm:$0xff] }
 0x255   :  { %7640 = vmatpush1.bf16.msra.mxu0 %v7639_v44  ;;  %v14276_v44 = vld [vmem:[#allocation167_spill] sm:$0xff] }
 0x256   :  { %7642 = vmatprep.subr.bf16.mxu0 %v7641_v60  ;;  %v14277_v60 = vld [vmem:[#allocation46_spill] sm:$0xff] }
 0x259   :  { %7644 = vmatpush1.bf16.msra.mxu0 %v7643_v0  ;;  %v14278_v0 = vld [vmem:[#allocation88_spill] sm:$0xff] }
 0x25a   :  { %7646 = vmatprep.subr.bf16.mxu0 %v14275_v25  ;;  %v14281_v25 = vld [vmem:[#allocation161_spill] sm:$0xff] }
 0x25d   :  { %7648 = vmatpush1.bf16.msra.mxu0 %v7647_v42  ;;  %v14283_v42 = vld [vmem:[#allocation170_spill] sm:$0xff] }
 0x25e   :  { %7650 = vmatprep.subr.bf16.mxu0 %v7649_v41  ;;  %v14285_v41 = vld [vmem:[#allocation11_spill] sm:$0xff] }
 0x261   :  { %7652 = vmatpush1.bf16.msra.mxu0 %v7651_v56  ;;  %v14286_v56 = vld [vmem:[#allocation15_spill] sm:$0xff] }
 0x262   :  { %7654 = vmatprep.subr.bf16.mxu0 %v14276_v44  ;;  %v14287_v44 = vld [vmem:[#allocation24_spill] sm:$0xff] }
 0x264   :  { %3548 = vmatmul.mubr.f32.vlgmr.msra.gmra.mrb[0].mxu0 %v14277_v60 }
 0x265   :  { %7656 = vmatpush1.bf16.msra.mxu0 %v14278_v0  ;;  %3685 = vmatprep.mubr.f32.mxu0 %v14279_v57  ;;  %v14288_v0 = vld [vmem:[#allocation26_spill] sm:$0xff] }
 0x266   :  { %7658 = vmatprep.subr.bf16.mxu0 %v14280_v6  ;;  %v14290_v57 = vld [vmem:[#allocation38_spill] sm:$0xff]  ;;  %v14291_v6 = vld [vmem:[#allocation47_spill] sm:$0xff] }
 0x269   :  { %7660 = vmatpush1.bf16.msra.mxu0 %v14281_v25  ;;  %v14292_v25 = vld [vmem:[#allocation50_spill] sm:$0xff] }
 0x26a   :  { %7662 = vmatprep.subr.bf16.mxu0 %v14282_v45  ;;  %v14293_v45 = vld [vmem:[#allocation56_spill] sm:$0xff] }
 0x26d   :  { %7664 = vmatpush1.bf16.msra.mxu0 %v14283_v42  ;;  %v14294_v42 = vld [vmem:[#allocation59_spill] sm:$0xff] }
 0x26e   :  { %7666 = vmatprep.subr.bf16.mxu0 %v14284_v23  ;;  %v14295_v23 = vld [vmem:[#allocation74_spill] sm:$0xff] }
 0x271   :  { %7668 = vmatpush1.bf16.msra.mxu0 %v14285_v41  ;;  %v14296_v41 = vld [vmem:[#allocation77_spill] sm:$0xff] }
 0x272   :  { %7670 = vmatprep.subr.bf16.mxu0 %v14286_v56  ;;  %v14297_v56 = vld [vmem:[#allocation9_spill] sm:$0xff] }
 0x275   :  { %7672 = vmatpush1.bf16.msra.mxu0 %v14287_v44  ;;  %v14298_v44 = vld [vmem:[#allocation10_spill] sm:$0xff] }
 0x276   :  { %7674 = vmatprep.subr.bf16.mxu0 %v14288_v0  ;;  %v14299_v0 = vld [vmem:[#allocation14_spill] sm:$0xff] }
 0x279   :  { %7676 = vmatpush1.bf16.msra.mxu0 %v14289_v59  ;;  %v14302_v59 = vld [vmem:[#allocation31_spill] sm:$0xff] }
 0x27a   :  { %7678 = vmatprep.subr.bf16.mxu0 %v14290_v57 }
 0x27d   :  { %7680 = vmatpush1.bf16.msra.mxu0 %v14291_v6  ;;  %v32_v6 = vld [vmem:[%s12543_s0 + $0x30] sm:$0xff] }
 0x27e   :  { %7682 = vmatprep.subr.bf16.mxu0 %v14292_v25  ;;  %v14300_v25 = vld [vmem:[#allocation16_spill] sm:$0xff] }
 0x281   :  { %7684 = vmatpush1.bf16.msra.mxu0 %v14293_v45  ;;  %v243_v45 = vsel %vm241_vm0, %v32_v6, 0  ;;  %v227_v6 = vld [vmem:[%s12542_s1 + $0x610] sm:$0xff] }
 0x282   :  { %7686 = vmatprep.subr.bf16.mxu0 %v14294_v42  ;;  %v11385_v57 = vand.u32 4294901760, %v243_v45  ;;  %v225_v42 = vld [vmem:[%s12542_s1 + $0x600] sm:$0xff]  ;;  %v4103_v4 = vand.u32 4294901760, %v227_v6 }
 0x283   :  { %v4099_v27 = vand.u32 4294901760, %v225_v42 }
 0x284   :  { %v4196_v35 = vsub.f32 %v227_v6, %v4103_v4 }
 0x285   :  { %7688 = vmatpush1.bf16.msra.mxu0 %v14295_v23  ;;  %v11407_v24 = vpack.c.bf16 %v4103_v4, %v4099_v27  ;;  %v4184_v2 = vsub.f32 %v225_v42, %v4099_v27 }
 0x286   :  { %7690 = vmatprep.subr.bf16.mxu0 %v14296_v41  ;;  %v226_v41 = vld [vmem:[%s12542_s1 + $0x608] sm:$0xff] }
 0x287   :  { %14304 = vst [vmem:[#allocation84_spill] sm:$0xff] %v11407_v24 }
 0x289   :  { %7692 = vmatpush1.bf16.msra.mxu0 %v14297_v56  ;;  %v14301_v56 = vld [vmem:[#allocation28_spill] sm:$0xff] }
 0x28a   :  { %7694 = vmatprep.subr.bf16.mxu0 %v14298_v44  ;;  %v228_v44 = vld [vmem:[%s12542_s1 + $0x618] sm:$0xff] }
 0x28b   :  { %v4101_v23 = vand.u32 4294901760, %v228_v44 }
 0x28d   :  { %7696 = vmatpush1.bf16.msra.mxu0 %v14299_v0  ;;  %v4097_v0 = vand.u32 4294901760, %v226_v41  ;;  %v4190_v38 = vsub.f32 %v228_v44, %v4101_v23  ;;  %v4197_v44 = vand.u32 4294901760, %v4196_v35 }
 0x28e   :  { %7698 = vmatprep.subr.bf16.mxu0 %v14300_v25  ;;  %v11401_v25 = vsub.f32 %v243_v45, %v11385_v57 }
 0x28f   :  { %v11404_v53 = vpack.c.bf16 %v4101_v23, %v4097_v0  ;;  %v4191_v63 = vand.u32 4294901760, %v4190_v38  ;;  %v4185_v23 = vand.u32 4294901760, %v4184_v2  ;;  %v4198_v6 = vsub.f32 %v4196_v35, %v4197_v44 }
 0x290   :  { %v13232_v49 = vand.u32 4294901760, %v11401_v25 }
 0x291   :  { %7700 = vmatpush1.bf16.msra.mxu0 %v14301_v56  ;;  %14303 = vst [vmem:[#allocation166_spill] sm:$0xff] %v11404_v53  ;;  %v4178_v56 = vsub.f32 %v226_v41, %v4097_v0  ;;  %7846 = vmatprep.subr.bf16.mxu1 %v11404_v53  ;;  %v13240_v0 = vmov 0.0   ;;  %v4192_v42 = vsub.f32 %v4190_v38, %v4191_v63  ;;  %v14307_v53 = vld [vmem:[#allocation43_spill] sm:$0xff]  ;;  %v4199_v12 = vand.u32 4294901760, %v4198_v6 }
 0x292   :  { %7702 = vmatprep.subr.bf16.mxu0 %v14302_v59  ;;  %v4169_v45 = vsub.f32 %v11401_v25, %v13232_v49  ;;  %7848 = vmatpush1.bf16.msra.mxu1 %v11407_v24  ;;  %v4186_v41 = vsub.f32 %v4184_v2, %v4185_v23 }
 0x293   :  { %v4179_v59 = vand.u32 4294901760, %v4178_v56  ;;  %4165 = vmatprep.mubr.f32.mxu1 %v13240_v0 }
 0x294   :  { %v4170_v4 = vand.u32 4294901760, %v4169_v45  ;;  %v14310_v45 = vld [vmem:[#allocation52_spill] sm:$0xff] }
 0x295   :  { %7704 = vmatpush1.bf16.msra.mxu0 %v14305_v30  ;;  %v4180_v27 = vsub.f32 %v4178_v56, %v4179_v59  ;;  %v4193_v30 = vand.u32 4294901760, %v4192_v42  ;;  %v14314_v42 = vand.u32 4294901760, %v10679_v61  ;;  %v14319_v61 = vand.u32 4294901760, %v14242_v16 }
 0x296   :  { %7706 = vmatprep.subr.bf16.mxu0 %v14306_v7  ;;  %4171 = vmatmul.mubr.f32.vlgmr.msra.gmra.mrb[2].mxu1 %v4170_v4  ;;  %v4187_v7 = vand.u32 4294901760, %v4186_v41  ;;  %v14315_v41 = vand.u32 4294901760, %v10684_v18  ;;  %v14320_v18 = vand.u32 4294901760, %v10312_v3  ;;  %v14326_v3 = vand.u32 4294901760, %v10371_v62 }
 0x297   :  { %v4181_v49 = vand.u32 4294901760, %v4180_v27  ;;  %4261 = vmatprep.mubr.f32.mxu1 %v13240_v0  ;;  %v14313_v27 = vld [vmem:[#allocation55_spill] sm:$0xff]  ;;  %v14333_v62 = vand.u32 4294901760, %v14254_v55 }
 0x298   :  { %v7851_v36 = vpack.c.bf16 %v4199_v12, %v4187_v7  ;;  %v7719_v6 = vpack.c.bf16 %v14315_v41, %v14314_v42  ;;  %v7853_v12 = vpack.c.bf16 %v4190_v38, %v4178_v56  ;;  %v14321_v38 = vld [vmem:[#allocation100_spill] sm:$0xff] }
 0x299   :  { %7708 = vmatpush1.bf16.msra.mxu0 %v14307_v53  ;;  %v7849_v24 = vpack.c.bf16 %v4193_v30, %v4181_v49  ;;  %v14312_v53 = vand.u32 4294901760, %v10272_v51  ;;  %v7855_v30 = vpack.c.bf16 %v4196_v35, %v4184_v2  ;;  %v14317_v49 = vand.u32 4294901760, %v10300_v8  ;;  %v14338_v41 = vld [vmem:[#allocation32_spill] sm:$0xff] }
 0x29a   :  { %7710 = vmatprep.subr.bf16.mxu0 %v14308_v52  ;;  %v14318_v51 = vand.u32 4294901760, %v14277_v60  ;;  %v14323_v8 = vand.u32 4294901760, %v10334_v5  ;;  %v11448_v35 = vpack.c.bf16 %v4191_v63, %v4179_v59  ;;  %v11450_v2 = vpack.c.bf16 %v4197_v44, %v4185_v23 }
 0x29b   :  { %7850 = vmatprep.subr.bf16.mxu1 %v7849_v24  ;;  %v7717_v4 = vpack.c.bf16 %v14312_v53, %v14311_v43  ;;  %v14316_v24 = vand.u32 4294901760, %v14240_v54  ;;  %v7723_v53 = vpack.c.bf16 %v14320_v18, %v14319_v61  ;;  %v14322_v43 = vand.u32 4294901760, %v10332_v1 }
 0x29c   :  { %7852 = vmatpush1.bf16.msra.mxu1 %v7851_v36  ;;  %v14325_v54 = vand.u32 4294901760, %v10350_v34  ;;  %v14327_v1 = vand.u32 4294901760, %v10373_v9  ;;  %v14328_v5 = vand.u32 4294901760, %v14250_v39  ;;  %v14329_v63 = vand.u32 4294901760, %v14249_v47  ;;  %v14336_v47 = vld [vmem:[#allocation29_spill] sm:$0xff] }
 0x29d   :  { %7712 = vmatpush1.bf16.msra.mxu0 %v14309_v19  ;;  %v7721_v7 = vpack.c.bf16 %v14317_v49, %v14316_v24  ;;  %7854 = vmatprep.subr.bf16.mxu1 %v7853_v12  ;;  %v7725_v36 = vpack.c.bf16 %v14323_v8, %v14322_v43  ;;  %v14331_v34 = vand.u32 4294901760, %v14248_v29  ;;  %v14332_v23 = vand.u32 4294901760, %v14255_v33  ;;  %v14341_v12 = vld [vmem:[#allocation44_spill] sm:$0xff]  ;;  %v14343_v24 = vld [vmem:[#allocation27_spill] sm:$0xff]  ;;  %v14345_v49 = vld [vmem:[#allocation30_spill] sm:$0xff] }
 0x29e   :  { %7714 = vmatprep.subr.bf16.mxu0 %v14310_v45  ;;  %v7727_v16 = vpack.c.bf16 %v14325_v54, %v14324_v15  ;;  %v7729_v60 = vpack.c.bf16 %v14327_v1, %v14326_v3  ;;  %v7731_v56 = vpack.c.bf16 %v14329_v63, %v14328_v5  ;;  %v14334_v9 = vand.u32 4294901760, %v14252_v50  ;;  %v14351_v8 = vld [vmem:[#allocation42_spill] sm:$0xff] }
 0x29f   :  { %4263 = vmatmul.mubr.f32.vlgmr.msra.gmra.mrb[2].mxu1 %v11385_v57  ;;  %v7733_v59 = vpack.c.bf16 %v14331_v34, %v14330_v58  ;;  %v7735_v44 = vpack.c.bf16 %v14333_v62, %v14332_v23  ;;  %v14335_v39 = vand.u32 4294901760, %v14253_v40  ;;  %v14337_v42 = vand.u32 4294901760, %v14336_v47  ;;  %v14372_v47 = vld [vmem:[#allocation66_spill] sm:$0xff] }
 0x2a0   :  { %4341 = vmatprep.mubr.f32.mxu1 %v13240_v0  ;;  %7856 = vmatpush1.bf16.msra.mxu1 %v7855_v30  ;;  %v14339_v14 = vand.u32 4294901760, %v14338_v41  ;;  %v14340_v29 = vand.u32 4294901760, %v14262_v10  ;;  %v14342_v33 = vand.u32 4294901760, %v14341_v12  ;;  %v14344_v50 = vand.u32 4294901760, %v14343_v24  ;;  %v14349_v10 = vld [vmem:[#allocation40_spill] sm:$0xff]  ;;  %v14380_v12 = vld [vmem:[#allocation69_spill] sm:$0xff] }
 0x2a1   :  { %7716 = vmatpush1.bf16.msra.mxu0 %v14313_v27  ;;  %v14346_v40 = vand.u32 4294901760, %v14345_v49  ;;  %v14347_v61 = vand.u32 4294901760, %v10785_v32  ;;  %v14348_v18 = vand.u32 4294901760, %v10800_v26  ;;  %v14350_v43 = vand.u32 4294901760, %v14349_v10  ;;  %v14382_v24 = vld [vmem:[#allocation70_spill] sm:$0xff]  ;;  %v14384_v49 = vld [vmem:[#allocation72_spill] sm:$0xff] }
 0x2a2   :  { %7718 = vmatprep.subr.bf16.mxu0 %v7717_v4  ;;  %v7737_v4 = vpack.c.bf16 %v14335_v39, %v14334_v9  ;;  %v7741_v30 = vpack.c.bf16 %v14342_v33, %v14340_v29  ;;  %v14353_v54 = vand.u32 4294901760, %v14266_v21  ;;  %v14355_v1 = vand.u32 4294901760, %v10903_v20  ;;  %v14368_v9 = vld [vmem:[#allocation63_spill] sm:$0xff] }
 0x2a3   :  { %v14358_v26 = vand.u32 4294901760, %v14268_v17  ;;  %v14359_v63 = vand.u32 4294901760, %v14269_v11  ;;  %v14360_v58 = vand.u32 4294901760, %v10999_v31  ;;  %v14361_v21 = vand.u32 4294901760, %v11018_v22  ;;  %v14366_v11 = vld [vmem:[#allocation61_spill] sm:$0xff]  ;;  %v14370_v22 = vld [vmem:[#allocation64_spill] sm:$0xff] }
 0x2a4   :  { %3689 = vmatmul.mubr.f32.vlgmr.msra.gmra.mrb[0].mxu0 %v14318_v51  ;;  %v14363_v20 = vand.u32 4294901760, %v14271_v46  ;;  %v14364_v23 = vand.u32 4294901760, %v14270_v28  ;;  %v14365_v17 = vand.u32 4294901760, %v11038_v37  ;;  %v14369_v31 = vand.u32 4294901760, %v14368_v9  ;;  %v14374_v46 = vld [vmem:[#allocation33_spill] sm:$0xff]  ;;  %v14378_v37 = vld [vmem:[#allocation67_spill] sm:$0xff] }
 0x2a5   :  { %7720 = vmatpush1.bf16.msra.mxu0 %v7719_v6  ;;  %3952 = vmatprep.mubr.f32.mxu0 %v14321_v38  ;;  %v7739_v6 = vpack.c.bf16 %v14339_v14, %v14337_v42  ;;  %v7755_v34 = vpack.c.bf16 %v14361_v21, %v14360_v58  ;;  %v14375_v41 = vand.u32 4294901760, %v14374_v46  ;;  %v14376_v14 = vld [vmem:[#allocation34_spill] sm:$0xff]  ;;  %v14379_v29 = vand.u32 4294901760, %v14378_v37  ;;  %v14410_v9 = vld [vmem:[#allocation161_spill] sm:$0xff]  ;;  %v14418_v46 = vld [vmem:[#allocation35_spill] sm:$0xff] }
 0x2a6   :  { %7722 = vmatprep.subr.bf16.mxu0 %v7721_v7  ;;  %v7743_v7 = vpack.c.bf16 %v14346_v40, %v14344_v50  ;;  %v7759_v62 = vpack.c.bf16 %v14365_v17, %v14364_v23  ;;  %v14377_v28 = vand.u32 4294901760, %v14376_v14  ;;  %v14381_v33 = vand.u32 4294901760, %v14380_v12  ;;  %v14406_v17 = vld [vmem:[#allocation167_spill] sm:$0xff]  ;;  %v14421_v14 = vld [vmem:[#allocation50_spill] sm:$0xff]  ;;  %v14426_v12 = vld [vmem:[#allocation9_spill] sm:$0xff] }
 0x2a7   :  { %4344 = vmatmul.mubr.f32.vlgmr.msra.gmra.mrb[2].mxu1 %v11401_v25  ;;  %v14383_v50 = vand.u32 4294901760, %v14382_v24  ;;  %v14385_v40 = vand.u32 4294901760, %v14384_v49  ;;  %v14424_v37 = vld [vmem:[#allocation74_spill] sm:$0xff]  ;;  %v14429_v24 = vld [vmem:[#allocation16_spill] sm:$0xff]  ;;  %v14431_v49 = vld [vmem:[#allocation31_spill] sm:$0xff] }
 0x2a9   :  { %7724 = vmatpush1.bf16.msra.mxu0 %v7723_v53  ;;  %v7745_v53 = vpack.c.bf16 %v14348_v18, %v14347_v61  ;;  %v14386_v61 = vld [vmem:[#allocation73_spill] sm:$0xff] }
 0x2aa   :  { %7726 = vmatprep.subr.bf16.mxu0 %v7725_v36  ;;  %v14352_v36 = vand.u32 4294901760, %v14351_v8  ;;  %v14387_v18 = vand.u32 4294901760, %v14386_v61  ;;  %v14390_v8 = vld [vmem:[#allocation48_spill] sm:$0xff]  ;;  %v14434_v61 = vld [vmem:[#allocation43_spill] sm:$0xff] }
 0x2ac   :  { %v7747_v15 = vpack.c.bf16 %v14352_v36, %v14350_v43  ;;  %v14391_v36 = vand.u32 4294901760, %v14390_v8 }
 0x2ad   :  { %7728 = vmatpush1.bf16.msra.mxu0 %v7727_v16  ;;  %v14354_v16 = vand.u32 4294901760, %v14265_v13  ;;  %v14362_v13 = vand.u32 4294901760, %v14272_v48  ;;  %v14373_v48 = vand.u32 4294901760, %v14372_v47  ;;  %v14415_v47 = vld [vmem:[#allocation15_spill] sm:$0xff] }
 0x2ae   :  { %7730 = vmatprep.subr.bf16.mxu0 %v7729_v60  ;;  %v14356_v60 = vld [vmem:[#allocation54_spill] sm:$0xff] }
 0x2af   :  { %v7749_v3 = vpack.c.bf16 %v14354_v16, %v14353_v54  ;;  %v14357_v32 = vand.u32 4294901760, %v14356_v60  ;;  %v14396_v60 = vld [vmem:[#allocation78_spill] sm:$0xff] }
 0x2b1   :  { %7732 = vmatpush1.bf16.msra.mxu0 %v7731_v56  ;;  %v7751_v5 = vpack.c.bf16 %v14357_v32, %v14355_v1  ;;  %v7753_v56 = vpack.c.bf16 %v14359_v63, %v14358_v26  ;;  %v14397_v32 = vand.u32 4294901760, %v14396_v60  ;;  %v14398_v26 = vld [vmem:[#allocation79_spill] sm:$0xff]  ;;  %v4593_v60 = vld [vmem:[%s12544_s3 + $0x18] sm:$0xff] }
 0x2b2   :  { %7734 = vmatprep.subr.bf16.mxu0 %v7733_v59  ;;  %v7757_v59 = vpack.c.bf16 %v14363_v20, %v14362_v13  ;;  %v14399_v63 = vand.u32 4294901760, %v14398_v26  ;;  %v14404_v20 = vld [vmem:[#allocation164_spill] sm:$0xff] }
 0x2b5   :  { %7736 = vmatpush1.bf16.msra.mxu0 %v7735_v44  ;;  %v14367_v44 = vand.u32 4294901760, %v14366_v11  ;;  %v14408_v11 = vld [vmem:[#allocation88_spill] sm:$0xff] }
 0x2b6   :  { %7738 = vmatprep.subr.bf16.mxu0 %v7737_v4  ;;  %v11485_v55 = vpop.f32.mrb[0].mxu1  ;;  %v14371_v4 = vand.u32 4294901760, %v14370_v22  ;;  %v14413_v22 = vld [vmem:[#allocation8_spill] sm:$0xff] }
 0x2b7   :  { %v11491_v51 = vpop.f32.mrb[1].mxu1  ;;  %v7761_v39 = vpack.c.bf16 %v14369_v31, %v14367_v44  ;;  %v14409_v44 = vld [vmem:[#allocation2_spill] sm:$0xff] }
 0x2b8   :  { %v7763_v42 = vpack.c.bf16 %v14373_v48, %v14371_v4  ;;  %v14411_v31 = vld [vmem:[#allocation6_spill] sm:$0xff]  ;;  %v14414_v4 = vld [vmem:[#allocation11_spill] sm:$0xff]  ;;  %v14416_v48 = vld [vmem:[#allocation24_spill] sm:$0xff] }
 0x2b9   :  { %7740 = vmatpush1.bf16.msra.mxu0 %v7739_v6  ;;  %v7765_v6 = vpack.c.bf16 %v14377_v28, %v14375_v41  ;;  %v14420_v41 = vld [vmem:[#allocation47_spill] sm:$0xff]  ;;  %v14422_v28 = vld [vmem:[#allocation56_spill] sm:$0xff] }
 0x2ba   :  { %7742 = vmatprep.subr.bf16.mxu0 %v7741_v30  ;;  %v7767_v30 = vpack.c.bf16 %v14381_v33, %v14379_v29  ;;  %v14425_v29 = vld [vmem:[#allocation77_spill] sm:$0xff]  ;;  %v14427_v33 = vld [vmem:[#allocation10_spill] sm:$0xff] }
 0x2bd   :  { %7744 = vmatpush1.bf16.msra.mxu0 %v7743_v7  ;;  %v7769_v7 = vpack.c.bf16 %v14385_v40, %v14383_v50  ;;  %v14430_v50 = vld [vmem:[#allocation28_spill] sm:$0xff]  ;;  %v14432_v40 = vld [vmem:[#allocation37_spill] sm:$0xff] }
 0x2be   :  { %7746 = vmatprep.subr.bf16.mxu0 %v7745_v53  ;;  %v14388_v53 = vld [vmem:[#allocation75_spill] sm:$0xff] }
 0x2bf   :  { %v14389_v10 = vand.u32 4294901760, %v14388_v53  ;;  %v14436_v53 = vld [vmem:[#allocation84_spill] sm:$0xff] }
 0x2c1   :  { %7748 = vmatpush1.bf16.msra.mxu0 %v7747_v15  ;;  %v7771_v43 = vpack.c.bf16 %v14389_v10, %v14387_v18  ;;  %v14392_v15 = vld [vmem:[#allocation49_spill] sm:$0xff]  ;;  %v14435_v18 = vld [vmem:[#allocation166_spill] sm:$0xff]  ;;  %v14437_v10 = vand.u32 4294901760, %v11401_v25 }
 0x2c2   :  { %7750 = vmatprep.subr.bf16.mxu0 %v7749_v3  ;;  %v14393_v54 = vand.u32 4294901760, %v14392_v15  ;;  %v14394_v3 = vld [vmem:[#allocation76_spill] sm:$0xff] }
 0x2c3   :  { %v14395_v1 = vand.u32 4294901760, %v14394_v3 }
 0x2c4   :  { %v7773_v16 = vpack.c.bf16 %v14393_v54, %v14391_v36  ;;  %v4609_v36 = vld [vmem:[%s12544_s3 + $0x98] sm:$0xff]  ;;  %v4592_v54 = vld [vmem:[%s12544_s3 + $0x10] sm:$0xff] }
 0x2c5   :  { %7752 = vmatpush1.bf16.msra.mxu0 %v7751_v5  ;;  %v7775_v5 = vpack.c.bf16 %v14397_v32, %v14395_v1  ;;  %v4687_v1 = vand.u32 4294901760, %v4609_v36  ;;  %v4610_v32 = vld [vmem:[%s12544_s3 + $0xa0] sm:$0xff] }
 0x2c6   :  { %7754 = vmatprep.subr.bf16.mxu0 %v7753_v56  ;;  %v14400_v56 = vld [vmem:[#allocation81_spill] sm:$0xff] }
 0x2c7   :  { %v14401_v58 = vand.u32 4294901760, %v14400_v56 }
 0x2c9   :  { %7756 = vmatpush1.bf16.msra.mxu0 %v7755_v34  ;;  %v7777_v21 = vpack.c.bf16 %v14401_v58, %v14399_v63  ;;  %v14402_v34 = vld [vmem:[#allocation82_spill] sm:$0xff] }
 0x2ca   :  { %7758 = vmatprep.subr.bf16.mxu0 %v7757_v59  ;;  %v14403_v13 = vand.u32 4294901760, %v14402_v34  ;;  %v14405_v59 = vand.u32 4294901760, %v14404_v20  ;;  %v4595_v34 = vld [vmem:[%s12544_s3 + $0x28] sm:$0xff] }
 0x2cc   :  { %v7779_v23 = vpack.c.bf16 %v14405_v59, %v14403_v13  ;;  %v4612_v13 = vld [vmem:[%s12544_s3 + $0xb0] sm:$0xff]  ;;  %v11679_v59 = vsub.f32 %v4609_v36, %v4687_v1 }
 0x2cd   :  { %7760 = vmatpush1.bf16.msra.mxu0 %v7759_v62  ;;  %v14407_v62 = vld [vmem:[#allocation36_spill] sm:$0xff] }
 0x2ce   :  { %7762 = vmatprep.subr.bf16.mxu0 %v7761_v39  ;;  %v14412_v39 = vld [vmem:[#allocation170_spill] sm:$0xff]  ;;  %v4616_v36 = vld [vmem:[%s12544_s3 + $0xd0] sm:$0xff] }
 0x2d1   :  { %7764 = vmatpush1.bf16.msra.mxu0 %v7763_v42  ;;  %v14417_v42 = vld [vmem:[#allocation26_spill] sm:$0xff] }
 0x2d2   :  { %7766 = vmatprep.subr.bf16.mxu0 %v7765_v6  ;;  %v14423_v6 = vld [vmem:[#allocation59_spill] sm:$0xff] }
 0x2d5   :  { %7768 = vmatpush1.bf16.msra.mxu0 %v7767_v30  ;;  %v14428_v30 = vld [vmem:[#allocation14_spill] sm:$0xff] }
 0x2d6   :  { %7770 = vmatprep.subr.bf16.mxu0 %v7769_v7  ;;  %v14433_v7 = vld [vmem:[#allocation39_spill] sm:$0xff] }
 0x2d9   :  { %7772 = vmatpush1.bf16.msra.mxu0 %v7771_v43 }
 0x2da   :  { %7774 = vmatprep.subr.bf16.mxu0 %v7773_v16 }
 0x2dd   :  { %7776 = vmatpush1.bf16.msra.mxu0 %v7775_v5  ;;  %v4611_v5 = vld [vmem:[%s12544_s3 + $0xa8] sm:$0xff] }
 0x2de   :  { %7778 = vmatprep.subr.bf16.mxu0 %v7777_v21  ;;  %v4594_v21 = vld [vmem:[%s12544_s3 + $0x20] sm:$0xff] }
 0x2e1   :  { %7780 = vmatpush1.bf16.msra.mxu0 %v7779_v23  ;;  %v4636_v23 = vand.u32 4294901760, %v4592_v54 }
 0x2e2   :  { %7782 = vmatprep.subr.bf16.mxu0 %v14406_v17  ;;  %v4639_v17 = vand.u32 4294901760, %v4593_v60 }
 0x2e4   :  { %3954 = vmatmul.mubr.f32.vlgmr.msra.gmra.mrb[0].mxu0 %v14407_v62 }
 0x2e5   :  { %7784 = vmatpush1.bf16.msra.mxu0 %v14408_v11  ;;  %4089 = vmatprep.mubr.f32.mxu0 %v14321_v38  ;;  %v14419_v38 = vld [vmem:[#allocation38_spill] sm:$0xff]  ;;  %v4693_v11 = vand.u32 4294901760, %v4611_v5 }
 0x2e6   :  { %7786 = vmatprep.subr.bf16.mxu0 %v14409_v44  ;;  %v4642_v44 = vand.u32 4294901760, %v4594_v21 }
 0x2e9   :  { %7788 = vmatpush1.bf16.msra.mxu0 %v14410_v9  ;;  %v4645_v9 = vand.u32 4294901760, %v4595_v34 }
 0x2ea   :  { %7790 = vmatprep.subr.bf16.mxu0 %v14411_v31  ;;  %v4613_v31 = vld [vmem:[%s12544_s3 + $0xb8] sm:$0xff] }
 0x2ed   :  { %7792 = vmatpush1.bf16.msra.mxu0 %v14412_v39  ;;  %v11686_v39 = vpack.c.bf16 %v4639_v17, %v4636_v23 }
 0x2ee   :  { %7794 = vmatprep.subr.bf16.mxu0 %v14413_v22  ;;  %v11688_v22 = vsub.f32 %v4592_v54, %v4636_v23  ;;  %v4708_v54 = vand.u32 4294901760, %v4616_v36  ;;  %v4618_v23 = vld [vmem:[%s12544_s3 + $0xe0] sm:$0xff] }
 0x2ef   :  { %14441 = vst [vmem:[#allocation93_spill] sm:$0xff] %v11686_v39 }
 0x2f1   :  { %7796 = vmatpush1.bf16.msra.mxu0 %v14414_v4  ;;  %v11690_v4 = vsub.f32 %v4593_v60, %v4639_v17  ;;  %v4600_v60 = vld [vmem:[%s12544_s3 + $0x50] sm:$0xff]  ;;  %v4619_v17 = vld [vmem:[%s12544_s3 + $0xe8] sm:$0xff] }
 0x2f2   :  { %7798 = vmatprep.subr.bf16.mxu0 %v14415_v47  ;;  %v4696_v47 = vand.u32 4294901760, %v4612_v13 }
 0x2f5   :  { %7800 = vmatpush1.bf16.msra.mxu0 %v14416_v48  ;;  %v4596_v48 = vld [vmem:[%s12544_s3 + $0x30] sm:$0xff] }
 0x2f6   :  { %7802 = vmatprep.subr.bf16.mxu0 %v14417_v42  ;;  %v4597_v42 = vld [vmem:[%s12544_s3 + $0x38] sm:$0xff] }
 0x2f9   :  { %7804 = vmatpush1.bf16.msra.mxu0 %v14418_v46 }
 0x2fa   :  { %7806 = vmatprep.subr.bf16.mxu0 %v14419_v38 }
 0x2fd   :  { %7808 = vmatpush1.bf16.msra.mxu0 %v14420_v41  ;;  %v11702_v41 = vsub.f32 %v4611_v5, %v4693_v11  ;;  %v4660_v5 = vand.u32 4294901760, %v4600_v60 }
 0x2fe   :  { %7810 = vmatprep.subr.bf16.mxu0 %v14421_v14  ;;  %v11704_v14 = vsub.f32 %v4594_v21, %v4642_v44 }
 0x301   :  { %7812 = vmatpush1.bf16.msra.mxu0 %v14422_v28  ;;  %v11706_v28 = vsub.f32 %v4595_v34, %v4645_v9 }
 0x302   :  { %7814 = vmatprep.subr.bf16.mxu0 %v14423_v6  ;;  %v4699_v6 = vand.u32 4294901760, %v4613_v31 }
 0x305   :  { %7816 = vmatpush1.bf16.msra.mxu0 %v14424_v37  ;;  %v11708_v37 = vsub.f32 %v4612_v13, %v4696_v47 }
 0x306   :  { %7818 = vmatprep.subr.bf16.mxu0 %v14425_v29  ;;  %v11711_v29 = vpack.c.bf16 %v4645_v9, %v4642_v44  ;;  %v4602_v44 = vld [vmem:[%s12544_s3 + $0x60] sm:$0xff]  ;;  %v4603_v9 = vld [vmem:[%s12544_s3 + $0x68] sm:$0xff] }
 0x308   :  { %14443 = vst [vmem:[#allocation176_spill] sm:$0xff] %v11711_v29 }
 0x309   :  { %7820 = vmatpush1.bf16.msra.mxu0 %v14426_v12  ;;  %v4648_v12 = vand.u32 4294901760, %v4596_v48 }
 0x30a   :  { %7822 = vmatprep.subr.bf16.mxu0 %v14427_v33  ;;  %v4651_v33 = vand.u32 4294901760, %v4597_v42 }
 0x30d   :  { %7824 = vmatpush1.bf16.msra.mxu0 %v14428_v30  ;;  %v11714_v30 = vpack.c.bf16 %v4699_v6, %v4696_v47  ;;  %v4669_v47 = vand.u32 4294901760, %v4603_v9 }
 0x30e   :  { %7826 = vmatprep.subr.bf16.mxu0 %v14429_v24  ;;  %v11716_v24 = vsub.f32 %v4613_v31, %v4699_v6  ;;  %v4666_v31 = vand.u32 4294901760, %v4602_v44 }
 0x30f   :  { %14444 = vst [vmem:[#allocation178_spill] sm:$0xff] %v11714_v30 }
 0x311   :  { %7828 = vmatpush1.bf16.msra.mxu0 %v14430_v50  ;;  %v11718_v50 = vsub.f32 %v4596_v48, %v4648_v12 }
 0x312   :  { %7830 = vmatprep.subr.bf16.mxu0 %v14431_v49  ;;  %v11720_v49 = vsub.f32 %v4597_v42, %v4651_v33 }
 0x315   :  { %7832 = vmatpush1.bf16.msra.mxu0 %v14432_v40  ;;  %v11723_v40 = vpack.c.bf16 %v4651_v33, %v4648_v12 }
 0x316   :  { %7834 = vmatprep.subr.bf16.mxu0 %v14433_v7  ;;  %v4614_v7 = vld [vmem:[%s12544_s3 + $0xc0] sm:$0xff] }
 0x317   :  { %14445 = vst [vmem:[#allocation96_spill] sm:$0xff] %v11723_v40 }
 0x319   :  { %7836 = vmatpush1.bf16.msra.mxu0 %v14434_v61  ;;  %v4615_v61 = vld [vmem:[%s12544_s3 + $0xc8] sm:$0xff] }
 0x31a   :  { %7838 = vmatprep.subr.bf16.mxu0 %v14308_v52  ;;  %v11621_v52 = vld [vmem:[%s12544_s3 + $0x88] sm:$0xff] }
 0x31d   :  { %7840 = vmatpush1.bf16.msra.mxu0 %v14309_v19  ;;  %v11616_v19 = vld [vmem:[%s12544_s3 + $0x80] sm:$0xff] }
 0x31e   :  { %7842 = vmatprep.subr.bf16.mxu0 %v14310_v45  ;;  %v4678_v25 = vand.u32 4294901760, %v11616_v19  ;;  %v4681_v45 = vand.u32 4294901760, %v11621_v52 }
 0x320   :  { %v11648_v3 = vpack.c.bf16 %v4681_v45, %v4678_v25  ;;  %v11778_v48 = vsub.f32 %v11616_v19, %v4678_v25  ;;  %v11783_v42 = vsub.f32 %v11621_v52, %v4681_v45  ;;  %v4620_v19 = vld [vmem:[%s12544_s3 + $0xf0] sm:$0xff]  ;;  %v4621_v25 = vld [vmem:[%s12544_s3 + $0xf8] sm:$0xff]  ;;  %v11804_v45 = vsub.f32 %v4616_v36, %v4708_v54 }
 0x321   :  { %7844 = vmatpush1.bf16.msra.mxu0 %v14313_v27  ;;  %v4590_v27 = vld [vmem:[%s12544_s3] sm:$0xff]  ;;  %v4604_v52 = vld [vmem:[%s12544_s3 + $0x70] sm:$0xff]  ;;  %v11824_v36 = vsub.f32 %v4603_v9, %v4669_v47 }
 0x322   :  { %7858 = vmatprep.subr.bf16.mxu0 %v14435_v18  ;;  %v4630_v43 = vand.u32 4294901760, %v4590_v27  ;;  %14438 = vst [vmem:[#allocation85_spill] sm:$0xff] %v11648_v3  ;;  %7870 = vmatprep.subr.bf16.mxu1 %v11648_v3 }
 0x324   :  { %4091 = vmatmul.mubr.f32.vlgmr.msra.gmra.mrb[0].mxu0 %v14407_v62  ;;  %v11661_v63 = vsub.f32 %v4590_v27, %v4630_v43  ;;  %v4690_v62 = vand.u32 4294901760, %v4610_v32  ;;  %v4599_v27 = vld [vmem:[%s12544_s3 + $0x48] sm:$0xff] }
 0x325   :  { %7860 = vmatpush1.bf16.msra.mxu0 %v14436_v53  ;;  %4418 = vmatprep.mubr.f32.mxu0 %v13240_v0 }
 0x326   :  { %7862 = vmatprep.subr.bf16.mxu0 %v11448_v35  ;;  %v4608_v35 = vld [vmem:[%s12544_s3 + $0x90] sm:$0xff]  ;;  %v11698_v46 = vpack.c.bf16 %v4693_v11, %v4690_v62  ;;  %v11700_v38 = vsub.f32 %v4610_v32, %v4690_v62  ;;  %v4601_v32 = vld [vmem:[%s12544_s3 + $0x58] sm:$0xff]  ;;  %v4714_v62 = vand.u32 4294901760, %v4618_v23  ;;  %v4717_v11 = vand.u32 4294901760, %v4619_v17 }
 0x327   :  { %v4684_v15 = vand.u32 4294901760, %v4608_v35  ;;  %v4663_v21 = vand.u32 4294901760, %v4601_v32 }
 0x328   :  { %4422 = vmatmul.mubr.f32.vlgmr.msra.gmra.mrb[2].mxu0 %v14437_v10  ;;  %14442 = vst [vmem:[#allocation94_spill] sm:$0xff] %v11698_v46  ;;  %v4598_v10 = vld [vmem:[%s12544_s3 + $0x40] sm:$0xff]  ;;  %v11785_v6 = vpack.c.bf16 %v4717_v11, %v4714_v62 }
 0x329   :  { %7864 = vmatpush1.bf16.msra.mxu0 %v11450_v2  ;;  %4504 = vmatprep.mubr.f32.mxu0 %v13240_v0  ;;  %v11665_v58 = vsub.f32 %v4608_v35, %v4684_v15  ;;  %v11677_v20 = vpack.c.bf16 %v4687_v1, %v4684_v15  ;;  %v4657_v35 = vand.u32 4294901760, %v4599_v27  ;;  %v4617_v15 = vld [vmem:[%s12544_s3 + $0xd8] sm:$0xff]  ;;  %v11759_v13 = vpack.c.bf16 %v4663_v21, %v4660_v5 }
 0x32a   :  { %7866 = vmatprep.subr.bf16.mxu0 %v14435_v18  ;;  %v4702_v18 = vand.u32 4294901760, %v4614_v7  ;;  %v4711_v1 = vand.u32 4294901760, %v4617_v15  ;;  %14450 = vst [vmem:[#allocation102_spill] sm:$0xff] %v11785_v6 }
 0x32b   :  { %14440 = vst [vmem:[#allocation91_spill] sm:$0xff] %v11677_v20  ;;  %14449 = vst [vmem:[#allocation187_spill] sm:$0xff] %v11759_v13 }
 0x32c   :  { %v11757_v34 = vpack.c.bf16 %v4711_v1, %v4708_v54  ;;  %v11787_v12 = vsub.f32 %v4614_v7, %v4702_v18  ;;  %v11806_v7 = vsub.f32 %v4617_v15, %v4711_v1  ;;  %v4720_v15 = vand.u32 4294901760, %v4620_v19 }
 0x32d   :  { %v4723_v54 = vand.u32 4294901760, %v4621_v25  ;;  %v4672_v1 = vand.u32 4294901760, %v4604_v52 }
 0x32e   :  { %14448 = vst [vmem:[#allocation184_spill] sm:$0xff] %v11757_v34 }
 0x330   :  { %4506 = vmatmul.mubr.f32.vlgmr.msra.gmra.mrb[2].mxu0 %v11385_v57 }
 0x331   :  { %7868 = vmatpush1.bf16.msra.mxu0 %v14436_v53  ;;  %4580 = vmatprep.mubr.f32.mxu0 %v13240_v0  ;;  %v4705_v53 = vand.u32 4294901760, %v4615_v61 }
 0x333   :  { %v11789_v33 = vsub.f32 %v4615_v61, %v4705_v53  ;;  %v11808_v61 = vsub.f32 %v4600_v60, %v4660_v5  ;;  %v13244_v5 = vand.u32 4294901760, %v11783_v42 }
 0x338   :  { %4582 = vmatmul.mubr.f32.vlgmr.msra.gmra.mrb[2].mxu0 %v11385_v57  ;;  %v4591_v57 = vld [vmem:[%s12544_s3 + $0x8] sm:$0xff] }
 0x339   :  { %v4633_v8 = vand.u32 4294901760, %v4591_v57 }
 0x33b   :  { %v11659_v26 = vpack.c.bf16 %v4633_v8, %v4630_v43  ;;  %v11663_v56 = vsub.f32 %v4591_v57, %v4633_v8  ;;  %v4654_v57 = vand.u32 4294901760, %v4598_v10  ;;  %v11739_v43 = vpack.c.bf16 %v4705_v53, %v4702_v18  ;;  %v4605_v53 = vld [vmem:[%s12544_s3 + $0x78] sm:$0xff] }
 0x33c   :  { %v11810_v18 = vsub.f32 %v4601_v32, %v4663_v21  ;;  %v4675_v60 = vand.u32 4294901760, %v4605_v53  ;;  %v13245_v32 = vand.u32 4294901760, %v11778_v48  ;;  %v13246_v21 = vand.u32 4294901760, %v11661_v63 }
 0x33d   :  { %14439 = vst [vmem:[#allocation90_spill] sm:$0xff] %v11659_v26  ;;  %7872 = vmatpush3.bf16.msra.mxu1 %v11659_v26  ;;  %14446 = vst [vmem:[#allocation97_spill] sm:$0xff] %v11739_v43  ;;  %v11741_v8 = vpack.c.bf16 %v4657_v35, %v4654_v57  ;;  %v11791_v0 = vsub.f32 %v4598_v10, %v4654_v57  ;;  %v11816_v10 = vsub.f32 %v4618_v23, %v4714_v62 }
 0x33e   :  { %7874 = vmatprep.subr.bf16.mxu1 %v11677_v20  ;;  %v11820_v57 = vpack.c.bf16 %v4669_v47, %v4666_v31  ;;  %v11830_v23 = vpack.c.bf16 %v4723_v54, %v4720_v15  ;;  %v11834_v62 = vsub.f32 %v4621_v25, %v4723_v54  ;;  %v11840_v9 = vsub.f32 %v4605_v53, %v4675_v60 }
 0x33f   :  { %14447 = vst [vmem:[#allocation181_spill] sm:$0xff] %v11741_v8  ;;  %v4864_v47 = vsub.f32 %v11783_v42, %v13244_v5  ;;  %v13251_v25 = vand.u32 4294901760, %v11663_v56  ;;  %v13262_v53 = vand.u32 4294901760, %v11679_v59 }
 0x340   :  { %14451 = vst [vmem:[#allocation188_spill] sm:$0xff] %v11820_v57  ;;  %14453 = vst [vmem:[#allocation111_spill] sm:$0xff] %v11830_v23 }
 0x341   :  { %7876 = vmatpush3.bf16.msra.mxu1 %v11686_v39  ;;  %14455 = vst [vmem:[#allocation114_spill] sm:$0xff] %v11834_v62  ;;  %14458 = vst [vmem:[#allocation119_spill] sm:$0xff] %v11840_v9  ;;  %v4865_v54 = vand.u32 4294901760, %v4864_v47 }
 0x342   :  { %7878 = vmatprep.subr.bf16.mxu1 %v11698_v46 }
 0x345   :  { %7880 = vmatpush3.bf16.msra.mxu1 %v11711_v29 }
 0x346   :  { %7882 = vmatprep.subr.bf16.mxu1 %v11714_v30 }
 0x349   :  { %7884 = vmatpush3.bf16.msra.mxu1 %v11723_v40 }
 0x34a   :  { %7886 = vmatprep.subr.bf16.mxu1 %v11739_v43  ;;  %v13280_v43 = vand.u32 4294901760, %v11791_v0 }
 0x34d   :  { %7888 = vmatpush3.bf16.msra.mxu1 %v11741_v8 }
 0x34e   :  { %7890 = vmatprep.subr.bf16.mxu1 %v11757_v34 }
 0x351   :  { %7892 = vmatpush3.bf16.msra.mxu1 %v11759_v13  ;;  %v11793_v13 = vsub.f32 %v4599_v27, %v4657_v35  ;;  %v11818_v27 = vsub.f32 %v4619_v17, %v4717_v11  ;;  %v11822_v35 = vsub.f32 %v4602_v44, %v4666_v31  ;;  %v11832_v17 = vsub.f32 %v4620_v19, %v4720_v15 }
 0x352   :  { %7894 = vmatprep.subr.bf16.mxu1 %v11785_v6  ;;  %v11836_v11 = vsub.f32 %v4604_v52, %v4672_v1  ;;  %v11838_v44 = vpack.c.bf16 %v4675_v60, %v4672_v1  ;;  %v4857_v31 = vsub.f32 %v11778_v48, %v13245_v32  ;;  %v4745_v19 = vsub.f32 %v11661_v63, %v13246_v21 }
 0x353   :  { %14452 = vst [vmem:[#allocation110_spill] sm:$0xff] %v11822_v35  ;;  %14454 = vst [vmem:[#allocation113_spill] sm:$0xff] %v11832_v17  ;;  %v13256_v52 = vand.u32 4294901760, %v11665_v58  ;;  %v13261_v1 = vand.u32 4294901760, %v11688_v22  ;;  %v13268_v60 = vand.u32 4294901760, %v11690_v4  ;;  %v4752_v32 = vsub.f32 %v11663_v56, %v13251_v25 }
 0x354   :  { %14456 = vst [vmem:[#allocation115_spill] sm:$0xff] %v11836_v11  ;;  %14457 = vst [vmem:[#allocation117_spill] sm:$0xff] %v11838_v44  ;;  %v4858_v15 = vand.u32 4294901760, %v4857_v31  ;;  %v4746_v5 = vand.u32 4294901760, %v4745_v19  ;;  %v13263_v19 = vand.u32 4294901760, %v11700_v38  ;;  %v13305_v20 = vand.u32 4294901760, %v11836_v11 }
 0x355   :  { %7896 = vmatpush3.bf16.msra.mxu1 %v11820_v57  ;;  %v4871_v21 = vsub.f32 %v11665_v58, %v13256_v52  ;;  %v4759_v31 = vsub.f32 %v11688_v22, %v13261_v1  ;;  %v4766_v47 = vsub.f32 %v11690_v4, %v13268_v60  ;;  %v4753_v25 = vand.u32 4294901760, %v4752_v32 }
 0x356   :  { %7898 = vmatprep.subr.bf16.mxu1 %v11830_v23  ;;  %v4878_v23 = vsub.f32 %v11679_v59, %v13262_v53  ;;  %v13266_v52 = vand.u32 4294901760, %v11702_v41  ;;  %v13277_v60 = vand.u32 4294901760, %v11789_v33 }
 0x357   :  { %v4872_v57 = vand.u32 4294901760, %v4871_v21  ;;  %v4760_v34 = vand.u32 4294901760, %v4759_v31  ;;  %v4767_v8 = vand.u32 4294901760, %v4766_v47  ;;  %v11879_v1 = vpack.c.bf16 %v4753_v25, %v4746_v5 }
 0x358   :  { %v4879_v6 = vand.u32 4294901760, %v4878_v23  ;;  %v4892_v32 = vsub.f32 %v11702_v41, %v13266_v52  ;;  %v13265_v21 = vand.u32 4294901760, %v11706_v28  ;;  %v13267_v47 = vand.u32 4294901760, %v11708_v37 }
 0x359   :  { %7900 = vmatpush3.bf16.msra.mxu1 %v11838_v44  ;;  %v7901_v44 = vpack.c.bf16 %v4865_v54, %v4858_v15  ;;  %v4885_v15 = vsub.f32 %v11700_v38, %v13263_v19  ;;  %v13264_v54 = vand.u32 4294901760, %v11704_v14  ;;  %v11887_v23 = vpack.c.bf16 %v4767_v8, %v4760_v34 }
 0x35a   :  { %v11881_v53 = vpack.c.bf16 %v4879_v6, %v4872_v57  ;;  %v4893_v19 = vand.u32 4294901760, %v4892_v32  ;;  %v4780_v6 = vsub.f32 %v11706_v28, %v13265_v21  ;;  %v13271_v57 = vand.u32 4294901760, %v11716_v24 }
 0x35b   :  { %7902 = vmatprep.subr.bf16.mxu1 %v7901_v44  ;;  %v4886_v44 = vand.u32 4294901760, %v4885_v15  ;;  %v4773_v31 = vsub.f32 %v11704_v14, %v13264_v54  ;;  %v13272_v5 = vand.u32 4294901760, %v11718_v50  ;;  %v4899_v8 = vsub.f32 %v11708_v37, %v13267_v47 }
 0x35c   :  { %v13273_v34 = vand.u32 4294901760, %v11720_v49  ;;  %v4781_v54 = vand.u32 4294901760, %v4780_v6  ;;  %v4906_v32 = vsub.f32 %v11716_v24, %v13271_v57  ;;  %v13276_v47 = vand.u32 4294901760, %v11787_v12 }
 0x35d   :  { %v4774_v25 = vand.u32 4294901760, %v4773_v31  ;;  %v11902_v15 = vpack.c.bf16 %v4893_v19, %v4886_v44  ;;  %v4787_v21 = vsub.f32 %v11718_v50, %v13272_v5  ;;  %v4900_v52 = vand.u32 4294901760, %v4899_v8 }
 0x35e   :  { %v4794_v31 = vsub.f32 %v11720_v49, %v13273_v34  ;;  %v4907_v44 = vand.u32 4294901760, %v4906_v32  ;;  %v4913_v5 = vsub.f32 %v11787_v12, %v13276_v47  ;;  %v4920_v8 = vsub.f32 %v11789_v33, %v13277_v60 }
 0x35f   :  { %v11915_v19 = vpack.c.bf16 %v4781_v54, %v4774_v25  ;;  %v4788_v6 = vand.u32 4294901760, %v4787_v21  ;;  %v13283_v34 = vand.u32 4294901760, %v11793_v13  ;;  %v4801_v54 = vsub.f32 %v11791_v0, %v13280_v43 }
 0x360   :  { %v4795_v57 = vand.u32 4294901760, %v4794_v31  ;;  %v11925_v40 = vpack.c.bf16 %v4907_v44, %v4900_v52  ;;  %v13284_v21 = vand.u32 4294901760, %v11804_v45  ;;  %v13285_v25 = vand.u32 4294901760, %v11806_v7 }
 0x361   :  { %v4914_v31 = vand.u32 4294901760, %v4913_v5  ;;  %v4921_v47 = vand.u32 4294901760, %v4920_v8  ;;  %v4808_v60 = vsub.f32 %v11793_v13, %v13283_v34  ;;  %v4802_v30 = vand.u32 4294901760, %v4801_v54 }
 0x362   :  { %v11932_v32 = vpack.c.bf16 %v4795_v57, %v4788_v6  ;;  %v4927_v52 = vsub.f32 %v11804_v45, %v13284_v21  ;;  %v4934_v44 = vsub.f32 %v11806_v7, %v13285_v25  ;;  %v13286_v43 = vand.u32 4294901760, %v11808_v61 }
 0x363   :  { %v11944_v29 = vpack.c.bf16 %v4921_v47, %v4914_v31  ;;  %v4809_v57 = vand.u32 4294901760, %v4808_v60  ;;  %v13289_v5 = vand.u32 4294901760, %v11810_v18  ;;  %v13290_v34 = vand.u32 4294901760, %v11816_v10 }
 0x364   :  { %v4928_v6 = vand.u32 4294901760, %v4927_v52  ;;  %v4935_v8 = vand.u32 4294901760, %v4934_v44  ;;  %v4815_v54 = vsub.f32 %v11808_v61, %v13286_v43  ;;  %v13295_v47 = vand.u32 4294901760, %v11818_v27 }
 0x365   :  { %v11951_v21 = vpack.c.bf16 %v4809_v57, %v4802_v30  ;;  %v4822_v25 = vsub.f32 %v11810_v18, %v13289_v5  ;;  %v13296_v60 = vand.u32 4294901760, %v11822_v35  ;;  %v4941_v44 = vsub.f32 %v11816_v10, %v13290_v34 }
 0x366   :  { %v11958_v31 = vpack.c.bf16 %v4935_v8, %v4928_v6  ;;  %v4816_v52 = vand.u32 4294901760, %v4815_v54  ;;  %v13297_v43 = vand.u32 4294901760, %v11824_v36  ;;  %v4948_v30 = vsub.f32 %v11818_v27, %v13295_v47 }
 0x367   :  { %v4823_v46 = vand.u32 4294901760, %v4822_v25  ;;  %v4829_v57 = vsub.f32 %v11822_v35, %v13296_v60  ;;  %v4942_v5 = vand.u32 4294901760, %v4941_v44  ;;  %v13300_v8 = vand.u32 4294901760, %v11832_v17 }
 0x368   :  { %v4836_v6 = vsub.f32 %v11824_v36, %v13297_v43  ;;  %v13303_v54 = vand.u32 4294901760, %v11834_v62  ;;  %v4949_v25 = vand.u32 4294901760, %v4948_v30  ;;  %v13304_v43 = vand.u32 4294901760, %v11840_v9 }
 0x369   :  { %v11975_v34 = vpack.c.bf16 %v4823_v46, %v4816_v52  ;;  %v4830_v39 = vand.u32 4294901760, %v4829_v57  ;;  %v4955_v60 = vsub.f32 %v11832_v17, %v13300_v8  ;;  %v4843_v46 = vsub.f32 %v11836_v11, %v13305_v20 }
 0x36a   :  { %v4837_v47 = vand.u32 4294901760, %v4836_v6  ;;  %v4962_v44 = vsub.f32 %v11834_v62, %v13303_v54  ;;  %v11985_v26 = vpack.c.bf16 %v4949_v25, %v4942_v5  ;;  %v4850_v6 = vsub.f32 %v11840_v9, %v13304_v43 }
 0x36b   :  { %14459 = vst [vmem:[#allocation120_spill] sm:$0xff] %v11975_v34  ;;  %v4956_v30 = vand.u32 4294901760, %v4955_v60  ;;  %v4844_v8 = vand.u32 4294901760, %v4843_v46 }
 0x36c   :  { %v11990_v52 = vpack.c.bf16 %v4837_v47, %v4830_v39  ;;  %v4963_v57 = vand.u32 4294901760, %v4962_v44  ;;  %v4851_v54 = vand.u32 4294901760, %v4850_v6  ;;  %v229_v6 = vld [vmem:[%s12545_s2] sm:$0x3] }
 0x36e   :  { %v11995_v3 = vpack.c.bf16 %v4963_v57, %v4956_v30  ;;  %v11997_v34 = vpack.c.bf16 %v4851_v54, %v4844_v8  ;;  %v13306_v8 = vlaneseq }
 0x370   :  { %v232_v30 = vshrl.u32 %v13306_v8, 7 }
 0x372   :  { %v233_v44 = vsub.s32 0, %v232_v30  ;;  %v237_v57 = vsub.s32 1, %v232_v30 }
 0x374   :  { %v234_v60 = vrot.slane %v229_v6, %v233_v44  ;;  %v238_v43 = vrot.slane %v229_v6, %v237_v57  ;;  %v14485_v6 = vld [vmem:[#allocation93_spill] sm:$0xff] }
 0x376   :  { %v8205_v47 = vadd.f32 %v11485_v55, %v234_v60  ;;  %v8209_v20 = vadd.f32 %v11491_v51, %v238_v43 }
 0x37a   :  { %v11634_v2 = vpop.f32.mrb[2].mxu1 }
 0x37b   :  { %v11642_v16 = vpop.f32.mrb[3].mxu1 }
 0x3f7   :  { %v4092_v39 = vpop.f32.mrb[0].mxu0 }
 0x3f8   :  { %v8206_v54 = vadd.f32 %v8205_v47, %v4092_v39  ;;  %v4094_v25 = vpop.f32.mrb[1].mxu0  ;;  %v14479_v39 = vld [vmem:[#allocation119_spill] sm:$0xff] }
 0x3f9   :  { %v8210_v5 = vadd.f32 %v8209_v20, %v4094_v25  ;;  %v14480_v47 = vld [vmem:[#allocation115_spill] sm:$0xff] }
 0x3fa   :  { %v8207_v46 = vadd.f32 %v8206_v54, %v11634_v2  ;;  %v14481_v60 = vpack.c.bf16 %v14479_v39, %v14480_v47  ;;  %v14483_v54 = vld [vmem:[#allocation90_spill] sm:$0xff] }
 0x3fb   :  { %v8211_v8 = vadd.f32 %v8210_v5, %v11642_v16  ;;  %v14477_v5 = vld [vmem:[#allocation113_spill] sm:$0xff] }
 0x40b   :  { %v4583_v11 = vpop.f32.mrb[2].mxu0 }
 0x40c   :  { %v8208_v9 = vadd.f32 %v8207_v46, %v4583_v11  ;;  %v4585_v17 = vpop.f32.mrb[3].mxu0  ;;  %v14484_v46 = vld [vmem:[#allocation91_spill] sm:$0xff] }
 0x40d   :  { %v8212_v62 = vadd.f32 %v8211_v8, %v4585_v17  ;;  %v14482_v8 = vld [vmem:[#allocation85_spill] sm:$0xff] }
 0x40e   :  { %v4588_v35 = vmax.f32 %v8208_v9, 0.0  ;;  %v14466_v9 = vpack.c.bf16 %v11706_v28, %v11704_v14 }
 0x40f   :  { %v4589_v30 = vmax.f32 %v8212_v62, 0.0  ;;  %v14465_v62 = vpack.c.bf16 %v11702_v41, %v11700_v38 }
 0x410   :  { %v12039_v44 = vand.u32 4294901760, %v4588_v35 }
 0x411   :  { %v12041_v57 = vand.u32 4294901760, %v4589_v30 }
 0x412   :  { %v12044_v55 = vsub.f32 %v4588_v35, %v12039_v44  ;;  %v14460_v35 = vld [vmem:[#allocation120_spill] sm:$0xff] }
 0x413   :  { %v4726_v51 = vsub.f32 %v4589_v30, %v12041_v57  ;;  %v14486_v30 = vld [vmem:[#allocation94_spill] sm:$0xff] }
 0x414   :  { %v4733_v20 = vand.u32 4294901760, %v12044_v55 }
 0x415   :  { %v4727_v2 = vand.u32 4294901760, %v4726_v51 }
 0x416   :  { %v4734_v16 = vsub.f32 %v12044_v55, %v4733_v20 }
 0x417   :  { %v4728_v43 = vsub.f32 %v4726_v51, %v4727_v2 }
 0x418   :  { %v4735_v11 = vand.u32 4294901760, %v4734_v16  ;;  %v14488_v16 = vld [vmem:[#allocation178_spill] sm:$0xff] }
 0x419   :  { %v4729_v17 = vand.u32 4294901760, %v4728_v43  ;;  %v14489_v43 = vld [vmem:[#allocation96_spill] sm:$0xff] }
 0x41b   :  { %4730 = vmatprep.mubr.f32.mxu1 %v4729_v17  ;;  %v14490_v17 = vld [vmem:[#allocation97_spill] sm:$0xff] }
 0x41c   :  { %4736 = vmatmul.mubr.f32.vlgmr.msra.gmra.mrb[4].mxu1 %v4735_v11  ;;  %v14491_v11 = vld [vmem:[#allocation181_spill] sm:$0xff] }
 0x41d   :  { %7904 = vmatpush3.bf16.msra.mxu1 %v11879_v1  ;;  %4966 = vmatprep.mubr.f32.mxu1 %v12041_v57  ;;  %v14468_v1 = vpack.c.bf16 %v11720_v49, %v11718_v50 }
 0x41e   :  { %7906 = vmatprep.subr.bf16.mxu1 %v11881_v53  ;;  %v14467_v53 = vpack.c.bf16 %v11716_v24, %v11708_v37 }
 0x421   :  { %7908 = vmatpush3.bf16.msra.mxu1 %v11887_v23  ;;  %v14469_v23 = vpack.c.bf16 %v11789_v33, %v11787_v12 }
 0x422   :  { %7910 = vmatprep.subr.bf16.mxu1 %v11902_v15  ;;  %v14471_v15 = vpack.c.bf16 %v11806_v7, %v11804_v45 }
 0x425   :  { %7912 = vmatpush3.bf16.msra.mxu1 %v11915_v19  ;;  %v14472_v19 = vpack.c.bf16 %v11810_v18, %v11808_v61 }
 0x426   :  { %7914 = vmatprep.subr.bf16.mxu1 %v11925_v40  ;;  %v14461_v40 = vpack.c.bf16 %v11783_v42, %v11778_v48 }
 0x429   :  { %7916 = vmatpush3.bf16.msra.mxu1 %v11932_v32  ;;  %v14474_v32 = vld [vmem:[#allocation110_spill] sm:$0xff] }
 0x42a   :  { %7918 = vmatprep.subr.bf16.mxu1 %v11944_v29  ;;  %v14462_v29 = vpack.c.bf16 %v11663_v56, %v11661_v63 }
 0x42d   :  { %7920 = vmatpush3.bf16.msra.mxu1 %v11951_v21  ;;  %v14473_v21 = vpack.c.bf16 %v11818_v27, %v11816_v10 }
 0x42e   :  { %7922 = vmatprep.subr.bf16.mxu1 %v11958_v31  ;;  %v14475_v31 = vpack.c.bf16 %v11824_v36, %v14474_v32 }
 0x431   :  { %7924 = vmatpush3.bf16.msra.mxu1 %v14460_v35  ;;  %v14492_v35 = vld [vmem:[#allocation184_spill] sm:$0xff] }
 0x432   :  { %7926 = vmatprep.subr.bf16.mxu1 %v11985_v26  ;;  %v14463_v26 = vpack.c.bf16 %v11679_v59, %v11665_v58 }
 0x435   :  { %7928 = vmatpush3.bf16.msra.mxu1 %v11990_v52  ;;  %v14476_v52 = vld [vmem:[#allocation114_spill] sm:$0xff] }
 0x436   :  { %7930 = vmatprep.subr.bf16.mxu1 %v11995_v3  ;;  %v14464_v3 = vpack.c.bf16 %v11690_v4, %v11688_v22  ;;  %v14478_v25 = vpack.c.bf16 %v14476_v52, %v14477_v5 }
 0x439   :  { %7932 = vmatpush3.bf16.msra.mxu1 %v11997_v34  ;;  %v14470_v34 = vpack.c.bf16 %v11793_v13, %v11791_v0 }
 0x43a   :  { %7934 = vmatprep.subr.bf16.mxu1 %v14461_v40  ;;  %v14493_v40 = vld [vmem:[#allocation187_spill] sm:$0xff] }
 0x43c   :  { %4968 = vmatmul.mubr.f32.vlgmr.msra.gmra.mrb[6].mxu1 %v12039_v44 }
 0x43d   :  { %7936 = vmatpush3.bf16.msra.mxu1 %v14462_v29  ;;  %5103 = vmatprep.mubr.f32.mxu1 %v4726_v51  ;;  %v14487_v51 = vld [vmem:[#allocation176_spill] sm:$0xff] }
 0x43e   :  { %7938 = vmatprep.subr.bf16.mxu1 %v14463_v26  ;;  %v14495_v29 = vld [vmem:[#allocation188_spill] sm:$0xff]  ;;  %v14496_v26 = vld [vmem:[#allocation111_spill] sm:$0xff] }
 0x441   :  { %7940 = vmatpush3.bf16.msra.mxu1 %v14464_v3  ;;  %v14497_v3 = vand.u32 4294901760, %v11778_v48  ;;  %v14504_v48 = vand.u32 4294901760, %v11688_v22  ;;  %v14511_v22 = vand.u32 4294901760, %v11716_v24  ;;  %v14518_v24 = vand.u32 4294901760, %v11804_v45 }
 0x442   :  { %7942 = vmatprep.subr.bf16.mxu1 %v14465_v62  ;;  %v14498_v62 = vand.u32 4294901760, %v11783_v42  ;;  %v14505_v42 = vand.u32 4294901760, %v11690_v4  ;;  %v14512_v4 = vand.u32 4294901760, %v11718_v50  ;;  %v14519_v50 = vand.u32 4294901760, %v11806_v7 }
 0x443   :  { %v14525_v45 = vand.u32 4294901760, %v11824_v36  ;;  %v14526_v7 = vand.u32 4294901760, %v14477_v5  ;;  %v5493_v5 = vld [vmem:[%s12546_s5 + $0x8] sm:$0xff] }
 0x445   :  { %7944 = vmatpush3.bf16.msra.mxu1 %v14466_v9  ;;  %v7997_v9 = vpack.c.bf16 %v14498_v62, %v14497_v3 }
 0x446   :  { %7946 = vmatprep.subr.bf16.mxu1 %v14467_v53  ;;  %v14499_v53 = vld [vmem:[#allocation117_spill] sm:$0xff] }
 0x449   :  { %7948 = vmatpush3.bf16.msra.mxu1 %v14468_v1  ;;  %v14500_v1 = vand.u32 4294901760, %v11661_v63  ;;  %v8003_v63 = vpack.c.bf16 %v14505_v42, %v14504_v48 }
 0x44a   :  { %7950 = vmatprep.subr.bf16.mxu1 %v14469_v23  ;;  %v14501_v23 = vand.u32 4294901760, %v11663_v56  ;;  %v14506_v56 = vand.u32 4294901760, %v11700_v38  ;;  %v14513_v38 = vand.u32 4294901760, %v11720_v49  ;;  %v14520_v49 = vand.u32 4294901760, %v11808_v61 }
 0x44b   :  { %v14527_v61 = vand.u32 4294901760, %v14476_v52  ;;  %v5492_v52 = vld [vmem:[%s12546_s5] sm:$0xff] }
 0x44c   :  { %v8011_v3 = vpack.c.bf16 %v14513_v38, %v14512_v4 }
 0x44d   :  { %7952 = vmatpush3.bf16.msra.mxu1 %v14470_v34  ;;  %v7999_v34 = vpack.c.bf16 %v14501_v23, %v14500_v1  ;;  %v8017_v1 = vpack.c.bf16 %v14519_v50, %v14518_v24 }
 0x44e   :  { %7954 = vmatprep.subr.bf16.mxu1 %v14471_v15  ;;  %v14502_v15 = vand.u32 4294901760, %v11665_v58 }
 0x451   :  { %7956 = vmatpush3.bf16.msra.mxu1 %v14472_v19  ;;  %v14503_v19 = vand.u32 4294901760, %v11679_v59  ;;  %v14508_v59 = vand.u32 4294901760, %v11704_v14  ;;  %v14515_v14 = vand.u32 4294901760, %v11789_v33  ;;  %v14522_v33 = vand.u32 4294901760, %v11816_v10 }
 0x452   :  { %7958 = vmatprep.subr.bf16.mxu1 %v14473_v21  ;;  %v14529_v10 = vand.u32 4294901760, %v14479_v39  ;;  %v5494_v39 = vld [vmem:[%s12546_s5 + $0x10] sm:$0xff] }
 0x453   :  { %v8001_v21 = vpack.c.bf16 %v14503_v19, %v14502_v15  ;;  %v8025_v19 = vpack.c.bf16 %v14527_v61, %v14526_v7  ;;  %v5507_v7 = vld [vmem:[%s12546_s5 + $0x78] sm:$0xff] }
 0x455   :  { %7960 = vmatpush3.bf16.msra.mxu1 %v14475_v31  ;;  %v14507_v31 = vand.u32 4294901760, %v11702_v41  ;;  %v14514_v41 = vand.u32 4294901760, %v11787_v12  ;;  %v14521_v12 = vand.u32 4294901760, %v11810_v18  ;;  %v14528_v18 = vand.u32 4294901760, %v14480_v47 }
 0x456   :  { %7962 = vmatprep.subr.bf16.mxu1 %v14478_v25  ;;  %v14510_v25 = vand.u32 4294901760, %v11708_v37  ;;  %v14517_v37 = vand.u32 4294901760, %v11793_v13  ;;  %v14524_v13 = vand.u32 4294901760, %v14474_v32  ;;  %v8270_v32 = vmov 0.0|0.0  }
 0x457   :  { %v8005_v58 = vpack.c.bf16 %v14507_v31, %v14506_v56  ;;  %v8013_v62 = vpack.c.bf16 %v14515_v14, %v14514_v41  ;;  %v8019_v23 = vpack.c.bf16 %v14521_v12, %v14520_v49  ;;  %v5516_v47 = vand.u32 4294901760, %v5492_v52  ;;  %v5505_v49 = vld [vmem:[%s12546_s5 + $0x68] sm:$0xff] }
 0x458   :  { %v8023_v15 = vpack.c.bf16 %v14525_v45, %v14524_v13 }
 0x459   :  { %7964 = vmatpush3.bf16.msra.mxu1 %v14481_v60  ;;  %v8009_v60 = vpack.c.bf16 %v14511_v22, %v14510_v25  ;;  %v5500_v25 = vld [vmem:[%s12546_s5 + $0x40] sm:$0xff]  ;;  %v5501_v22 = vld [vmem:[%s12546_s5 + $0x48] sm:$0xff] }
 0x45a   :  { %7966 = vmatprep.subr.bf16.mxu1 %v14482_v8  ;;  %v5540_v4 = vand.u32 4294901760, %v5500_v25  ;;  %v5543_v38 = vand.u32 4294901760, %v5501_v22 }
 0x45c   :  { %5106 = vmatmul.mubr.f32.vlgmr.msra.gmra.mrb[8].mxu1 %v12044_v55  ;;  %v14509_v55 = vand.u32 4294901760, %v11706_v28  ;;  %v14516_v28 = vand.u32 4294901760, %v11791_v0  ;;  %v14523_v0 = vand.u32 4294901760, %v11818_v27  ;;  %v12285_v14 = vpack.c.bf16 %v5543_v38, %v5540_v4 }
 0x45d   :  { %7968 = vmatpush3.bf16.msra.mxu1 %v14483_v54  ;;  %5210 = vmatprep.mubr.f32.mxu1 %v4727_v2  ;;  %v14494_v2 = vld [vmem:[#allocation102_spill] sm:$0xff] }
 0x45e   :  { %7970 = vmatprep.subr.bf16.mxu1 %v14484_v46 }
 0x461   :  { %7972 = vmatpush3.bf16.msra.mxu1 %v14485_v6 }
 0x462   :  { %7974 = vmatprep.subr.bf16.mxu1 %v14486_v30 }
 0x465   :  { %7976 = vmatpush3.bf16.msra.mxu1 %v14487_v51 }
 0x466   :  { %7978 = vmatprep.subr.bf16.mxu1 %v14488_v16 }
 0x469   :  { %7980 = vmatpush3.bf16.msra.mxu1 %v14489_v43 }
 0x46a   :  { %7982 = vmatprep.subr.bf16.mxu1 %v14490_v17 }
 0x46d   :  { %7984 = vmatpush3.bf16.msra.mxu1 %v14491_v11 }
 0x46e   :  { %7986 = vmatprep.subr.bf16.mxu1 %v14492_v35 }
 0x471   :  { %7988 = vmatpush3.bf16.msra.mxu1 %v14493_v40 }
 0x472   :  { %7990 = vmatprep.subr.bf16.mxu1 %v14494_v2 }
 0x475   :  { %7992 = vmatpush3.bf16.msra.mxu1 %v14495_v29 }
 0x476   :  { %7994 = vmatprep.subr.bf16.mxu1 %v14496_v26 }
 0x479   :  { %7996 = vmatpush3.bf16.msra.mxu1 %v14499_v53 }
 0x47a   :  { %7998 = vmatprep.subr.bf16.mxu1 %v7997_v9  ;;  %v8015_v9 = vpack.c.bf16 %v14517_v37, %v14516_v28  ;;  %v5502_v28 = vld [vmem:[%s12546_s5 + $0x50] sm:$0xff]  ;;  %v5503_v37 = vld [vmem:[%s12546_s5 + $0x58] sm:$0xff] }
 0x47b   :  { %v5549_v24 = vand.u32 4294901760, %v5503_v37 }
 0x47c   :  { %5214 = vmatmul.mubr.f32.vlgmr.msra.gmra.mrb[10].mxu1 %v4733_v20  ;;  %v8007_v20 = vpack.c.bf16 %v14509_v55, %v14508_v59  ;;  %v6169_v55 = vld [vmem:[%s12547_s4] ss:$0 sm:$0xff] }
 0x47d   :  { %8000 = vmatpush3.bf16.msra.mxu1 %v7999_v34  ;;  %5380 = vmatprep.mubr.f32.mxu1 %v12041_v57  ;;  %v8021_v34 = vpack.c.bf16 %v14523_v0, %v14522_v33  ;;  %v12309_v0 = vsub.f32 %v5500_v25, %v5540_v4  ;;  %v12315_v45 = vsub.f32 %v5503_v37, %v5549_v24 }
 0x47e   :  { %8002 = vmatprep.subr.bf16.mxu1 %v8001_v21  ;;  %v8027_v21 = vpack.c.bf16 %v14529_v10, %v14528_v18  ;;  %v5561_v10 = vand.u32 4294901760, %v5507_v7 }
 0x481   :  { %8004 = vmatpush3.bf16.msra.mxu1 %v8003_v63 }
 0x482   :  { %8006 = vmatprep.subr.bf16.mxu1 %v8005_v58 }
 0x485   :  { %8008 = vmatpush3.bf16.msra.mxu1 %v8007_v20 }
 0x486   :  { %8010 = vmatprep.subr.bf16.mxu1 %v8009_v60 }
 0x489   :  { %8012 = vmatpush3.bf16.msra.mxu1 %v8011_v3 }
 0x48a   :  { %8014 = vmatprep.subr.bf16.mxu1 %v8013_v62 }
 0x48d   :  { %8016 = vmatpush3.bf16.msra.mxu1 %v8015_v9  ;;  %v5546_v9 = vand.u32 4294901760, %v5502_v28 }
 0x48e   :  { %8018 = vmatprep.subr.bf16.mxu1 %v8017_v1  ;;  %v5504_v1 = vld [vmem:[%s12546_s5 + $0x60] sm:$0xff] }
 0x48f   :  { %v12297_v50 = vpack.c.bf16 %v5549_v24, %v5546_v9  ;;  %v5552_v12 = vand.u32 4294901760, %v5504_v1  ;;  %v12313_v13 = vsub.f32 %v5502_v28, %v5546_v9  ;;  %v13324_v9 = vand.u32 4294901760, %v12309_v0 }
 0x491   :  { %8020 = vmatpush3.bf16.msra.mxu1 %v8019_v23  ;;  %v5555_v23 = vand.u32 4294901760, %v5505_v49  ;;  %v12324_v61 = vsub.f32 %v5504_v1, %v5552_v12 }
 0x492   :  { %8022 = vmatprep.subr.bf16.mxu1 %v8021_v34  ;;  %v12311_v34 = vsub.f32 %v5501_v22, %v5543_v38 }
 0x493   :  { %v12307_v33 = vpack.c.bf16 %v5555_v23, %v5552_v12 }
 0x494   :  { %v13323_v24 = vand.u32 4294901760, %v12311_v34 }
 0x495   :  { %8024 = vmatpush3.bf16.msra.mxu1 %v8023_v15  ;;  %v5506_v15 = vld [vmem:[%s12546_s5 + $0x70] sm:$0xff] }
 0x496   :  { %8026 = vmatprep.subr.bf16.mxu1 %v8025_v19  ;;  %v12326_v19 = vsub.f32 %v5505_v49, %v5555_v23  ;;  %v5558_v18 = vand.u32 4294901760, %v5506_v15  ;;  %v5666_v49 = vsub.f32 %v12309_v0, %v13324_v9  ;;  %v5673_v12 = vsub.f32 %v12311_v34, %v13323_v24 }
 0x499   :  { %8028 = vmatpush3.bf16.msra.mxu1 %v8027_v21 }
 0x49a   :  { %8030 = vmatprep.subr.bf16.mxu1 %v14482_v8  ;;  %v5495_v8 = vld [vmem:[%s12546_s5 + $0x18] sm:$0xff] }
 0x49c   :  { %5382 = vmatmul.mubr.f32.vlgmr.msra.gmra.mrb[12].mxu1 %v12039_v44 }
 0x49d   :  { %8032 = vmatpush3.bf16.msra.mxu1 %v14483_v54  ;;  %5484 = vmatprep.mubr.f32.mxu1 %v12041_v57  ;;  %v5522_v54 = vand.u32 4294901760, %v5494_v39 }
 0x49e   :  { %8034 = vmatprep.subr.bf16.mxu1 %v14484_v46  ;;  %v5496_v46 = vld [vmem:[%s12546_s5 + $0x20] sm:$0xff] }
 0x4a1   :  { %8036 = vmatpush3.bf16.msra.mxu1 %v14485_v6  ;;  %v5497_v6 = vld [vmem:[%s12546_s5 + $0x28] sm:$0xff] }
 0x4a2   :  { %8038 = vmatprep.subr.bf16.mxu1 %v14486_v30  ;;  %v5525_v30 = vand.u32 4294901760, %v5495_v8 }
 0x4a5   :  { %8040 = vmatpush3.bf16.msra.mxu1 %v14487_v51  ;;  %v5528_v51 = vand.u32 4294901760, %v5496_v46 }
 0x4a6   :  { %8042 = vmatprep.subr.bf16.mxu1 %v14488_v16  ;;  %v5531_v16 = vand.u32 4294901760, %v5497_v6 }
 0x4a8   :  { %v12259_v48 = vsub.f32 %v5497_v6, %v5531_v16  ;;  %v12267_v58 = vpack.c.bf16 %v5531_v16, %v5528_v51 }
 0x4a9   :  { %8044 = vmatpush3.bf16.msra.mxu1 %v14489_v43  ;;  %v5498_v43 = vld [vmem:[%s12546_s5 + $0x30] sm:$0xff] }
 0x4aa   :  { %8046 = vmatprep.subr.bf16.mxu1 %v14490_v17  ;;  %v5499_v17 = vld [vmem:[%s12546_s5 + $0x38] sm:$0xff]  ;;  %v5534_v42 = vand.u32 4294901760, %v5498_v43 }
 0x4ab   :  { %v5537_v63 = vand.u32 4294901760, %v5499_v17 }
 0x4ac   :  { %v12262_v56 = vsub.f32 %v5498_v43, %v5534_v42 }
 0x4ad   :  { %8048 = vmatpush3.bf16.msra.mxu1 %v14491_v11  ;;  %v12264_v31 = vsub.f32 %v5499_v17, %v5537_v63  ;;  %v12271_v59 = vpack.c.bf16 %v5537_v63, %v5534_v42  ;;  %v5644_v42 = vand.u32 4294901760, %v12259_v48 }
 0x4ae   :  { %8050 = vmatprep.subr.bf16.mxu1 %v14492_v35  ;;  %v12246_v35 = vsub.f32 %v5492_v52, %v5516_v47  ;;  %v12335_v52 = vsub.f32 %v5507_v7, %v5561_v10  ;;  %v5667_v7 = vand.u32 4294901760, %v5666_v49 }
 0x4af   :  { %v13325_v4 = vand.u32 4294901760, %v12264_v31 }
 0x4b0   :  { %v5609_v21 = vand.u32 4294901760, %v12246_v35 }
 0x4b1   :  { %8052 = vmatpush3.bf16.msra.mxu1 %v14493_v40 }
 0x4b2   :  { %8054 = vmatprep.subr.bf16.mxu1 %v14494_v2  ;;  %v12250_v2 = vsub.f32 %v5494_v39, %v5522_v54  ;;  %v5610_v39 = vsub.f32 %v12246_v35, %v5609_v21 }
 0x4b5   :  { %8056 = vmatpush3.bf16.msra.mxu1 %v14495_v29  ;;  %v12252_v29 = vsub.f32 %v5495_v8, %v5525_v30 }
 0x4b6   :  { %8058 = vmatprep.subr.bf16.mxu1 %v14496_v26  ;;  %v12254_v26 = vsub.f32 %v5496_v46, %v5528_v51 }
 0x4b7   :  { %v5630_v8 = vand.u32 4294901760, %v12252_v29 }
 0x4b8   :  { %v5637_v17 = vand.u32 4294901760, %v12254_v26 }
 0x4b9   :  { %8060 = vmatpush3.bf16.msra.mxu1 %v14499_v53  ;;  %v12257_v53 = vpack.c.bf16 %v5525_v30, %v5522_v54  ;;  %v5611_v54 = vand.u32 4294901760, %v5610_v39  ;;  %v5631_v30 = vsub.f32 %v12252_v29, %v5630_v8  ;;  %v13321_v39 = vand.u32 4294901760, %v12315_v45 }
 0x4ba   :  { %8061 = vmatprep.subr.bf16.mxu1 %v8270_v32 }
 0x4bb   :  { %v5632_v43 = vand.u32 4294901760, %v5631_v30 }
 0x4bc   :  { %5486 = vmatmul.mubr.f32.vlgmr.msra.gmra.mrb[14].mxu1 %v12039_v44  ;;  %v5519_v44 = vand.u32 4294901760, %v5493_v5 }
 0x4be   :  { %v12244_v11 = vpack.c.bf16 %v5519_v44, %v5516_v47  ;;  %v12248_v40 = vsub.f32 %v5493_v5, %v5519_v44  ;;  %v14530_v5 = vmov 0.0   ;;  %v5623_v44 = vand.u32 4294901760, %v12250_v2 }
 0x4bf   :  { %6515 = vmatprep.mubr.msk.f32.mxu1 %vm8271_vm1, %v14530_v5 }
 0x4c0   :  { %8063 = vmatpush3.bf16.msra.mxu1 %v12244_v11  ;;  %v5624_v6 = vsub.f32 %v12250_v2, %v5623_v44 }
 0x4c1   :  { %8064 = vmatprep.subr.bf16.mxu1 %v8270_v32 }
 0x4c2   :  { %v5625_v16 = vand.u32 4294901760, %v5624_v6  ;;  %v5687_v6 = vsub.f32 %v12315_v45, %v13321_v39 }
 0x4c4   :  { %8066 = vmatpush3.bf16.msra.mxu1 %v12257_v53  ;;  %v12359_v63 = vpack.c.bf16 %v5632_v43, %v5625_v16  ;;  %v5688_v43 = vand.u32 4294901760, %v5687_v6  ;;  %v8116_v6 = vpack.c.bf16 %v12259_v48, %v12254_v26 }
 0x4c5   :  { %8067 = vmatprep.subr.bf16.mxu1 %v8270_v32 }
 0x4c8   :  { %8069 = vmatpush3.bf16.msra.mxu1 %v12267_v58 }
 0x4c9   :  { %8070 = vmatprep.subr.bf16.mxu1 %v8270_v32 }
 0x4cc   :  { %8072 = vmatpush3.bf16.msra.mxu1 %v12271_v59 }
 0x4cd   :  { %8073 = vmatprep.subr.bf16.mxu1 %v8270_v32 }
 0x4d0   :  { %8075 = vmatpush3.bf16.msra.mxu1 %v12285_v14 }
 0x4d1   :  { %8076 = vmatprep.subr.bf16.mxu1 %v8270_v32 }
 0x4d4   :  { %8078 = vmatpush3.bf16.msra.mxu1 %v12297_v50 }
 0x4d5   :  { %8079 = vmatprep.subr.bf16.mxu1 %v8270_v32 }
 0x4d8   :  { %8081 = vmatpush3.bf16.msra.mxu1 %v12307_v33 }
 0x4d9   :  { %8082 = vmatprep.subr.bf16.mxu1 %v8270_v32 }
 0x4ef   :  { %v6203_v27 = vpop.f32.mrb[4].mxu1 }
 0x4f0   :  { %v6204_v36 = vpop.f32.mrb[5].mxu1 }
 0x4f1   :  { %v6205_v57 = vadd.f32 %v6204_v36, %v6203_v27  ;;  %v5616_v27 = vand.u32 4294901760, %v12248_v40  ;;  %v12331_v36 = vpack.c.bf16 %v5561_v10, %v5558_v18  ;;  %v13322_v10 = vand.u32 4294901760, %v12313_v13 }
 0x4f3   :  { %v4738_v3 = vadd.f32 %v6205_v57, %v6169_v55  ;;  %v12333_v57 = vsub.f32 %v5506_v15, %v5558_v18  ;;  %v5617_v47 = vsub.f32 %v12248_v40, %v5616_v27  ;;  %8084 = vmatpush3.bf16.msra.mxu1 %v12331_v36  ;;  %v5638_v55 = vsub.f32 %v12254_v26, %v5637_v17 }
 0x4f4   :  { %8085 = vmatprep.subr.bf16.mxu1 %v8270_v32  ;;  %v5674_v18 = vand.u32 4294901760, %v5673_v12  ;;  %v14534_v26 = vand.u32 4294901760, %v12313_v13 }
 0x4f5   :  { %v5618_v46 = vand.u32 4294901760, %v5617_v47  ;;  %v5639_v25 = vand.u32 4294901760, %v5638_v55  ;;  %v13320_v55 = vand.u32 4294901760, %v12324_v61 }
 0x4f7   :  { %v12355_v51 = vpack.c.bf16 %v5618_v46, %v5611_v54  ;;  %v8098_v54 = vpack.c.bf16 %v5674_v18, %v5667_v7  ;;  %v5680_v46 = vsub.f32 %v12313_v13, %v13322_v10 }
 0x4f9   :  { %v5681_v16 = vand.u32 4294901760, %v5680_v46  ;;  %v8113_v46 = vpack.c.bf16 %v12252_v29, %v12250_v2  ;;  %v14532_v29 = vand.u32 4294901760, %v12309_v0 }
 0x50f   :  { %v6238_v20 = vpop.f32.mrb[6].mxu1 }
 0x510   :  { %v6239_v60 = vpop.f32.mrb[7].mxu1 }
 0x511   :  { %v6240_v41 = vadd.f32 %v6239_v60, %v6238_v20  ;;  %v5645_v20 = vsub.f32 %v12259_v48, %v5644_v42  ;;  %v5651_v60 = vand.u32 4294901760, %v12262_v56  ;;  %v14535_v48 = vand.u32 4294901760, %v12315_v45 }
 0x513   :  { %v12287_v62 = vadd.f32 %v6240_v41, %v4738_v3  ;;  %v5646_v22 = vand.u32 4294901760, %v5645_v20  ;;  %v5652_v3 = vsub.f32 %v12262_v56, %v5651_v60  ;;  %v5659_v41 = vsub.f32 %v12264_v31, %v13325_v4 }
 0x514   :  { %v13319_v20 = vand.u32 4294901760, %v12326_v19 }
 0x515   :  { %v12369_v38 = vpack.c.bf16 %v5646_v22, %v5639_v25  ;;  %v5653_v28 = vand.u32 4294901760, %v5652_v3  ;;  %v5660_v37 = vand.u32 4294901760, %v5659_v41  ;;  %v8101_v25 = vpack.c.bf16 %v5688_v43, %v5681_v16 }
 0x516   :  { %v5694_v22 = vsub.f32 %v12324_v61, %v13320_v55  ;;  %v5701_v3 = vsub.f32 %v12326_v19, %v13319_v20  ;;  %v8119_v16 = vpack.c.bf16 %v12264_v31, %v12262_v56  ;;  %v14536_v56 = vand.u32 4294901760, %v12324_v61 }
 0x517   :  { %v12379_v1 = vpack.c.bf16 %v5660_v37, %v5653_v28  ;;  %v13318_v37 = vand.u32 4294901760, %v12333_v57 }
 0x518   :  { %v5695_v41 = vand.u32 4294901760, %v5694_v22  ;;  %v5702_v28 = vand.u32 4294901760, %v5701_v3  ;;  %v8122_v22 = vpack.c.bf16 %v12311_v34, %v12309_v0  ;;  %v14538_v0 = vand.u32 4294901760, %v12333_v57 }
 0x519   :  { %v5708_v12 = vsub.f32 %v12333_v57, %v13318_v37 }
 0x51a   :  { %v8104_v49 = vpack.c.bf16 %v5702_v28, %v5695_v41 }
 0x52f   :  { %v6273_v23 = vpop.f32.mrb[8].mxu1 }
 0x530   :  { %v6274_v15 = vpop.f32.mrb[9].mxu1 }
 0x531   :  { %v6275_v47 = vadd.f32 %v6274_v15, %v6273_v23  ;;  %v5709_v15 = vand.u32 4294901760, %v5708_v12  ;;  %v8125_v12 = vpack.c.bf16 %v12315_v45, %v12313_v13 }
 0x533   :  { %v5108_v30 = vadd.f32 %v6275_v47, %v12287_v62  ;;  %v13317_v62 = vand.u32 4294901760, %v12335_v52  ;;  %v8110_v47 = vpack.c.bf16 %v12248_v40, %v12246_v35  ;;  %v8164_v35 = vpack.c.bf16 %v5644_v42, %v5637_v17 }
 0x534   :  { %v14531_v40 = vand.u32 4294901760, %v12264_v31  ;;  %v14537_v31 = vand.u32 4294901760, %v12326_v19 }
 0x535   :  { %v5715_v23 = vsub.f32 %v12335_v52, %v13317_v62 }
 0x536   :  { %v8167_v2 = vpack.c.bf16 %v14531_v40, %v5651_v60 }
 0x537   :  { %v5716_v7 = vand.u32 4294901760, %v5715_v23  ;;  %v8128_v23 = vpack.c.bf16 %v12326_v19, %v12324_v61 }
 0x539   :  { %v8107_v18 = vpack.c.bf16 %v5716_v7, %v5709_v15  ;;  %v8131_v15 = vpack.c.bf16 %v12335_v52, %v12333_v57 }
 0x54f   :  { %v6308_v43 = vpop.f32.mrb[10].mxu1 }
 0x550   :  { %v6309_v3 = vpop.f32.mrb[11].mxu1 }
 0x551   :  { %v6310_v41 = vadd.f32 %v6309_v3, %v6308_v43 }
 0x553   :  { %v5216_v28 = vadd.f32 %v6310_v41, %v5108_v30 }
 0x56f   :  { %v6343_v7 = vpop.f32.mrb[12].mxu1 }
 0x570   :  { %v6344_v62 = vpop.f32.mrb[13].mxu1 }
 0x571   :  { %v6345_v37 = vadd.f32 %v6344_v62, %v6343_v7 }
 0x573   :  { %v5384_v20 = vadd.f32 %v6345_v37, %v5216_v28 }
 0x58f   :  { %v6378_v55 = vpop.f32.mrb[14].mxu1 }
 0x590   :  { %v6379_v39 = vpop.f32.mrb[15].mxu1 }
 0x591   :  { %v6380_v10 = vadd.f32 %v6379_v39, %v6378_v55 }
 0x593   :  { %v5488_v24 = vadd.f32 %v6380_v10, %v5384_v20 }
 0x595   :  { %v5491_v9 = vmax.f32 %v5488_v24, 0.0 }
 0x597   :  { %v12428_v43 = vand.u32 4294901760, %v5491_v9 }
 0x599   :  { %v5597_v30 = vsub.f32 %v5491_v9, %v12428_v43 }
 0x59b   :  { %v5598_v3 = vand.u32 4294901760, %v5597_v30 }
 0x59d   :  { %v5599_v41 = vsub.f32 %v5597_v30, %v5598_v3 }
 0x59f   :  { %v5600_v4 = vand.u32 4294901760, %v5599_v41 }
 0x5a1   :  { %6516 = vmatmul.mubr.f32.vlgmr.msra.gmra.mrb[16].mxu1 %v5600_v4 }
 0x5a2   :  { %8087 = vmatpush3.bf16.msra.mxu1 %v12355_v51  ;;  %6550 = vmatprep.mubr.msk.f32.mxu1 %vm8271_vm1, %v14530_v5  ;;  %v8158_v51 = vpack.c.bf16 %v5616_v27, %v5609_v21  ;;  %v14533_v21 = vand.u32 4294901760, %v12311_v34  ;;  %v14539_v34 = vand.u32 4294901760, %v12335_v52 }
 0x5a3   :  { %8088 = vmatprep.subr.bf16.mxu1 %v8270_v32 }
 0x5a4   :  { %v8170_v27 = vpack.c.bf16 %v14533_v21, %v14532_v29  ;;  %v8179_v17 = vpack.c.bf16 %v14539_v34, %v14538_v0 }
 0x5a6   :  { %8090 = vmatpush3.bf16.msra.mxu1 %v12359_v63  ;;  %v8161_v63 = vpack.c.bf16 %v5630_v8, %v5623_v44  ;;  %v8173_v44 = vpack.c.bf16 %v14535_v48, %v14534_v26  ;;  %v8176_v8 = vpack.c.bf16 %v14537_v31, %v14536_v56 }
 0x5a7   :  { %8091 = vmatprep.subr.bf16.mxu1 %v8270_v32 }
 0x5aa   :  { %8093 = vmatpush3.bf16.msra.mxu1 %v12369_v38 }
 0x5ab   :  { %8094 = vmatprep.subr.bf16.mxu1 %v8270_v32 }
 0x5ae   :  { %8096 = vmatpush3.bf16.msra.mxu1 %v12379_v1 }
 0x5af   :  { %8097 = vmatprep.subr.bf16.mxu1 %v8270_v32 }
 0x5b2   :  { %8099 = vmatpush3.bf16.msra.mxu1 %v8098_v54 }
 0x5b3   :  { %8100 = vmatprep.subr.bf16.mxu1 %v8270_v32 }
 0x5b6   :  { %8102 = vmatpush3.bf16.msra.mxu1 %v8101_v25 }
 0x5b7   :  { %8103 = vmatprep.subr.bf16.mxu1 %v8270_v32 }
 0x5ba   :  { %8105 = vmatpush3.bf16.msra.mxu1 %v8104_v49 }
 0x5bb   :  { %8106 = vmatprep.subr.bf16.mxu1 %v8270_v32 }
 0x5be   :  { %8108 = vmatpush3.bf16.msra.mxu1 %v8107_v18 }
 0x5bf   :  { %8109 = vmatprep.subr.bf16.mxu1 %v8270_v32 }
 0x5c1   :  { %6551 = vmatmul.mubr.f32.vlgmr.msra.gmra.mrb[16].mxu1 %v12428_v43 }
 0x5c2   :  { %8111 = vmatpush3.bf16.msra.mxu1 %v8110_v47  ;;  %6585 = vmatprep.mubr.msk.f32.mxu1 %vm8271_vm1, %v14530_v5 }
 0x5c3   :  { %8112 = vmatprep.subr.bf16.mxu1 %v8270_v32 }
 0x5c6   :  { %8114 = vmatpush3.bf16.msra.mxu1 %v8113_v46 }
 0x5c7   :  { %8115 = vmatprep.subr.bf16.mxu1 %v8270_v32 }
 0x5ca   :  { %8117 = vmatpush3.bf16.msra.mxu1 %v8116_v6 }
 0x5cb   :  { %8118 = vmatprep.subr.bf16.mxu1 %v8270_v32 }
 0x5ce   :  { %8120 = vmatpush3.bf16.msra.mxu1 %v8119_v16 }
 0x5cf   :  { %8121 = vmatprep.subr.bf16.mxu1 %v8270_v32 }
 0x5d2   :  { %8123 = vmatpush3.bf16.msra.mxu1 %v8122_v22 }
 0x5d3   :  { %8124 = vmatprep.subr.bf16.mxu1 %v8270_v32 }
 0x5d6   :  { %8126 = vmatpush3.bf16.msra.mxu1 %v8125_v12 }
 0x5d7   :  { %8127 = vmatprep.subr.bf16.mxu1 %v8270_v32 }
 0x5da   :  { %8129 = vmatpush3.bf16.msra.mxu1 %v8128_v23 }
 0x5db   :  { %8130 = vmatprep.subr.bf16.mxu1 %v8270_v32 }
 0x5de   :  { %8132 = vmatpush3.bf16.msra.mxu1 %v8131_v15 }
 0x5df   :  { %8133 = vmatprep.subr.bf16.mxu1 %v8270_v32 }
 0x5e1   :  { %6586 = vmatmul.mubr.f32.vlgmr.msra.gmra.mrb[16].mxu1 %v5597_v30 }
 0x5e2   :  { %8135 = vmatpush3.bf16.msra.mxu1 %v12244_v11  ;;  %6620 = vmatprep.mubr.msk.f32.mxu1 %vm8271_vm1, %v14530_v5 }
 0x5e3   :  { %8136 = vmatprep.subr.bf16.mxu1 %v8270_v32 }
 0x5e6   :  { %8138 = vmatpush3.bf16.msra.mxu1 %v12257_v53 }
 0x5e7   :  { %8139 = vmatprep.subr.bf16.mxu1 %v8270_v32 }
 0x5ea   :  { %8141 = vmatpush3.bf16.msra.mxu1 %v12267_v58 }
 0x5eb   :  { %8142 = vmatprep.subr.bf16.mxu1 %v8270_v32 }
 0x5ee   :  { %8144 = vmatpush3.bf16.msra.mxu1 %v12271_v59 }
 0x5ef   :  { %8145 = vmatprep.subr.bf16.mxu1 %v8270_v32 }
 0x5f2   :  { %8147 = vmatpush3.bf16.msra.mxu1 %v12285_v14 }
 0x5f3   :  { %8148 = vmatprep.subr.bf16.mxu1 %v8270_v32 }
 0x5f6   :  { %8150 = vmatpush3.bf16.msra.mxu1 %v12297_v50 }
 0x5f7   :  { %8151 = vmatprep.subr.bf16.mxu1 %v8270_v32 }
 0x5fa   :  { %8153 = vmatpush3.bf16.msra.mxu1 %v12307_v33 }
 0x5fb   :  { %8154 = vmatprep.subr.bf16.mxu1 %v8270_v32 }
 0x5fe   :  { %8156 = vmatpush3.bf16.msra.mxu1 %v12331_v36 }
 0x5ff   :  { %8157 = vmatprep.subr.bf16.mxu1 %v8270_v32 }
 0x601   :  { %6621 = vmatmul.mubr.f32.vlgmr.msra.gmra.mrb[16].mxu1 %v5598_v3 }
 0x602   :  { %8159 = vmatpush3.bf16.msra.mxu1 %v8158_v51  ;;  %6655 = vmatprep.mubr.msk.f32.mxu1 %vm8271_vm1, %v14530_v5 }
 0x603   :  { %8160 = vmatprep.subr.bf16.mxu1 %v8270_v32 }
 0x606   :  { %8162 = vmatpush3.bf16.msra.mxu1 %v8161_v63 }
 0x607   :  { %8163 = vmatprep.subr.bf16.mxu1 %v8270_v32 }
 0x60a   :  { %8165 = vmatpush3.bf16.msra.mxu1 %v8164_v35 }
 0x60b   :  { %8166 = vmatprep.subr.bf16.mxu1 %v8270_v32 }
 0x60e   :  { %8168 = vmatpush3.bf16.msra.mxu1 %v8167_v2 }
 0x60f   :  { %8169 = vmatprep.subr.bf16.mxu1 %v8270_v32 }
 0x612   :  { %8171 = vmatpush3.bf16.msra.mxu1 %v8170_v27 }
 0x613   :  { %8172 = vmatprep.subr.bf16.mxu1 %v8270_v32 }
 0x616   :  { %8174 = vmatpush3.bf16.msra.mxu1 %v8173_v44 }
 0x617   :  { %8175 = vmatprep.subr.bf16.mxu1 %v8270_v32 }
 0x61a   :  { %8177 = vmatpush3.bf16.msra.mxu1 %v8176_v8 }
 0x61b   :  { %8178 = vmatprep.subr.bf16.mxu1 %v8270_v32 }
 0x61e   :  { %8180 = vmatpush3.bf16.msra.mxu1 %v8179_v17 }
 0x61f   :  { %8181 = vmatprep.subr.bf16.mxu1 %v8270_v32 }
 0x621   :  { %6656 = vmatmul.mubr.f32.vlgmr.msra.gmra.mrb[16].mxu1 %v12428_v43 }
 0x622   :  { %8183 = vmatpush3.bf16.msra.mxu1 %v12244_v11  ;;  %6690 = vmatprep.mubr.msk.f32.mxu1 %vm8271_vm1, %v14530_v5  ;;  %v6170_v11 = vld [vmem:[%s12548_s6] ss:$0 sm:$0xff] }
 0x623   :  { %8184 = vmatprep.subr.bf16.mxu1 %v8270_v32 }
 0x626   :  { %8186 = vmatpush3.bf16.msra.mxu1 %v12257_v53 }
 0x627   :  { %8187 = vmatprep.subr.bf16.mxu1 %v8270_v32 }
 0x62a   :  { %8189 = vmatpush3.bf16.msra.mxu1 %v12267_v58 }
 0x62b   :  { %8190 = vmatprep.subr.bf16.mxu1 %v8270_v32 }
 0x62e   :  { %8192 = vmatpush3.bf16.msra.mxu1 %v12271_v59 }
 0x62f   :  { %8193 = vmatprep.subr.bf16.mxu1 %v8270_v32 }
 0x632   :  { %8195 = vmatpush3.bf16.msra.mxu1 %v12285_v14 }
 0x633   :  { %8196 = vmatprep.subr.bf16.mxu1 %v8270_v32 }
 0x636   :  { %8198 = vmatpush3.bf16.msra.mxu1 %v12297_v50  ;;  %v14540_v50 = vlaneseq }
 0x637   :  { %8199 = vmatprep.subr.bf16.mxu1 %v8270_v32 }
 0x638   :  { %v6157_v13 = vand.u32 127, %v14540_v50 }
 0x63a   :  { %8201 = vmatpush3.bf16.msra.mxu1 %v12307_v33  ;;  %vm6158_vm2 = vcmp.ge.s32.totalorder %v6157_v13, 8  ;;  %vm6159_vm3 = vcmp.lt.s32.totalorder %v6157_v13, 16 }
 0x63b   :  { %8202 = vmatprep.subr.bf16.mxu1 %v8270_v32  ;;  %vm6160_vm4 = vmand %vm6158_vm2, %vm6159_vm3 }
 0x63e   :  { %8204 = vmatpush3.bf16.msra.mxu1 %v12331_v36 }
 0x641   :  { %6691 = vmatmul.mubr.f32.vlgmr.msra.gmra.mrb[16].mxu1 %v12428_v43 }
 0x714   :  { %v6152_v53 = vpop.f32.mrb[16].mxu1 }
 0x715   :  { %v8213_v58 = vadd.f32 %v6170_v11, %v6152_v53  ;;  %v6692_v59 = vpop.f32.mrb[17].mxu1 }
 0x717   :  { %v6161_v14 = vmul.f32 1.442695, %v8213_v58 }
 0x719   :  { %8267 = vpow2.f32 %v6161_v14 }
 0x723   :  { %v8268_v33 = vpop.eup %8267 }
 0x724   :  { %v6163_v32 = vsel %vm6160_vm4, %v8268_v33, %v8213_v58 }
 0x725   :  { %6164 = vst [vmem:[%s12549_s7] sm:$0xff] %v6163_v32 }

</bundles_post_ra>
